<compile_context>
chip_gen: v7x
topology: tpu7x:2x2x1
jax: 0.10.0
libtpu: 0.0.40
codegen_flags: <defaults>
</compile_context>

<pallas_src>
import functools

import jax
import jax.numpy as jnp
from jax import lax
from jax.experimental import pallas as pl
from jax.experimental.pallas import tpu as pltpu


# ----------------------------- traced helpers --------------------------------

def _l2n(x, eps=1e-12):
    # matches Prompt.l2_normalize: x * rsqrt(max(sum(x^2), eps))
    sq = jnp.sum(x * x, axis=-1, keepdims=True)
    return x * lax.rsqrt(jnp.maximum(sq, eps))


# ----------------------------- fused kernel ----------------------------------

def _prompt_kernel(x_ref, dep_ref, q_ref, pn_ref, wkv_ref, bkv_ref,
                   wp_ref, bp_ref, o_ref, sim_ref, dn_ref,
                   *, num_heads, scale):
    # x:   (BB, N, C)   x_embed batch block (f32)
    # dep: (BB, M, C)   depth_feature batch block (f32)
    # q:   (Ng, C)      hoisted, batch-invariant q projection (bf16)
    # pn:  (P, C)       l2-normalized prompt keys (f32)
    # wkv: (C, 2C) bf16, bkv: (1, 2C) f32, wp: (C, C) bf16, bp: (1, C) f32
    BB, _, C = x_ref.shape
    M = dep_ref.shape[1]
    Ng = q_ref.shape[0]
    D = C // num_heads

    # --- per-batch-block embedding stats (fused; no separate launch) --------
    x_mean = jnp.mean(x_ref[...], axis=1)                       # (BB, C)
    xn = _l2n(x_mean)
    sim_ref[...] = lax.dot_general(                             # (BB, P)
        xn, pn_ref[...], (((1,), (1,)), ((), ())),
        preferred_element_type=jnp.float32)
    dep = dep_ref[...]                                          # (BB, M, C)
    dn_ref[...] = _l2n(jnp.mean(dep, axis=1))                   # (BB, C)

    # --- kv projection: one batched matmul over the whole batch block -------
    dep2d = dep.reshape(BB * M, C).astype(jnp.bfloat16)
    kv = jnp.dot(dep2d, wkv_ref[...],
                 preferred_element_type=jnp.float32) + bkv_ref[...]  # (BB*M, 2C)

    q = q_ref[...]                                              # (Ng, C) bf16

    # --- attention: per-(batch, head) dots, all values kept in vregs --------
    # PyTorch kv.reshape(B, M, 2, H, D): lanes [0:C) are K, [C:2C) are V,
    # head h occupies lane sub-range [h*D, (h+1)*D) in each.
    outs = []
    for b in range(BB):
        kvb = kv[b * M:(b + 1) * M, :]                          # (M, 2C) f32
        heads = []
        for h in range(num_heads):
            qh = q[:, h * D:(h + 1) * D]                                 # (Ng, D)
            kh = kvb[:, h * D:(h + 1) * D].astype(jnp.bfloat16)          # (M, D)
            vh = kvb[:, C + h * D:C + (h + 1) * D].astype(jnp.bfloat16)  # (M, D)
            s = lax.dot_general(qh, kh, (((1,), (1,)), ((), ())),
                                preferred_element_type=jnp.float32) * scale
            m = jnp.max(s, axis=-1, keepdims=True)
            p = jnp.exp(s - m)                                  # f32 softmax
            denom = jnp.sum(p, axis=-1, keepdims=True)
            attn = p * pl.reciprocal(denom, approx=True)
            heads.append(jnp.dot(attn.astype(jnp.bfloat16), vh,
                                 preferred_element_type=jnp.float32))
        # lane-concat head outputs -> (Ng, C); no VMEM scratch round trip
        outs.append(jnp.concatenate(heads, axis=-1))

    o_all = jnp.concatenate(outs, axis=0)                       # (BB*Ng, C)
    proj = jnp.dot(o_all.astype(jnp.bfloat16), wp_ref[...],
                   preferred_element_type=jnp.float32) + bp_ref[...]
    for b in range(BB):                                         # dense (Ng,C) stores
        o_ref[b] = proj[b * Ng:(b + 1) * Ng, :]
    # attn_drop / proj_drop have p=0.0 -> identity


def fused_prompt_attention(params, x_embed, depth_feature, prompt_norm, *,
                           num_heads, batch_block=8):
    """One launch: stats (mean/l2/similarity) + Attention_cross(g_prompt, dep)."""
    g_prompt = params["g_prompt"]                       # (1, Ng, C)
    _, Ng, C = g_prompt.shape
    B, N, _ = x_embed.shape
    M = depth_feature.shape[1]
    P = prompt_norm.shape[0]
    D = C // num_heads
    scale = float(D) ** -0.5

    BB = min(B, batch_block)
    assert B % BB == 0, "batch must divide evenly into batch blocks"
    grid = (B // BB,)

    # Batch-invariant work hoisted out of the grid (computed once by XLA):
    q_g = (jnp.dot(g_prompt[0], params["wq"], preferred_element_type=jnp.float32)
           + params["bq"][None, :]).astype(jnp.bfloat16)          # (Ng, C)
    wkv = params["wkv"].astype(jnp.bfloat16)
    wproj = params["wproj"].astype(jnp.bfloat16)
    bkv = params["bkv"].reshape(1, 2 * C)
    bproj = params["bproj"].reshape(1, C)

    kernel = functools.partial(_prompt_kernel, num_heads=num_heads, scale=scale)
    attn_out, similarity, depth_norm = pl.pallas_call(
        kernel,
        grid=grid,
        in_specs=[
            pl.BlockSpec((BB, N, C), lambda i: (i, 0, 0)),   # x_embed block
            pl.BlockSpec((BB, M, C), lambda i: (i, 0, 0)),   # depth_feature block
            pl.BlockSpec((Ng, C), lambda i: (0, 0)),         # hoisted q (bf16)
            pl.BlockSpec((P, C), lambda i: (0, 0)),          # prompt_norm
            pl.BlockSpec((C, 2 * C), lambda i: (0, 0)),      # wkv (bf16)
            pl.BlockSpec((1, 2 * C), lambda i: (0, 0)),      # bkv
            pl.BlockSpec((C, C), lambda i: (0, 0)),          # wproj (bf16)
            pl.BlockSpec((1, C), lambda i: (0, 0)),          # bproj
        ],
        out_specs=(
            pl.BlockSpec((BB, Ng, C), lambda i: (i, 0, 0)),  # attention output
            pl.BlockSpec((BB, P), lambda i: (i, 0)),         # similarity
            pl.BlockSpec((BB, C), lambda i: (i, 0)),         # depth_feature_norm
        ),
        out_shape=(
            jax.ShapeDtypeStruct((B, Ng, C), jnp.float32),
            jax.ShapeDtypeStruct((B, P), jnp.float32),
            jax.ShapeDtypeStruct((B, C), jnp.float32),
        ),
        compiler_params=pltpu.CompilerParams(
            dimension_semantics=("parallel",),               # batch blocks are independent
            vmem_limit_bytes=32 * 1024 * 1024),
    )(x_embed, depth_feature, q_g, prompt_norm, wkv, bkv, wproj, bproj)
    return attn_out, similarity, depth_norm


# ----------------------------- module glue (plain JAX, fused by jit) ----------

def init_params(key, *, embed_dim, length, length_g, pool_size):
    C = embed_dim
    ks = jax.random.split(key, 10)
    lim = 1.0 / (C ** 0.5)
    xav = (6.0 / (length_g * C + C)) ** 0.5

    def unif(k, shape, a, b):
        return jax.random.uniform(k, shape, jnp.float32, a, b)

    return dict(
        g_prompt=unif(ks[0], (1, length_g, C), -xav, xav),   # xavier_uniform-ish
        prompt_key_g=unif(ks[1], (1, C), -1.0, 1.0),
        prompt=unif(ks[2], (pool_size, length, C), -1.0, 1.0),
        prompt_key=unif(ks[3], (pool_size, C), -1.0, 1.0),
        wq=unif(ks[4], (C, C), -lim, lim),
        bq=unif(ks[5], (C,), -lim, lim),
        wkv=unif(ks[6], (C, 2 * C), -lim, lim),
        bkv=unif(ks[7], (2 * C,), -lim, lim),
        wproj=unif(ks[8], (C, C), -lim, lim),
        bproj=unif(ks[9], (C,), -lim, lim),
        # matches reference: prompt_frequency_table = zeros(pool_size)
        freq_table=jnp.zeros((pool_size,), jnp.float32),
    )


def prompt_forward(params, x_embed, depth_feature, *, num_heads, length_g,
                   top_k, prompt_mask=None, reverse=False):
    B = x_embed.shape[0]
    P = params["prompt_key"].shape[0]

    # batch-invariant norms (tiny) stay in XLA
    prompt_norm = _l2n(params["prompt_key"])            # (P, C)
    g_prompt_norm = _l2n(params["prompt_key_g"])        # (1, C)

    # --- single fused Pallas launch: stats + cross-attention ------------------
    g_attn, similarity, depth_feature_norm = fused_prompt_attention(
        params, x_embed, depth_feature, prompt_norm, num_heads=num_heads)

    # --- prompt selection (tiny (B,P) tensors -> leave to XLA) ----------------
    freq_table = params["freq_table"]
    if prompt_mask is None:
        # reference: penalties = table / table.max(); guard the fresh-table 0/0
        # (torch would yield NaN there) by treating an all-zero table as "no
        # penalty".
        penalties = freq_table / jnp.maximum(jnp.max(freq_table), 1.0)
        adjusted = similarity - penalties[None, :]
        _, idx = lax.top_k(adjusted, top_k)
        _, idx_reverse = lax.top_k(-adjusted, top_k)
        # functional version of update_frequency_table(idx.view(-1))
        new_freq_table = freq_table + jnp.sum(
            jax.nn.one_hot(idx.reshape(-1), P, dtype=freq_table.dtype), axis=0)
        # TODO(synk): batchwise_prompt unique/topk re-selection not implemented
        # (batchwise_prompt=False in this configuration).
    else:
        idx = prompt_mask
        idx_reverse = prompt_mask
        new_freq_table = freq_table
    if reverse:
        idx = idx_reverse

    # --- gather selected prompts (small XLA gathers) ---------------------------
    batched_prompt_raw = jnp.take(params["prompt"], idx, axis=0)   # (B, K, L, C)
    Bk, K, L, C = batched_prompt_raw.shape
    batched_prompt_e = batched_prompt_raw.reshape(Bk, K * L, C)
    batched_key_norm = jnp.take(prompt_norm, idx, axis=0)          # (B, K, C)

    batched_prompt = jnp.concatenate([g_attn, batched_prompt_e], axis=1)

    # --- prompt loss (scalar; XLA fuses this trivially) -----------------------
    gvec = g_prompt_norm[0]                                        # (C,)
    sim_g_e = jnp.einsum("bkc,c->bk", batched_key_norm, gvec)      # (B, K)
    sim_g_dep = jnp.einsum("c,bc->b", gvec, depth_feature_norm)    # (B,)
    loss = (jnp.sum((1.0 - sim_g_dep) ** 2)
            - jnp.sum((1.0 - sim_g_e) ** 2)) / B

    return {
        "selected_key": batched_key_norm,
        "prompt_loss": loss,
        "total_prompt_len": batched_prompt.shape[1],
        "prompted_embedding_e": batched_prompt[:, length_g:, :],
        "prompted_embedding_g": batched_prompt[:, :length_g, :],
        "prompt_frequency_table": new_freq_table,
    }


# ----------------------------- demo ------------------------------------------

if __name__ == "__main__":
    B, N, C = 2, 8, 64          # batch, x_embed seq, embed_dim
    H = 8                       # num_heads (head_dim = 8)
    length, length_g = 5, 20
    pool_size, top_k = 8, 2
    Nd = 16                     # depth_feature (guidance) seq length

    key = jax.random.PRNGKey(0)
    kp, kx, kd = jax.random.split(key, 3)
    params = init_params(kp, embed_dim=C, length=length,
                         length_g=length_g, pool_size=pool_size)
    x_embed = jax.random.normal(kx, (B, N, C), jnp.float32)
    depth_feature = jax.random.normal(kd, (B, Nd, C), jnp.float32)

    fwd = jax.jit(functools.partial(prompt_forward, num_heads=H,
                                    length_g=length_g, top_k=top_k))
    out = fwd(params, x_embed, depth_feature)

    jax.block_until_ready((out["prompt_loss"], out["selected_key"],
                           out["prompted_embedding_e"],
                           out["prompted_embedding_g"],
                           out["prompt_frequency_table"]))

    assert int(out["total_prompt_len"]) == length_g + top_k * length
    assert out["prompted_embedding_g"].shape == (B, length_g, C)
    assert out["prompted_embedding_e"].shape == (B, top_k * length, C)
    assert out["selected_key"].shape == (B, top_k, C)
    assert out["prompt_frequency_table"].shape == (pool_size,)
    assert bool(jnp.isfinite(out["prompt_loss"]))
    print("KERNEL_OK")
</pallas_src>

<mosaic_0001>
module attributes {stable_mosaic.version = 11 : i64} {
  func.func @_prompt_kernel(%arg0: i32, %arg1: memref<2x8x64xf32, #tpu.memory_space<vmem>>, %arg2: memref<2x16x64xf32, #tpu.memory_space<vmem>>, %arg3: memref<20x64xbf16, #tpu.memory_space<vmem>>, %arg4: memref<8x64xf32, #tpu.memory_space<vmem>>, %arg5: memref<64x128xbf16, #tpu.memory_space<vmem>>, %arg6: memref<1x128xf32, #tpu.memory_space<vmem>>, %arg7: memref<64x64xbf16, #tpu.memory_space<vmem>>, %arg8: memref<1x64xf32, #tpu.memory_space<vmem>>, %arg9: memref<2x20x64xf32, #tpu.memory_space<vmem>>, %arg10: memref<2x8xf32, #tpu.memory_space<vmem>>, %arg11: memref<2x64xf32, #tpu.memory_space<vmem>>) attributes {dimension_semantics = [#tpu.dimension_semantics<parallel>], iteration_bounds = array<i64: 1>, scalar_prefetch = 0 : i64, scratch_operands = 0 : i64, tpu.core_type = #tpu.core_type<tc>, window_params = [{transform_indices = @transform_0, window_bounds = array<i64: 2, 8, 64>}, {transform_indices = @transform_1, window_bounds = array<i64: 2, 16, 64>}, {pipeline_mode = #tpu.pipeline_mode<synchronous>, transform_indices = @transform_2, window_bounds = array<i64: 20, 64>}, {pipeline_mode = #tpu.pipeline_mode<synchronous>, transform_indices = @transform_3, window_bounds = array<i64: 8, 64>}, {pipeline_mode = #tpu.pipeline_mode<synchronous>, transform_indices = @transform_4, window_bounds = array<i64: 64, 128>}, {pipeline_mode = #tpu.pipeline_mode<synchronous>, transform_indices = @transform_5, window_bounds = array<i64: 1, 128>}, {pipeline_mode = #tpu.pipeline_mode<synchronous>, transform_indices = @transform_6, window_bounds = array<i64: 64, 64>}, {pipeline_mode = #tpu.pipeline_mode<synchronous>, transform_indices = @transform_7, window_bounds = array<i64: 1, 64>}, {transform_indices = @transform_8, window_bounds = array<i64: 2, 20, 64>}, {transform_indices = @transform_9, window_bounds = array<i64: 2, 8>}, {transform_indices = @transform_10, window_bounds = array<i64: 2, 64>}]} {
    %c0 = arith.constant 0 : index
    %c0_0 = arith.constant 0 : index
    %c0_1 = arith.constant 0 : index
    %0 = vector.load %arg1[%c0, %c0_0, %c0_1] : memref<2x8x64xf32, #tpu.memory_space<vmem>>, vector<2x8x64xf32>
    %cst = arith.constant dense<0.000000e+00> : vector<2x64xf32>
    %1 = vector.multi_reduction <add>, %0, %cst [1] : vector<2x8x64xf32> to vector<2x64xf32>
    %cst_2 = arith.constant 8.000000e+00 : f32
    %2 = vector.broadcast %cst_2 : f32 to vector<2x64xf32>
    %3 = arith.divf %1, %2 : vector<2x64xf32>
    %4 = arith.mulf %3, %3 : vector<2x64xf32>
    %cst_3 = arith.constant dense<0.000000e+00> : vector<2xf32>
    %5 = vector.multi_reduction <add>, %4, %cst_3 [1] : vector<2x64xf32> to vector<2xf32>
    %6 = vector.shape_cast %5 : vector<2xf32> to vector<2x1xf32>
    %cst_4 = arith.constant 9.99999996E-13 : f32
    %7 = vector.broadcast %cst_4 : f32 to vector<2x1xf32>
    %8 = arith.maximumf %6, %7 : vector<2x1xf32>
    %9 = math.rsqrt %8 : vector<2x1xf32>
    %10 = vector.broadcast %9 : vector<2x1xf32> to vector<2x64xf32>
    %11 = arith.mulf %3, %10 : vector<2x64xf32>
    %c0_5 = arith.constant 0 : index
    %c0_6 = arith.constant 0 : index
    %12 = vector.load %arg4[%c0_5, %c0_6] : memref<8x64xf32, #tpu.memory_space<vmem>>, vector<8x64xf32>
    %cst_7 = arith.constant dense<0.000000e+00> : vector<2x8xf32>
    %13 = tpu.matmul %11, %12, %cst_7 {dimension_numbers = #tpu.dot_dimension_numbers<[1], [1], [0], [0], [0, 0, 1, 0], [], []>} : vector<2x64xf32>, vector<8x64xf32>, vector<2x8xf32> -> vector<2x8xf32>
    %c0_8 = arith.constant 0 : index
    %c0_9 = arith.constant 0 : index
    %14 = vector.load %arg10[%c0_8, %c0_9] : memref<2x8xf32, #tpu.memory_space<vmem>>, vector<2x8xf32>
    tpu.vector_store %arg10[%c0_8, %c0_9], %13 {strides = array<i32>} : memref<2x8xf32, #tpu.memory_space<vmem>>, vector<2x8xf32>,
    %c0_10 = arith.constant 0 : index
    %c0_11 = arith.constant 0 : index
    %c0_12 = arith.constant 0 : index
    %15 = vector.load %arg2[%c0_10, %c0_11, %c0_12] : memref<2x16x64xf32, #tpu.memory_space<vmem>>, vector<2x16x64xf32>
    %cst_13 = arith.constant dense<0.000000e+00> : vector<2x64xf32>
    %16 = vector.multi_reduction <add>, %15, %cst_13 [1] : vector<2x16x64xf32> to vector<2x64xf32>
    %cst_14 = arith.constant 1.600000e+01 : f32
    %17 = vector.broadcast %cst_14 : f32 to vector<2x64xf32>
    %18 = arith.divf %16, %17 : vector<2x64xf32>
    %19 = arith.mulf %18, %18 : vector<2x64xf32>
    %cst_15 = arith.constant dense<0.000000e+00> : vector<2xf32>
    %20 = vector.multi_reduction <add>, %19, %cst_15 [1] : vector<2x64xf32> to vector<2xf32>
    %21 = vector.shape_cast %20 : vector<2xf32> to vector<2x1xf32>
    %cst_16 = arith.constant 9.99999996E-13 : f32
    %22 = vector.broadcast %cst_16 : f32 to vector<2x1xf32>
    %23 = arith.maximumf %21, %22 : vector<2x1xf32>
    %24 = math.rsqrt %23 : vector<2x1xf32>
    %25 = vector.broadcast %24 : vector<2x1xf32> to vector<2x64xf32>
    %26 = arith.mulf %18, %25 : vector<2x64xf32>
    %c0_17 = arith.constant 0 : index
    %c0_18 = arith.constant 0 : index
    %27 = vector.load %arg11[%c0_17, %c0_18] : memref<2x64xf32, #tpu.memory_space<vmem>>, vector<2x64xf32>
    tpu.vector_store %arg11[%c0_17, %c0_18], %26 {strides = array<i32>} : memref<2x64xf32, #tpu.memory_space<vmem>>, vector<2x64xf32>,
    %28 = vector.shape_cast %15 : vector<2x16x64xf32> to vector<32x64xf32>
    %29 = arith.truncf %28 : vector<32x64xf32> to vector<32x64xbf16>
    %c0_19 = arith.constant 0 : index
    %c0_20 = arith.constant 0 : index
    %30 = vector.load %arg5[%c0_19, %c0_20] : memref<64x128xbf16, #tpu.memory_space<vmem>>, vector<64x128xbf16>
    %cst_21 = arith.constant dense<0.000000e+00> : vector<32x128xf32>
    %31 = tpu.matmul %29, %30, %cst_21 {dimension_numbers = #tpu.dot_dimension_numbers<[1], [0], [0], [1], [0, 0, 1, 1], [], []>} : vector<32x64xbf16>, vector<64x128xbf16>, vector<32x128xf32> -> vector<32x128xf32>
    %c0_22 = arith.constant 0 : index
    %c0_23 = arith.constant 0 : index
    %32 = vector.load %arg6[%c0_22, %c0_23] : memref<1x128xf32, #tpu.memory_space<vmem>>, vector<1x128xf32>
    %33 = vector.broadcast %32 : vector<1x128xf32> to vector<32x128xf32>
    %34 = arith.addf %31, %33 : vector<32x128xf32>
    %c0_24 = arith.constant 0 : index
    %c0_25 = arith.constant 0 : index
    %35 = vector.load %arg3[%c0_24, %c0_25] : memref<20x64xbf16, #tpu.memory_space<vmem>>, vector<20x64xbf16>
    %36 = vector.extract_strided_slice %34 {offsets = [0, 0], sizes = [16, 128], strides = [1, 1]} : vector<32x128xf32> to vector<16x128xf32>
    %37 = vector.extract_strided_slice %35 {offsets = [0, 0], sizes = [20, 8], strides = [1, 1]} : vector<20x64xbf16> to vector<20x8xbf16>
    %38 = vector.extract_strided_slice %36 {offsets = [0, 0], sizes = [16, 8], strides = [1, 1]} : vector<16x128xf32> to vector<16x8xf32>
    %39 = arith.truncf %38 : vector<16x8xf32> to vector<16x8xbf16>
    %40 = vector.extract_strided_slice %36 {offsets = [0, 64], sizes = [16, 8], strides = [1, 1]} : vector<16x128xf32> to vector<16x8xf32>
    %41 = arith.truncf %40 : vector<16x8xf32> to vector<16x8xbf16>
    %cst_26 = arith.constant dense<0.000000e+00> : vector<20x16xf32>
    %42 = tpu.matmul %37, %39, %cst_26 {dimension_numbers = #tpu.dot_dimension_numbers<[1], [1], [0], [0], [0, 0, 1, 0], [], []>} : vector<20x8xbf16>, vector<16x8xbf16>, vector<20x16xf32> -> vector<20x16xf32>
    %cst_27 = arith.constant 0.353553385 : f32
    %43 = vector.broadcast %cst_27 : f32 to vector<20x16xf32>
    %44 = arith.mulf %42, %43 : vector<20x16xf32>
    %cst_28 = arith.constant dense<0xFF800000> : vector<20xf32>
    %45 = vector.multi_reduction <maximumf>, %44, %cst_28 [1] : vector<20x16xf32> to vector<20xf32>
    %46 = vector.shape_cast %45 : vector<20xf32> to vector<20x1xf32>
    %47 = vector.broadcast %46 : vector<20x1xf32> to vector<20x16xf32>
    %48 = arith.subf %44, %47 : vector<20x16xf32>
    %49 = math.exp %48 : vector<20x16xf32>
    %cst_29 = arith.constant dense<0.000000e+00> : vector<20xf32>
    %50 = vector.multi_reduction <add>, %49, %cst_29 [1] : vector<20x16xf32> to vector<20xf32>
    %51 = vector.shape_cast %50 : vector<20xf32> to vector<20x1xf32>
    %52 = tpu.reciprocal %51 {approx = true} : vector<20x1xf32> -> vector<20x1xf32>
    %53 = vector.broadcast %52 : vector<20x1xf32> to vector<20x16xf32>
    %54 = arith.mulf %49, %53 : vector<20x16xf32>
    %55 = arith.truncf %54 : vector<20x16xf32> to vector<20x16xbf16>
    %cst_30 = arith.constant dense<0.000000e+00> : vector<20x8xf32>
    %56 = tpu.matmul %55, %41, %cst_30 {dimension_numbers = #tpu.dot_dimension_numbers<[1], [0], [0], [1], [0, 0, 1, 1], [], []>} : vector<20x16xbf16>, vector<16x8xbf16>, vector<20x8xf32> -> vector<20x8xf32>
    %57 = vector.extract_strided_slice %35 {offsets = [0, 8], sizes = [20, 8], strides = [1, 1]} : vector<20x64xbf16> to vector<20x8xbf16>
    %58 = vector.extract_strided_slice %36 {offsets = [0, 8], sizes = [16, 8], strides = [1, 1]} : vector<16x128xf32> to vector<16x8xf32>
    %59 = arith.truncf %58 : vector<16x8xf32> to vector<16x8xbf16>
    %60 = vector.extract_strided_slice %36 {offsets = [0, 72], sizes = [16, 8], strides = [1, 1]} : vector<16x128xf32> to vector<16x8xf32>
    %61 = arith.truncf %60 : vector<16x8xf32> to vector<16x8xbf16>
    %cst_31 = arith.constant dense<0.000000e+00> : vector<20x16xf32>
    %62 = tpu.matmul %57, %59, %cst_31 {dimension_numbers = #tpu.dot_dimension_numbers<[1], [1], [0], [0], [0, 0, 1, 0], [], []>} : vector<20x8xbf16>, vector<16x8xbf16>, vector<20x16xf32> -> vector<20x16xf32>
    %cst_32 = arith.constant 0.353553385 : f32
    %63 = vector.broadcast %cst_32 : f32 to vector<20x16xf32>
    %64 = arith.mulf %62, %63 : vector<20x16xf32>
    %cst_33 = arith.constant dense<0xFF800000> : vector<20xf32>
    %65 = vector.multi_reduction <maximumf>, %64, %cst_33 [1] : vector<20x16xf32> to vector<20xf32>
    %66 = vector.shape_cast %65 : vector<20xf32> to vector<20x1xf32>
    %67 = vector.broadcast %66 : vector<20x1xf32> to vector<20x16xf32>
    %68 = arith.subf %64, %67 : vector<20x16xf32>
    %69 = math.exp %68 : vector<20x16xf32>
    %cst_34 = arith.constant dense<0.000000e+00> : vector<20xf32>
    %70 = vector.multi_reduction <add>, %69, %cst_34 [1] : vector<20x16xf32> to vector<20xf32>
    %71 = vector.shape_cast %70 : vector<20xf32> to vector<20x1xf32>
    %72 = tpu.reciprocal %71 {approx = true} : vector<20x1xf32> -> vector<20x1xf32>
    %73 = vector.broadcast %72 : vector<20x1xf32> to vector<20x16xf32>
    %74 = arith.mulf %69, %73 : vector<20x16xf32>
    %75 = arith.truncf %74 : vector<20x16xf32> to vector<20x16xbf16>
    %cst_35 = arith.constant dense<0.000000e+00> : vector<20x8xf32>
    %76 = tpu.matmul %75, %61, %cst_35 {dimension_numbers = #tpu.dot_dimension_numbers<[1], [0], [0], [1], [0, 0, 1, 1], [], []>} : vector<20x16xbf16>, vector<16x8xbf16>, vector<20x8xf32> -> vector<20x8xf32>
    %77 = vector.extract_strided_slice %35 {offsets = [0, 16], sizes = [20, 8], strides = [1, 1]} : vector<20x64xbf16> to vector<20x8xbf16>
    %78 = vector.extract_strided_slice %36 {offsets = [0, 16], sizes = [16, 8], strides = [1, 1]} : vector<16x128xf32> to vector<16x8xf32>
    %79 = arith.truncf %78 : vector<16x8xf32> to vector<16x8xbf16>
    %80 = vector.extract_strided_slice %36 {offsets = [0, 80], sizes = [16, 8], strides = [1, 1]} : vector<16x128xf32> to vector<16x8xf32>
    %81 = arith.truncf %80 : vector<16x8xf32> to vector<16x8xbf16>
    %cst_36 = arith.constant dense<0.000000e+00> : vector<20x16xf32>
    %82 = tpu.matmul %77, %79, %cst_36 {dimension_numbers = #tpu.dot_dimension_numbers<[1], [1], [0], [0], [0, 0, 1, 0], [], []>} : vector<20x8xbf16>, vector<16x8xbf16>, vector<20x16xf32> -> vector<20x16xf32>
    %cst_37 = arith.constant 0.353553385 : f32
    %83 = vector.broadcast %cst_37 : f32 to vector<20x16xf32>
    %84 = arith.mulf %82, %83 : vector<20x16xf32>
    %cst_38 = arith.constant dense<0xFF800000> : vector<20xf32>
    %85 = vector.multi_reduction <maximumf>, %84, %cst_38 [1] : vector<20x16xf32> to vector<20xf32>
    %86 = vector.shape_cast %85 : vector<20xf32> to vector<20x1xf32>
    %87 = vector.broadcast %86 : vector<20x1xf32> to vector<20x16xf32>
    %88 = arith.subf %84, %87 : vector<20x16xf32>
    %89 = math.exp %88 : vector<20x16xf32>
    %cst_39 = arith.constant dense<0.000000e+00> : vector<20xf32>
    %90 = vector.multi_reduction <add>, %89, %cst_39 [1] : vector<20x16xf32> to vector<20xf32>
    %91 = vector.shape_cast %90 : vector<20xf32> to vector<20x1xf32>
    %92 = tpu.reciprocal %91 {approx = true} : vector<20x1xf32> -> vector<20x1xf32>
    %93 = vector.broadcast %92 : vector<20x1xf32> to vector<20x16xf32>
    %94 = arith.mulf %89, %93 : vector<20x16xf32>
    %95 = arith.truncf %94 : vector<20x16xf32> to vector<20x16xbf16>
    %cst_40 = arith.constant dense<0.000000e+00> : vector<20x8xf32>
    %96 = tpu.matmul %95, %81, %cst_40 {dimension_numbers = #tpu.dot_dimension_numbers<[1], [0], [0], [1], [0, 0, 1, 1], [], []>} : vector<20x16xbf16>, vector<16x8xbf16>, vector<20x8xf32> -> vector<20x8xf32>
    %97 = vector.extract_strided_slice %35 {offsets = [0, 24], sizes = [20, 8], strides = [1, 1]} : vector<20x64xbf16> to vector<20x8xbf16>
    %98 = vector.extract_strided_slice %36 {offsets = [0, 24], sizes = [16, 8], strides = [1, 1]} : vector<16x128xf32> to vector<16x8xf32>
    %99 = arith.truncf %98 : vector<16x8xf32> to vector<16x8xbf16>
    %100 = vector.extract_strided_slice %36 {offsets = [0, 88], sizes = [16, 8], strides = [1, 1]} : vector<16x128xf32> to vector<16x8xf32>
    %101 = arith.truncf %100 : vector<16x8xf32> to vector<16x8xbf16>
    %cst_41 = arith.constant dense<0.000000e+00> : vector<20x16xf32>
    %102 = tpu.matmul %97, %99, %cst_41 {dimension_numbers = #tpu.dot_dimension_numbers<[1], [1], [0], [0], [0, 0, 1, 0], [], []>} : vector<20x8xbf16>, vector<16x8xbf16>, vector<20x16xf32> -> vector<20x16xf32>
    %cst_42 = arith.constant 0.353553385 : f32
    %103 = vector.broadcast %cst_42 : f32 to vector<20x16xf32>
    %104 = arith.mulf %102, %103 : vector<20x16xf32>
    %cst_43 = arith.constant dense<0xFF800000> : vector<20xf32>
    %105 = vector.multi_reduction <maximumf>, %104, %cst_43 [1] : vector<20x16xf32> to vector<20xf32>
    %106 = vector.shape_cast %105 : vector<20xf32> to vector<20x1xf32>
    %107 = vector.broadcast %106 : vector<20x1xf32> to vector<20x16xf32>
    %108 = arith.subf %104, %107 : vector<20x16xf32>
    %109 = math.exp %108 : vector<20x16xf32>
    %cst_44 = arith.constant dense<0.000000e+00> : vector<20xf32>
    %110 = vector.multi_reduction <add>, %109, %cst_44 [1] : vector<20x16xf32> to vector<20xf32>
    %111 = vector.shape_cast %110 : vector<20xf32> to vector<20x1xf32>
    %112 = tpu.reciprocal %111 {approx = true} : vector<20x1xf32> -> vector<20x1xf32>
    %113 = vector.broadcast %112 : vector<20x1xf32> to vector<20x16xf32>
    %114 = arith.mulf %109, %113 : vector<20x16xf32>
    %115 = arith.truncf %114 : vector<20x16xf32> to vector<20x16xbf16>
    %cst_45 = arith.constant dense<0.000000e+00> : vector<20x8xf32>
    %116 = tpu.matmul %115, %101, %cst_45 {dimension_numbers = #tpu.dot_dimension_numbers<[1], [0], [0], [1], [0, 0, 1, 1], [], []>} : vector<20x16xbf16>, vector<16x8xbf16>, vector<20x8xf32> -> vector<20x8xf32>
    %117 = vector.extract_strided_slice %35 {offsets = [0, 32], sizes = [20, 8], strides = [1, 1]} : vector<20x64xbf16> to vector<20x8xbf16>
    %118 = vector.extract_strided_slice %36 {offsets = [0, 32], sizes = [16, 8], strides = [1, 1]} : vector<16x128xf32> to vector<16x8xf32>
    %119 = arith.truncf %118 : vector<16x8xf32> to vector<16x8xbf16>
    %120 = vector.extract_strided_slice %36 {offsets = [0, 96], sizes = [16, 8], strides = [1, 1]} : vector<16x128xf32> to vector<16x8xf32>
    %121 = arith.truncf %120 : vector<16x8xf32> to vector<16x8xbf16>
    %cst_46 = arith.constant dense<0.000000e+00> : vector<20x16xf32>
    %122 = tpu.matmul %117, %119, %cst_46 {dimension_numbers = #tpu.dot_dimension_numbers<[1], [1], [0], [0], [0, 0, 1, 0], [], []>} : vector<20x8xbf16>, vector<16x8xbf16>, vector<20x16xf32> -> vector<20x16xf32>
    %cst_47 = arith.constant 0.353553385 : f32
    %123 = vector.broadcast %cst_47 : f32 to vector<20x16xf32>
    %124 = arith.mulf %122, %123 : vector<20x16xf32>
    %cst_48 = arith.constant dense<0xFF800000> : vector<20xf32>
    %125 = vector.multi_reduction <maximumf>, %124, %cst_48 [1] : vector<20x16xf32> to vector<20xf32>
    %126 = vector.shape_cast %125 : vector<20xf32> to vector<20x1xf32>
    %127 = vector.broadcast %126 : vector<20x1xf32> to vector<20x16xf32>
    %128 = arith.subf %124, %127 : vector<20x16xf32>
    %129 = math.exp %128 : vector<20x16xf32>
    %cst_49 = arith.constant dense<0.000000e+00> : vector<20xf32>
    %130 = vector.multi_reduction <add>, %129, %cst_49 [1] : vector<20x16xf32> to vector<20xf32>
    %131 = vector.shape_cast %130 : vector<20xf32> to vector<20x1xf32>
    %132 = tpu.reciprocal %131 {approx = true} : vector<20x1xf32> -> vector<20x1xf32>
    %133 = vector.broadcast %132 : vector<20x1xf32> to vector<20x16xf32>
    %134 = arith.mulf %129, %133 : vector<20x16xf32>
    %135 = arith.truncf %134 : vector<20x16xf32> to vector<20x16xbf16>
    %cst_50 = arith.constant dense<0.000000e+00> : vector<20x8xf32>
    %136 = tpu.matmul %135, %121, %cst_50 {dimension_numbers = #tpu.dot_dimension_numbers<[1], [0], [0], [1], [0, 0, 1, 1], [], []>} : vector<20x16xbf16>, vector<16x8xbf16>, vector<20x8xf32> -> vector<20x8xf32>
    %137 = vector.extract_strided_slice %35 {offsets = [0, 40], sizes = [20, 8], strides = [1, 1]} : vector<20x64xbf16> to vector<20x8xbf16>
    %138 = vector.extract_strided_slice %36 {offsets = [0, 40], sizes = [16, 8], strides = [1, 1]} : vector<16x128xf32> to vector<16x8xf32>
    %139 = arith.truncf %138 : vector<16x8xf32> to vector<16x8xbf16>
    %140 = vector.extract_strided_slice %36 {offsets = [0, 104], sizes = [16, 8], strides = [1, 1]} : vector<16x128xf32> to vector<16x8xf32>
    %141 = arith.truncf %140 : vector<16x8xf32> to vector<16x8xbf16>
    %cst_51 = arith.constant dense<0.000000e+00> : vector<20x16xf32>
    %142 = tpu.matmul %137, %139, %cst_51 {dimension_numbers = #tpu.dot_dimension_numbers<[1], [1], [0], [0], [0, 0, 1, 0], [], []>} : vector<20x8xbf16>, vector<16x8xbf16>, vector<20x16xf32> -> vector<20x16xf32>
    %cst_52 = arith.constant 0.353553385 : f32
    %143 = vector.broadcast %cst_52 : f32 to vector<20x16xf32>
    %144 = arith.mulf %142, %143 : vector<20x16xf32>
    %cst_53 = arith.constant dense<0xFF800000> : vector<20xf32>
    %145 = vector.multi_reduction <maximumf>, %144, %cst_53 [1] : vector<20x16xf32> to vector<20xf32>
    %146 = vector.shape_cast %145 : vector<20xf32> to vector<20x1xf32>
    %147 = vector.broadcast %146 : vector<20x1xf32> to vector<20x16xf32>
    %148 = arith.subf %144, %147 : vector<20x16xf32>
    %149 = math.exp %148 : vector<20x16xf32>
    %cst_54 = arith.constant dense<0.000000e+00> : vector<20xf32>
    %150 = vector.multi_reduction <add>, %149, %cst_54 [1] : vector<20x16xf32> to vector<20xf32>
    %151 = vector.shape_cast %150 : vector<20xf32> to vector<20x1xf32>
    %152 = tpu.reciprocal %151 {approx = true} : vector<20x1xf32> -> vector<20x1xf32>
    %153 = vector.broadcast %152 : vector<20x1xf32> to vector<20x16xf32>
    %154 = arith.mulf %149, %153 : vector<20x16xf32>
    %155 = arith.truncf %154 : vector<20x16xf32> to vector<20x16xbf16>
    %cst_55 = arith.constant dense<0.000000e+00> : vector<20x8xf32>
    %156 = tpu.matmul %155, %141, %cst_55 {dimension_numbers = #tpu.dot_dimension_numbers<[1], [0], [0], [1], [0, 0, 1, 1], [], []>} : vector<20x16xbf16>, vector<16x8xbf16>, vector<20x8xf32> -> vector<20x8xf32>
    %157 = vector.extract_strided_slice %35 {offsets = [0, 48], sizes = [20, 8], strides = [1, 1]} : vector<20x64xbf16> to vector<20x8xbf16>
    %158 = vector.extract_strided_slice %36 {offsets = [0, 48], sizes = [16, 8], strides = [1, 1]} : vector<16x128xf32> to vector<16x8xf32>
    %159 = arith.truncf %158 : vector<16x8xf32> to vector<16x8xbf16>
    %160 = vector.extract_strided_slice %36 {offsets = [0, 112], sizes = [16, 8], strides = [1, 1]} : vector<16x128xf32> to vector<16x8xf32>
    %161 = arith.truncf %160 : vector<16x8xf32> to vector<16x8xbf16>
    %cst_56 = arith.constant dense<0.000000e+00> : vector<20x16xf32>
    %162 = tpu.matmul %157, %159, %cst_56 {dimension_numbers = #tpu.dot_dimension_numbers<[1], [1], [0], [0], [0, 0, 1, 0], [], []>} : vector<20x8xbf16>, vector<16x8xbf16>, vector<20x16xf32> -> vector<20x16xf32>
    %cst_57 = arith.constant 0.353553385 : f32
    %163 = vector.broadcast %cst_57 : f32 to vector<20x16xf32>
    %164 = arith.mulf %162, %163 : vector<20x16xf32>
    %cst_58 = arith.constant dense<0xFF800000> : vector<20xf32>
    %165 = vector.multi_reduction <maximumf>, %164, %cst_58 [1] : vector<20x16xf32> to vector<20xf32>
    %166 = vector.shape_cast %165 : vector<20xf32> to vector<20x1xf32>
    %167 = vector.broadcast %166 : vector<20x1xf32> to vector<20x16xf32>
    %168 = arith.subf %164, %167 : vector<20x16xf32>
    %169 = math.exp %168 : vector<20x16xf32>
    %cst_59 = arith.constant dense<0.000000e+00> : vector<20xf32>
    %170 = vector.multi_reduction <add>, %169, %cst_59 [1] : vector<20x16xf32> to vector<20xf32>
    %171 = vector.shape_cast %170 : vector<20xf32> to vector<20x1xf32>
    %172 = tpu.reciprocal %171 {approx = true} : vector<20x1xf32> -> vector<20x1xf32>
    %173 = vector.broadcast %172 : vector<20x1xf32> to vector<20x16xf32>
    %174 = arith.mulf %169, %173 : vector<20x16xf32>
    %175 = arith.truncf %174 : vector<20x16xf32> to vector<20x16xbf16>
    %cst_60 = arith.constant dense<0.000000e+00> : vector<20x8xf32>
    %176 = tpu.matmul %175, %161, %cst_60 {dimension_numbers = #tpu.dot_dimension_numbers<[1], [0], [0], [1], [0, 0, 1, 1], [], []>} : vector<20x16xbf16>, vector<16x8xbf16>, vector<20x8xf32> -> vector<20x8xf32>
    %177 = vector.extract_strided_slice %35 {offsets = [0, 56], sizes = [20, 8], strides = [1, 1]} : vector<20x64xbf16> to vector<20x8xbf16>
    %178 = vector.extract_strided_slice %36 {offsets = [0, 56], sizes = [16, 8], strides = [1, 1]} : vector<16x128xf32> to vector<16x8xf32>
    %179 = arith.truncf %178 : vector<16x8xf32> to vector<16x8xbf16>
    %180 = vector.extract_strided_slice %36 {offsets = [0, 120], sizes = [16, 8], strides = [1, 1]} : vector<16x128xf32> to vector<16x8xf32>
    %181 = arith.truncf %180 : vector<16x8xf32> to vector<16x8xbf16>
    %cst_61 = arith.constant dense<0.000000e+00> : vector<20x16xf32>
    %182 = tpu.matmul %177, %179, %cst_61 {dimension_numbers = #tpu.dot_dimension_numbers<[1], [1], [0], [0], [0, 0, 1, 0], [], []>} : vector<20x8xbf16>, vector<16x8xbf16>, vector<20x16xf32> -> vector<20x16xf32>
    %cst_62 = arith.constant 0.353553385 : f32
    %183 = vector.broadcast %cst_62 : f32 to vector<20x16xf32>
    %184 = arith.mulf %182, %183 : vector<20x16xf32>
    %cst_63 = arith.constant dense<0xFF800000> : vector<20xf32>
    %185 = vector.multi_reduction <maximumf>, %184, %cst_63 [1] : vector<20x16xf32> to vector<20xf32>
    %186 = vector.shape_cast %185 : vector<20xf32> to vector<20x1xf32>
    %187 = vector.broadcast %186 : vector<20x1xf32> to vector<20x16xf32>
    %188 = arith.subf %184, %187 : vector<20x16xf32>
    %189 = math.exp %188 : vector<20x16xf32>
    %cst_64 = arith.constant dense<0.000000e+00> : vector<20xf32>
    %190 = vector.multi_reduction <add>, %189, %cst_64 [1] : vector<20x16xf32> to vector<20xf32>
    %191 = vector.shape_cast %190 : vector<20xf32> to vector<20x1xf32>
    %192 = tpu.reciprocal %191 {approx = true} : vector<20x1xf32> -> vector<20x1xf32>
    %193 = vector.broadcast %192 : vector<20x1xf32> to vector<20x16xf32>
    %194 = arith.mulf %189, %193 : vector<20x16xf32>
    %195 = arith.truncf %194 : vector<20x16xf32> to vector<20x16xbf16>
    %cst_65 = arith.constant dense<0.000000e+00> : vector<20x8xf32>
    %196 = tpu.matmul %195, %181, %cst_65 {dimension_numbers = #tpu.dot_dimension_numbers<[1], [0], [0], [1], [0, 0, 1, 1], [], []>} : vector<20x16xbf16>, vector<16x8xbf16>, vector<20x8xf32> -> vector<20x8xf32>
    %197 = tpu.concatenate %56, %76, %96, %116, %136, %156, %176, %196 in 1 : vector<20x8xf32>, vector<20x8xf32>, vector<20x8xf32>, vector<20x8xf32>, vector<20x8xf32>, vector<20x8xf32>, vector<20x8xf32>, vector<20x8xf32> -> vector<20x64xf32>
    %198 = vector.extract_strided_slice %34 {offsets = [16, 0], sizes = [16, 128], strides = [1, 1]} : vector<32x128xf32> to vector<16x128xf32>
    %199 = vector.extract_strided_slice %35 {offsets = [0, 0], sizes = [20, 8], strides = [1, 1]} : vector<20x64xbf16> to vector<20x8xbf16>
    %200 = vector.extract_strided_slice %198 {offsets = [0, 0], sizes = [16, 8], strides = [1, 1]} : vector<16x128xf32> to vector<16x8xf32>
    %201 = arith.truncf %200 : vector<16x8xf32> to vector<16x8xbf16>
    %202 = vector.extract_strided_slice %198 {offsets = [0, 64], sizes = [16, 8], strides = [1, 1]} : vector<16x128xf32> to vector<16x8xf32>
    %203 = arith.truncf %202 : vector<16x8xf32> to vector<16x8xbf16>
    %cst_66 = arith.constant dense<0.000000e+00> : vector<20x16xf32>
    %204 = tpu.matmul %199, %201, %cst_66 {dimension_numbers = #tpu.dot_dimension_numbers<[1], [1], [0], [0], [0, 0, 1, 0], [], []>} : vector<20x8xbf16>, vector<16x8xbf16>, vector<20x16xf32> -> vector<20x16xf32>
    %cst_67 = arith.constant 0.353553385 : f32
    %205 = vector.broadcast %cst_67 : f32 to vector<20x16xf32>
    %206 = arith.mulf %204, %205 : vector<20x16xf32>
    %cst_68 = arith.constant dense<0xFF800000> : vector<20xf32>
    %207 = vector.multi_reduction <maximumf>, %206, %cst_68 [1] : vector<20x16xf32> to vector<20xf32>
    %208 = vector.shape_cast %207 : vector<20xf32> to vector<20x1xf32>
    %209 = vector.broadcast %208 : vector<20x1xf32> to vector<20x16xf32>
    %210 = arith.subf %206, %209 : vector<20x16xf32>
    %211 = math.exp %210 : vector<20x16xf32>
    %cst_69 = arith.constant dense<0.000000e+00> : vector<20xf32>
    %212 = vector.multi_reduction <add>, %211, %cst_69 [1] : vector<20x16xf32> to vector<20xf32>
    %213 = vector.shape_cast %212 : vector<20xf32> to vector<20x1xf32>
    %214 = tpu.reciprocal %213 {approx = true} : vector<20x1xf32> -> vector<20x1xf32>
    %215 = vector.broadcast %214 : vector<20x1xf32> to vector<20x16xf32>
    %216 = arith.mulf %211, %215 : vector<20x16xf32>
    %217 = arith.truncf %216 : vector<20x16xf32> to vector<20x16xbf16>
    %cst_70 = arith.constant dense<0.000000e+00> : vector<20x8xf32>
    %218 = tpu.matmul %217, %203, %cst_70 {dimension_numbers = #tpu.dot_dimension_numbers<[1], [0], [0], [1], [0, 0, 1, 1], [], []>} : vector<20x16xbf16>, vector<16x8xbf16>, vector<20x8xf32> -> vector<20x8xf32>
    %219 = vector.extract_strided_slice %35 {offsets = [0, 8], sizes = [20, 8], strides = [1, 1]} : vector<20x64xbf16> to vector<20x8xbf16>
    %220 = vector.extract_strided_slice %198 {offsets = [0, 8], sizes = [16, 8], strides = [1, 1]} : vector<16x128xf32> to vector<16x8xf32>
    %221 = arith.truncf %220 : vector<16x8xf32> to vector<16x8xbf16>
    %222 = vector.extract_strided_slice %198 {offsets = [0, 72], sizes = [16, 8], strides = [1, 1]} : vector<16x128xf32> to vector<16x8xf32>
    %223 = arith.truncf %222 : vector<16x8xf32> to vector<16x8xbf16>
    %cst_71 = arith.constant dense<0.000000e+00> : vector<20x16xf32>
    %224 = tpu.matmul %219, %221, %cst_71 {dimension_numbers = #tpu.dot_dimension_numbers<[1], [1], [0], [0], [0, 0, 1, 0], [], []>} : vector<20x8xbf16>, vector<16x8xbf16>, vector<20x16xf32> -> vector<20x16xf32>
    %cst_72 = arith.constant 0.353553385 : f32
    %225 = vector.broadcast %cst_72 : f32 to vector<20x16xf32>
    %226 = arith.mulf %224, %225 : vector<20x16xf32>
    %cst_73 = arith.constant dense<0xFF800000> : vector<20xf32>
    %227 = vector.multi_reduction <maximumf>, %226, %cst_73 [1] : vector<20x16xf32> to vector<20xf32>
    %228 = vector.shape_cast %227 : vector<20xf32> to vector<20x1xf32>
    %229 = vector.broadcast %228 : vector<20x1xf32> to vector<20x16xf32>
    %230 = arith.subf %226, %229 : vector<20x16xf32>
    %231 = math.exp %230 : vector<20x16xf32>
    %cst_74 = arith.constant dense<0.000000e+00> : vector<20xf32>
    %232 = vector.multi_reduction <add>, %231, %cst_74 [1] : vector<20x16xf32> to vector<20xf32>
    %233 = vector.shape_cast %232 : vector<20xf32> to vector<20x1xf32>
    %234 = tpu.reciprocal %233 {approx = true} : vector<20x1xf32> -> vector<20x1xf32>
    %235 = vector.broadcast %234 : vector<20x1xf32> to vector<20x16xf32>
    %236 = arith.mulf %231, %235 : vector<20x16xf32>
    %237 = arith.truncf %236 : vector<20x16xf32> to vector<20x16xbf16>
    %cst_75 = arith.constant dense<0.000000e+00> : vector<20x8xf32>
    %238 = tpu.matmul %237, %223, %cst_75 {dimension_numbers = #tpu.dot_dimension_numbers<[1], [0], [0], [1], [0, 0, 1, 1], [], []>} : vector<20x16xbf16>, vector<16x8xbf16>, vector<20x8xf32> -> vector<20x8xf32>
    %239 = vector.extract_strided_slice %35 {offsets = [0, 16], sizes = [20, 8], strides = [1, 1]} : vector<20x64xbf16> to vector<20x8xbf16>
    %240 = vector.extract_strided_slice %198 {offsets = [0, 16], sizes = [16, 8], strides = [1, 1]} : vector<16x128xf32> to vector<16x8xf32>
    %241 = arith.truncf %240 : vector<16x8xf32> to vector<16x8xbf16>
    %242 = vector.extract_strided_slice %198 {offsets = [0, 80], sizes = [16, 8], strides = [1, 1]} : vector<16x128xf32> to vector<16x8xf32>
    %243 = arith.truncf %242 : vector<16x8xf32> to vector<16x8xbf16>
    %cst_76 = arith.constant dense<0.000000e+00> : vector<20x16xf32>
    %244 = tpu.matmul %239, %241, %cst_76 {dimension_numbers = #tpu.dot_dimension_numbers<[1], [1], [0], [0], [0, 0, 1, 0], [], []>} : vector<20x8xbf16>, vector<16x8xbf16>, vector<20x16xf32> -> vector<20x16xf32>
    %cst_77 = arith.constant 0.353553385 : f32
    %245 = vector.broadcast %cst_77 : f32 to vector<20x16xf32>
    %246 = arith.mulf %244, %245 : vector<20x16xf32>
    %cst_78 = arith.constant dense<0xFF800000> : vector<20xf32>
    %247 = vector.multi_reduction <maximumf>, %246, %cst_78 [1] : vector<20x16xf32> to vector<20xf32>
    %248 = vector.shape_cast %247 : vector<20xf32> to vector<20x1xf32>
    %249 = vector.broadcast %248 : vector<20x1xf32> to vector<20x16xf32>
    %250 = arith.subf %246, %249 : vector<20x16xf32>
    %251 = math.exp %250 : vector<20x16xf32>
    %cst_79 = arith.constant dense<0.000000e+00> : vector<20xf32>
    %252 = vector.multi_reduction <add>, %251, %cst_79 [1] : vector<20x16xf32> to vector<20xf32>
    %253 = vector.shape_cast %252 : vector<20xf32> to vector<20x1xf32>
    %254 = tpu.reciprocal %253 {approx = true} : vector<20x1xf32> -> vector<20x1xf32>
    %255 = vector.broadcast %254 : vector<20x1xf32> to vector<20x16xf32>
    %256 = arith.mulf %251, %255 : vector<20x16xf32>
    %257 = arith.truncf %256 : vector<20x16xf32> to vector<20x16xbf16>
    %cst_80 = arith.constant dense<0.000000e+00> : vector<20x8xf32>
    %258 = tpu.matmul %257, %243, %cst_80 {dimension_numbers = #tpu.dot_dimension_numbers<[1], [0], [0], [1], [0, 0, 1, 1], [], []>} : vector<20x16xbf16>, vector<16x8xbf16>, vector<20x8xf32> -> vector<20x8xf32>
    %259 = vector.extract_strided_slice %35 {offsets = [0, 24], sizes = [20, 8], strides = [1, 1]} : vector<20x64xbf16> to vector<20x8xbf16>
    %260 = vector.extract_strided_slice %198 {offsets = [0, 24], sizes = [16, 8], strides = [1, 1]} : vector<16x128xf32> to vector<16x8xf32>
    %261 = arith.truncf %260 : vector<16x8xf32> to vector<16x8xbf16>
    %262 = vector.extract_strided_slice %198 {offsets = [0, 88], sizes = [16, 8], strides = [1, 1]} : vector<16x128xf32> to vector<16x8xf32>
    %263 = arith.truncf %262 : vector<16x8xf32> to vector<16x8xbf16>
    %cst_81 = arith.constant dense<0.000000e+00> : vector<20x16xf32>
    %264 = tpu.matmul %259, %261, %cst_81 {dimension_numbers = #tpu.dot_dimension_numbers<[1], [1], [0], [0], [0, 0, 1, 0], [], []>} : vector<20x8xbf16>, vector<16x8xbf16>, vector<20x16xf32> -> vector<20x16xf32>
    %cst_82 = arith.constant 0.353553385 : f32
    %265 = vector.broadcast %cst_82 : f32 to vector<20x16xf32>
    %266 = arith.mulf %264, %265 : vector<20x16xf32>
    %cst_83 = arith.constant dense<0xFF800000> : vector<20xf32>
    %267 = vector.multi_reduction <maximumf>, %266, %cst_83 [1] : vector<20x16xf32> to vector<20xf32>
    %268 = vector.shape_cast %267 : vector<20xf32> to vector<20x1xf32>
    %269 = vector.broadcast %268 : vector<20x1xf32> to vector<20x16xf32>
    %270 = arith.subf %266, %269 : vector<20x16xf32>
    %271 = math.exp %270 : vector<20x16xf32>
    %cst_84 = arith.constant dense<0.000000e+00> : vector<20xf32>
    %272 = vector.multi_reduction <add>, %271, %cst_84 [1] : vector<20x16xf32> to vector<20xf32>
    %273 = vector.shape_cast %272 : vector<20xf32> to vector<20x1xf32>
    %274 = tpu.reciprocal %273 {approx = true} : vector<20x1xf32> -> vector<20x1xf32>
    %275 = vector.broadcast %274 : vector<20x1xf32> to vector<20x16xf32>
    %276 = arith.mulf %271, %275 : vector<20x16xf32>
    %277 = arith.truncf %276 : vector<20x16xf32> to vector<20x16xbf16>
    %cst_85 = arith.constant dense<0.000000e+00> : vector<20x8xf32>
    %278 = tpu.matmul %277, %263, %cst_85 {dimension_numbers = #tpu.dot_dimension_numbers<[1], [0], [0], [1], [0, 0, 1, 1], [], []>} : vector<20x16xbf16>, vector<16x8xbf16>, vector<20x8xf32> -> vector<20x8xf32>
    %279 = vector.extract_strided_slice %35 {offsets = [0, 32], sizes = [20, 8], strides = [1, 1]} : vector<20x64xbf16> to vector<20x8xbf16>
    %280 = vector.extract_strided_slice %198 {offsets = [0, 32], sizes = [16, 8], strides = [1, 1]} : vector<16x128xf32> to vector<16x8xf32>
    %281 = arith.truncf %280 : vector<16x8xf32> to vector<16x8xbf16>
    %282 = vector.extract_strided_slice %198 {offsets = [0, 96], sizes = [16, 8], strides = [1, 1]} : vector<16x128xf32> to vector<16x8xf32>
    %283 = arith.truncf %282 : vector<16x8xf32> to vector<16x8xbf16>
    %cst_86 = arith.constant dense<0.000000e+00> : vector<20x16xf32>
    %284 = tpu.matmul %279, %281, %cst_86 {dimension_numbers = #tpu.dot_dimension_numbers<[1], [1], [0], [0], [0, 0, 1, 0], [], []>} : vector<20x8xbf16>, vector<16x8xbf16>, vector<20x16xf32> -> vector<20x16xf32>
    %cst_87 = arith.constant 0.353553385 : f32
    %285 = vector.broadcast %cst_87 : f32 to vector<20x16xf32>
    %286 = arith.mulf %284, %285 : vector<20x16xf32>
    %cst_88 = arith.constant dense<0xFF800000> : vector<20xf32>
    %287 = vector.multi_reduction <maximumf>, %286, %cst_88 [1] : vector<20x16xf32> to vector<20xf32>
    %288 = vector.shape_cast %287 : vector<20xf32> to vector<20x1xf32>
    %289 = vector.broadcast %288 : vector<20x1xf32> to vector<20x16xf32>
    %290 = arith.subf %286, %289 : vector<20x16xf32>
    %291 = math.exp %290 : vector<20x16xf32>
    %cst_89 = arith.constant dense<0.000000e+00> : vector<20xf32>
    %292 = vector.multi_reduction <add>, %291, %cst_89 [1] : vector<20x16xf32> to vector<20xf32>
    %293 = vector.shape_cast %292 : vector<20xf32> to vector<20x1xf32>
    %294 = tpu.reciprocal %293 {approx = true} : vector<20x1xf32> -> vector<20x1xf32>
    %295 = vector.broadcast %294 : vector<20x1xf32> to vector<20x16xf32>
    %296 = arith.mulf %291, %295 : vector<20x16xf32>
    %297 = arith.truncf %296 : vector<20x16xf32> to vector<20x16xbf16>
    %cst_90 = arith.constant dense<0.000000e+00> : vector<20x8xf32>
    %298 = tpu.matmul %297, %283, %cst_90 {dimension_numbers = #tpu.dot_dimension_numbers<[1], [0], [0], [1], [0, 0, 1, 1], [], []>} : vector<20x16xbf16>, vector<16x8xbf16>, vector<20x8xf32> -> vector<20x8xf32>
    %299 = vector.extract_strided_slice %35 {offsets = [0, 40], sizes = [20, 8], strides = [1, 1]} : vector<20x64xbf16> to vector<20x8xbf16>
    %300 = vector.extract_strided_slice %198 {offsets = [0, 40], sizes = [16, 8], strides = [1, 1]} : vector<16x128xf32> to vector<16x8xf32>
    %301 = arith.truncf %300 : vector<16x8xf32> to vector<16x8xbf16>
    %302 = vector.extract_strided_slice %198 {offsets = [0, 104], sizes = [16, 8], strides = [1, 1]} : vector<16x128xf32> to vector<16x8xf32>
    %303 = arith.truncf %302 : vector<16x8xf32> to vector<16x8xbf16>
    %cst_91 = arith.constant dense<0.000000e+00> : vector<20x16xf32>
    %304 = tpu.matmul %299, %301, %cst_91 {dimension_numbers = #tpu.dot_dimension_numbers<[1], [1], [0], [0], [0, 0, 1, 0], [], []>} : vector<20x8xbf16>, vector<16x8xbf16>, vector<20x16xf32> -> vector<20x16xf32>
    %cst_92 = arith.constant 0.353553385 : f32
    %305 = vector.broadcast %cst_92 : f32 to vector<20x16xf32>
    %306 = arith.mulf %304, %305 : vector<20x16xf32>
    %cst_93 = arith.constant dense<0xFF800000> : vector<20xf32>
    %307 = vector.multi_reduction <maximumf>, %306, %cst_93 [1] : vector<20x16xf32> to vector<20xf32>
    %308 = vector.shape_cast %307 : vector<20xf32> to vector<20x1xf32>
    %309 = vector.broadcast %308 : vector<20x1xf32> to vector<20x16xf32>
    %310 = arith.subf %306, %309 : vector<20x16xf32>
    %311 = math.exp %310 : vector<20x16xf32>
    %cst_94 = arith.constant dense<0.000000e+00> : vector<20xf32>
    %312 = vector.multi_reduction <add>, %311, %cst_94 [1] : vector<20x16xf32> to vector<20xf32>
    %313 = vector.shape_cast %312 : vector<20xf32> to vector<20x1xf32>
    %314 = tpu.reciprocal %313 {approx = true} : vector<20x1xf32> -> vector<20x1xf32>
    %315 = vector.broadcast %314 : vector<20x1xf32> to vector<20x16xf32>
    %316 = arith.mulf %311, %315 : vector<20x16xf32>
    %317 = arith.truncf %316 : vector<20x16xf32> to vector<20x16xbf16>
    %cst_95 = arith.constant dense<0.000000e+00> : vector<20x8xf32>
    %318 = tpu.matmul %317, %303, %cst_95 {dimension_numbers = #tpu.dot_dimension_numbers<[1], [0], [0], [1], [0, 0, 1, 1], [], []>} : vector<20x16xbf16>, vector<16x8xbf16>, vector<20x8xf32> -> vector<20x8xf32>
    %319 = vector.extract_strided_slice %35 {offsets = [0, 48], sizes = [20, 8], strides = [1, 1]} : vector<20x64xbf16> to vector<20x8xbf16>
    %320 = vector.extract_strided_slice %198 {offsets = [0, 48], sizes = [16, 8], strides = [1, 1]} : vector<16x128xf32> to vector<16x8xf32>
    %321 = arith.truncf %320 : vector<16x8xf32> to vector<16x8xbf16>
    %322 = vector.extract_strided_slice %198 {offsets = [0, 112], sizes = [16, 8], strides = [1, 1]} : vector<16x128xf32> to vector<16x8xf32>
    %323 = arith.truncf %322 : vector<16x8xf32> to vector<16x8xbf16>
    %cst_96 = arith.constant dense<0.000000e+00> : vector<20x16xf32>
    %324 = tpu.matmul %319, %321, %cst_96 {dimension_numbers = #tpu.dot_dimension_numbers<[1], [1], [0], [0], [0, 0, 1, 0], [], []>} : vector<20x8xbf16>, vector<16x8xbf16>, vector<20x16xf32> -> vector<20x16xf32>
    %cst_97 = arith.constant 0.353553385 : f32
    %325 = vector.broadcast %cst_97 : f32 to vector<20x16xf32>
    %326 = arith.mulf %324, %325 : vector<20x16xf32>
    %cst_98 = arith.constant dense<0xFF800000> : vector<20xf32>
    %327 = vector.multi_reduction <maximumf>, %326, %cst_98 [1] : vector<20x16xf32> to vector<20xf32>
    %328 = vector.shape_cast %327 : vector<20xf32> to vector<20x1xf32>
    %329 = vector.broadcast %328 : vector<20x1xf32> to vector<20x16xf32>
    %330 = arith.subf %326, %329 : vector<20x16xf32>
    %331 = math.exp %330 : vector<20x16xf32>
    %cst_99 = arith.constant dense<0.000000e+00> : vector<20xf32>
    %332 = vector.multi_reduction <add>, %331, %cst_99 [1] : vector<20x16xf32> to vector<20xf32>
    %333 = vector.shape_cast %332 : vector<20xf32> to vector<20x1xf32>
    %334 = tpu.reciprocal %333 {approx = true} : vector<20x1xf32> -> vector<20x1xf32>
    %335 = vector.broadcast %334 : vector<20x1xf32> to vector<20x16xf32>
    %336 = arith.mulf %331, %335 : vector<20x16xf32>
    %337 = arith.truncf %336 : vector<20x16xf32> to vector<20x16xbf16>
    %cst_100 = arith.constant dense<0.000000e+00> : vector<20x8xf32>
    %338 = tpu.matmul %337, %323, %cst_100 {dimension_numbers = #tpu.dot_dimension_numbers<[1], [0], [0], [1], [0, 0, 1, 1], [], []>} : vector<20x16xbf16>, vector<16x8xbf16>, vector<20x8xf32> -> vector<20x8xf32>
    %339 = vector.extract_strided_slice %35 {offsets = [0, 56], sizes = [20, 8], strides = [1, 1]} : vector<20x64xbf16> to vector<20x8xbf16>
    %340 = vector.extract_strided_slice %198 {offsets = [0, 56], sizes = [16, 8], strides = [1, 1]} : vector<16x128xf32> to vector<16x8xf32>
    %341 = arith.truncf %340 : vector<16x8xf32> to vector<16x8xbf16>
    %342 = vector.extract_strided_slice %198 {offsets = [0, 120], sizes = [16, 8], strides = [1, 1]} : vector<16x128xf32> to vector<16x8xf32>
    %343 = arith.truncf %342 : vector<16x8xf32> to vector<16x8xbf16>
    %cst_101 = arith.constant dense<0.000000e+00> : vector<20x16xf32>
    %344 = tpu.matmul %339, %341, %cst_101 {dimension_numbers = #tpu.dot_dimension_numbers<[1], [1], [0], [0], [0, 0, 1, 0], [], []>} : vector<20x8xbf16>, vector<16x8xbf16>, vector<20x16xf32> -> vector<20x16xf32>
    %cst_102 = arith.constant 0.353553385 : f32
    %345 = vector.broadcast %cst_102 : f32 to vector<20x16xf32>
    %346 = arith.mulf %344, %345 : vector<20x16xf32>
    %cst_103 = arith.constant dense<0xFF800000> : vector<20xf32>
    %347 = vector.multi_reduction <maximumf>, %346, %cst_103 [1] : vector<20x16xf32> to vector<20xf32>
    %348 = vector.shape_cast %347 : vector<20xf32> to vector<20x1xf32>
    %349 = vector.broadcast %348 : vector<20x1xf32> to vector<20x16xf32>
    %350 = arith.subf %346, %349 : vector<20x16xf32>
    %351 = math.exp %350 : vector<20x16xf32>
    %cst_104 = arith.constant dense<0.000000e+00> : vector<20xf32>
    %352 = vector.multi_reduction <add>, %351, %cst_104 [1] : vector<20x16xf32> to vector<20xf32>
    %353 = vector.shape_cast %352 : vector<20xf32> to vector<20x1xf32>
    %354 = tpu.reciprocal %353 {approx = true} : vector<20x1xf32> -> vector<20x1xf32>
    %355 = vector.broadcast %354 : vector<20x1xf32> to vector<20x16xf32>
    %356 = arith.mulf %351, %355 : vector<20x16xf32>
    %357 = arith.truncf %356 : vector<20x16xf32> to vector<20x16xbf16>
    %cst_105 = arith.constant dense<0.000000e+00> : vector<20x8xf32>
    %358 = tpu.matmul %357, %343, %cst_105 {dimension_numbers = #tpu.dot_dimension_numbers<[1], [0], [0], [1], [0, 0, 1, 1], [], []>} : vector<20x16xbf16>, vector<16x8xbf16>, vector<20x8xf32> -> vector<20x8xf32>
    %359 = tpu.concatenate %218, %238, %258, %278, %298, %318, %338, %358 in 1 : vector<20x8xf32>, vector<20x8xf32>, vector<20x8xf32>, vector<20x8xf32>, vector<20x8xf32>, vector<20x8xf32>, vector<20x8xf32>, vector<20x8xf32> -> vector<20x64xf32>
    %360 = tpu.concatenate %197, %359 in 0 : vector<20x64xf32>, vector<20x64xf32> -> vector<40x64xf32>
    %361 = arith.truncf %360 : vector<40x64xf32> to vector<40x64xbf16>
    %c0_106 = arith.constant 0 : index
    %c0_107 = arith.constant 0 : index
    %362 = vector.load %arg7[%c0_106, %c0_107] : memref<64x64xbf16, #tpu.memory_space<vmem>>, vector<64x64xbf16>
    %cst_108 = arith.constant dense<0.000000e+00> : vector<40x64xf32>
    %363 = tpu.matmul %361, %362, %cst_108 {dimension_numbers = #tpu.dot_dimension_numbers<[1], [0], [0], [1], [0, 0, 1, 1], [], []>} : vector<40x64xbf16>, vector<64x64xbf16>, vector<40x64xf32> -> vector<40x64xf32>
    %c0_109 = arith.constant 0 : index
    %c0_110 = arith.constant 0 : index
    %364 = vector.load %arg8[%c0_109, %c0_110] : memref<1x64xf32, #tpu.memory_space<vmem>>, vector<1x64xf32>
    %365 = vector.broadcast %364 : vector<1x64xf32> to vector<40x64xf32>
    %366 = arith.addf %363, %365 : vector<40x64xf32>
    %367 = vector.extract_strided_slice %366 {offsets = [0, 0], sizes = [20, 64], strides = [1, 1]} : vector<40x64xf32> to vector<20x64xf32>
    %c0_111 = arith.constant 0 : index
    %c0_112 = arith.constant 0 : index
    %c0_113 = arith.constant 0 : index
    %368 = vector.load %arg9[%c0_111, %c0_112, %c0_113] : memref<2x20x64xf32, #tpu.memory_space<vmem>>, vector<1x20x64xf32>
    %369 = vector.shape_cast %368 : vector<1x20x64xf32> to vector<20x64xf32>
    %370 = vector.shape_cast %367 : vector<20x64xf32> to vector<1x20x64xf32>
    tpu.vector_store %arg9[%c0_111, %c0_112, %c0_113], %370 {strides = array<i32>} : memref<2x20x64xf32, #tpu.memory_space<vmem>>, vector<1x20x64xf32>,
    %371 = vector.extract_strided_slice %366 {offsets = [20, 0], sizes = [20, 64], strides = [1, 1]} : vector<40x64xf32> to vector<20x64xf32>
    %c1 = arith.constant 1 : index
    %c0_114 = arith.constant 0 : index
    %c0_115 = arith.constant 0 : index
    %372 = vector.load %arg9[%c1, %c0_114, %c0_115] : memref<2x20x64xf32, #tpu.memory_space<vmem>>, vector<1x20x64xf32>
    %373 = vector.shape_cast %372 : vector<1x20x64xf32> to vector<20x64xf32>
    %374 = vector.shape_cast %371 : vector<20x64xf32> to vector<1x20x64xf32>
    tpu.vector_store %arg9[%c1, %c0_114, %c0_115], %374 {strides = array<i32>} : memref<2x20x64xf32, #tpu.memory_space<vmem>>, vector<1x20x64xf32>,
    return
  }
  func.func @transform_0(%arg0: i32) -> (i32, i32, i32) {
    %c0_i32 = arith.constant 0 : i32
    %c0_i32_0 = arith.constant 0 : i32
    %c0_i32_1 = arith.constant 0 : i32
    return %arg0, %c0_i32, %c0_i32_0 : i32, i32, i32
  }
  func.func @transform_1(%arg0: i32) -> (i32, i32, i32) {
    %c0_i32 = arith.constant 0 : i32
    %c0_i32_0 = arith.constant 0 : i32
    %c0_i32_1 = arith.constant 0 : i32
    return %arg0, %c0_i32, %c0_i32_0 : i32, i32, i32
  }
  func.func @transform_2(%arg0: i32) -> (i32, i32) {
    %c0_i32 = arith.constant 0 : i32
    %c0_i32_0 = arith.constant 0 : i32
    %c0_i32_1 = arith.constant 0 : i32
    return %c0_i32, %c0_i32_0 : i32, i32
  }
  func.func @transform_3(%arg0: i32) -> (i32, i32) {
    %c0_i32 = arith.constant 0 : i32
    %c0_i32_0 = arith.constant 0 : i32
    %c0_i32_1 = arith.constant 0 : i32
    return %c0_i32, %c0_i32_0 : i32, i32
  }
  func.func @transform_4(%arg0: i32) -> (i32, i32) {
    %c0_i32 = arith.constant 0 : i32
    %c0_i32_0 = arith.constant 0 : i32
    %c0_i32_1 = arith.constant 0 : i32
    return %c0_i32, %c0_i32_0 : i32, i32
  }
  func.func @transform_5(%arg0: i32) -> (i32, i32) {
    %c0_i32 = arith.constant 0 : i32
    %c0_i32_0 = arith.constant 0 : i32
    %c0_i32_1 = arith.constant 0 : i32
    return %c0_i32, %c0_i32_0 : i32, i32
  }
  func.func @transform_6(%arg0: i32) -> (i32, i32) {
    %c0_i32 = arith.constant 0 : i32
    %c0_i32_0 = arith.constant 0 : i32
    %c0_i32_1 = arith.constant 0 : i32
    return %c0_i32, %c0_i32_0 : i32, i32
  }
  func.func @transform_7(%arg0: i32) -> (i32, i32) {
    %c0_i32 = arith.constant 0 : i32
    %c0_i32_0 = arith.constant 0 : i32
    %c0_i32_1 = arith.constant 0 : i32
    return %c0_i32, %c0_i32_0 : i32, i32
  }
  func.func @transform_8(%arg0: i32) -> (i32, i32, i32) {
    %c0_i32 = arith.constant 0 : i32
    %c0_i32_0 = arith.constant 0 : i32
    %c0_i32_1 = arith.constant 0 : i32
    return %arg0, %c0_i32, %c0_i32_0 : i32, i32, i32
  }
  func.func @transform_9(%arg0: i32) -> (i32, i32) {
    %c0_i32 = arith.constant 0 : i32
    %c0_i32_0 = arith.constant 0 : i32
    return %arg0, %c0_i32 : i32, i32
  }
  func.func @transform_10(%arg0: i32) -> (i32, i32) {
    %c0_i32 = arith.constant 0 : i32
    %c0_i32_0 = arith.constant 0 : i32
    return %arg0, %c0_i32 : i32, i32
  }
}

</mosaic_0001>

<bundles_post_ra>
// kernel: prompt_forward.1
= control target key start
LH: loop header
LB: loop body
LE: loop exit
PB: predicated region body
PF: predicated region fallthrough
CT: control target
= control target key end

     0   :  { %vm35_vm0 = vcmask 523264   ;;  %vm57_vm1 = vcmask 1041409   ;;  %vm60_vm2 = vcmask 517120   ;;  %v4971_v22 = vmov 0.0   ;;  %s3859_s14 = smov 120   ;;  %s3863_s19 = smov 88   ;;  %s4960_s0 = inlined_call_operand.vmem [shape: f32[2,8,64], index: 0, kind: input, shape index: {}]   ;;  %s4961_s3 = inlined_call_operand.vmem [shape: f32[8,64], index: 3, kind: input, shape index: {}]   ;;  %s4962_s4 = inlined_call_operand.vmem [shape: bf16[64,128], index: 4, kind: input, shape index: {}]   ;;  %s4963_s1 = inlined_call_operand.vmem [shape: f32[2,16,64], index: 1, kind: input, shape index: {}]   ;;  %s4964_s2 = inlined_call_operand.vmem [shape: bf16[20,64], index: 2, kind: input, shape index: {}]   ;;  %s4965_s9 = inlined_call_operand.vmem [shape: f32[2,8], index: 9, kind: output, shape index: {1}]   ;;  %s4966_s5 = inlined_call_operand.vmem [shape: f32[1,128], index: 5, kind: input, shape index: {}]   ;;  %s4967_s6 = inlined_call_operand.vmem [shape: bf16[64,64], index: 6, kind: input, shape index: {}]   ;;  %s4968_s10 = inlined_call_operand.vmem [shape: f32[2,64], index: 10, kind: output, shape index: {2}]   ;;  %s4969_s7 = inlined_call_operand.vmem [shape: f32[1,64], index: 7, kind: input, shape index: {}]   ;;  %s4970_s8 = inlined_call_operand.vmem [shape: f32[2,20,64], index: 8, kind: output, shape index: {0}]  }
   0x1   :  { %v33_v0 = vld [vmem:[%s4960_s0] sm:$0xff]  ;;  %v34_v1 = vld [vmem:[%s4960_s0 + $0x8] sm:$0xff]  ;;  %3309 = vmatprep.subr.mxu0 %v4971_v22  ;;  %vm3858_vm3 = vmmov 0   ;;  %v156_v29 = vld [vmem:[%s4963_s1 + $0x10] sm:$0xff]  ;;  %vm310_vm4 = vcmask 64512   ;;  %vm152_vm5 = vcmask 58368  }
   0x2   :  { %v36_v2 = vsel %vm35_vm0, %v33_v0, 0.0  ;;  %v43_v3 = vsel %vm35_vm0, %v34_v1, 0.0  ;;  %v72_v23 = vld [vmem:[%s4961_s3] sm:$0xff]  ;;  %3311 = vmatprep.mubr.msk.f32.mxu0 %vm3858_vm3, %v4971_v22  ;;  %v155_v26 = vld [vmem:[%s4963_s1 + $0x8] sm:$0xff]  ;;  %v157_v30 = vld [vmem:[%s4963_s1 + $0x18] sm:$0xff]  ;;  %v167_v32 = vsel %vm35_vm0, %v156_v29, 0.0 }
   0x3   :  { %v37_v4 = vrot.slane %v36_v2, 4  ;;  %v44_v5 = vrot.slane %v43_v3, 4  ;;  %3310 = vmatpush3.xpose.msk.msra.mxu0 %vm35_vm0, %v72_v23  ;;  %v3651_v24 = vld [vmem:[%s4962_s4] sm:$0xff]   ;;  %v159_v28 = vsel %vm35_vm0, %v155_v26, 0.0  ;;  %v168_v33 = vsel %vm35_vm0, %v157_v30, 0.0  ;;  %v3652_v43 = vld [vmem:[%s4962_s4 + $0x8] sm:$0xff]  }
   0x4   :  { %3314 = vmatprep.subr.bf16.mxu0 %v3651_v24  ;;  %v154_v25 = vld [vmem:[%s4963_s1] sm:$0xff]  ;;  %v3967_v34 = vadd.f32 %v168_v33, %v167_v32  ;;  %v3653_v45 = vld [vmem:[%s4962_s4 + $0x10] sm:$0xff]   ;;  %v3654_v46 = vld [vmem:[%s4962_s4 + $0x18] sm:$0xff]   ;;  %v203_v47 = vpack.c.bf16 %v157_v30, %v156_v29  ;;  %s3860_s4 = smov 112   ;;  %s3864_s20 = smov 80   ;;  %vm378_vm6 = vcmask 125952  }
   0x5   :  { %v38_v6 = vadd.f32 %v37_v4, %v36_v2  ;;  %v45_v7 = vadd.f32 %v44_v5, %v43_v3  ;;  %v158_v27 = vsel %vm35_vm0, %v154_v25, 0.0  ;;  %v202_v42 = vpack.c.bf16 %v155_v26, %v154_v25  ;;  %v3985_v48 = vld [vmem:[%s4964_s2] sm:$0xff]   ;;  %v3992_v49 = vld [vmem:[%s4964_s2 + $0x8] ss:$0 sps:$4 sm:$0x33]   ;;  %s3865_s21 = smov 72  }
   0x6   :  { %v3963_v31 = vadd.f32 %v159_v28, %v158_v27  ;;  %4999 = vst [vmem:[#allocation3_spill] sm:$0xff] %v3967_v34  ;;  %466 = vrot.lane.b32.xlu1 %v3985_v48, %s3859_s14  ;;  %v3114_v54 = vld [vmem:[%s4966_s5] ss:$0 sm:$0xff]  ;;  %s3861_s5 = smov 104   ;;  %s3866_s22 = smov 64   ;;  %vm371_vm7 = vcmask 130048  }
   0x7   :  { %v39_v8 = vrot.slane %v38_v6, 2  ;;  %v46_v9 = vrot.slane %v45_v7, 2  ;;  %s3867_s23 = smov 48   ;;  %s3868_s3 = smov 56   ;;  %vm1662_vm8 = vcmask 195584   ;;  %vm1666_vm9 = vcmask 261120  }
   0x8   :  { %4998 = vst [vmem:[#allocation2_spill] sm:$0xff] %v3963_v31  ;;  %s3869_s24 = smov 32   ;;  %s3870_s25 = smov 40   ;;  %vm1670_vm10 = vcmask 326656   ;;  %vm1674_vm11 = vcmask 392192   ;;  %vm1678_vm12 = vcmask 457728  }
   0x9   :  { %v40_v10 = vadd.f32 %v39_v8, %v38_v6  ;;  %v47_v11 = vadd.f32 %v46_v9, %v45_v7  ;;  %s3871_s26 = smov 16   ;;  %s3872_s27 = smov 24   ;;  %vm2974_vm13 = vcmask 1043456   ;;  %vm3093_vm14 = vcmask 519168  }
   0xa   :  { %468 = vrot.lane.b32.xlu1 %v3992_v49, %s3859_s14  ;;  %s3873_s28 = smov 8   ;;  %vm3096_vm15 = vcmask 523268  }
   0xb   :  { %v41_v12 = vrot.slane %v40_v10, 1  ;;  %v48_v13 = vrot.slane %v47_v11, 1 }
   0xd   :  { %v42_v14 = vadd.f32 %v41_v12, %v40_v10  ;;  %v49_v15 = vadd.f32 %v48_v13, %v47_v11 }
   0xe   :  { %624 = vrot.lane.b32.xlu1 %v3985_v48, %s3860_s4 }
   0xf   :  { %v51_v16 = vmul.f32 0.125, %v42_v14  ;;  %v52_v17 = vmul.f32 0.125, %v49_v15 }
  0x11   :  { %v53_v18 = vmul.f32 %v51_v16, %v51_v16  ;;  %v54_v19 = vmul.f32 %v52_v17, %v52_v17 }
  0x13   :  { %v58_v20 = vsel %vm57_vm1, %v54_v19, %v53_v18 }
  0x14   :  { %v61_v21 = vsel %vm60_vm2, %v58_v20, 0.0 }
  0x15   :  { %62 = vadd.xlane.f32.xlu0 %v61_v21 }
  0x78   :  { %v4000_v50 = vpop.permute.xlu1 %466 }
  0x79   :  { %3340 = vmatprep.mubr.msk.bf16.mxu1 %vm310_vm4, %v4000_v50 }
  0x7c   :  { %v4051_v1 = vpop.permute.xlu1 %468 }
  0x80   :  { %v4053_v2 = vpop.permute.xlu1 %624 }
  0xa2   :  { %v63_v35 = vpop.xlane.xlu0 %62 }
  0xa3   :  { %v64_v36 = vmax.f32 %v63_v35, 1e-12 }
  0xa5   :  { %3661 = vrsqrt.f32 %v64_v36 }
  0xaf   :  { %v3662_v37 = vpop.eup %3661 }
  0xb0   :  { %v67_v38 = vrot.slane %v3662_v37, 1  ;;  %v70_v40 = vmul.f32 %v3662_v37, %v51_v16 }
  0xb2   :  { %v71_v39 = vmul.f32 %v67_v38, %v52_v17 }
  0xb4   :  { %v75_v41 = vrot.slane %v71_v39, 7 }
  0xb6   :  { %v76_v44 = vsel %vm57_vm1, %v75_v41, %v70_v40 }
  0xb7   :  { %3312 = vmatmul.mubr.msk.f32.vlgmr.msra.gmra.mrb[0].mxu0 %vm35_vm0, %v76_v44 }
  0xb8   :  { %3315 = vmatpush3.bf16.msra.mxu0 %v3651_v24  ;;  %3322 = vmatprep.mubr.msk.bf16.mxu0 %vm35_vm0, %v202_v42 }
  0xb9   :  { %3316 = vmatprep.subr.bf16.mxu0 %v3652_v43 }
  0xbc   :  { %3317 = vmatpush3.bf16.msra.mxu0 %v3652_v43 }
  0xbd   :  { %3318 = vmatprep.subr.bf16.mxu0 %v3653_v45 }
  0xc0   :  { %3319 = vmatpush3.bf16.msra.mxu0 %v3653_v45 }
  0xc1   :  { %3320 = vmatprep.subr.bf16.mxu0 %v3654_v46 }
  0xc4   :  { %3321 = vmatpush3.bf16.msra.mxu0 %v3654_v46 }
  0xc7   :  { %3323 = vmatmul.mubr.msk.bf16.vlgmr.msra.gmra.mrb[4].mxu0 %vm35_vm0, %v203_v47 }
  0xc8   :  { %3328 = vmatprep.mubr.msk.bf16.mxu0 %vm310_vm4, %v3985_v48 }
 0x18a   :  { %v148_v51 = vpop.f32.mrb[0].mxu0 }
 0x18b   :  { %153 = vst.msk [vmem:[%s4965_s9] sm:$0x3] %vm152_vm5, %v148_v51  ;;  %v3313_v52 = vpop.f32.mrb[1].mxu0  ;;  %s3862_s9 = smov 96  }
 0x19a   :  { %v3324_v53 = vpop.f32.mrb[4].mxu0 }
 0x19b   :  { %v283_v55 = vpop.f32.mrb[5].mxu0  ;;  %v292_v57 = vadd.f32 %v3324_v53, %v3114_v54 }
 0x19c   :  { %v3325_v56 = vpop.f32.mrb[6].mxu0  ;;  %v284_v60 = vadd.f32 %v3114_v54, %v283_v55 }
 0x19d   :  { %v295_v58 = vadd.f32 %v3325_v56, %v3114_v54  ;;  %v286_v59 = vpop.f32.mrb[7].mxu0 }
 0x19e   :  { %v287_v61 = vadd.f32 %v3114_v54, %v286_v59 }
 0x19f   :  { %v4010_v62 = vpack.c.bf16 %v295_v58, %v292_v57 }
 0x1a0   :  { %v301_v63 = vpack.c.bf16 %v287_v61, %v284_v60 }
 0x1a1   :  { %5000 = vst [vmem:[#allocation4_spill] sm:$0xff] %v4010_v62  ;;  %v1684_v42 = vsel %vm310_vm4, %v4010_v62, 0 }
 0x1a2   :  { %628 = vrot.lane.b32.xlu1 %v301_v63, %s3860_s4  ;;  %470 = vrot.lane.b32.xlu0 %v301_v63, %s3859_s14  ;;  %v318_v0 = vsel %vm310_vm4, %v301_v63, 0 }
 0x1a3   :  { %3538 = vmatprep.subr.msk.bf16.mxu0 %vm310_vm4, %v301_v63 }
 0x1a4   :  { %3327 = vmatpush3.bf16.xpose.msra.mxu0 %v318_v0 }
 0x1a6   :  { %626 = vrot.lane.b32.xlu1 %v3992_v49, %s3860_s4  ;;  %784 = vrot.lane.b32.xlu0 %v3992_v49, %s3861_s5 }
 0x1aa   :  { %786 = vrot.lane.b32.xlu1 %v301_v63, %s3861_s5  ;;  %940 = vrot.lane.b32.xlu0 %v3985_v48, %s3862_s9 }
 0x1ab   :  { %3329 = vmatmul.mubr.msk.bf16.vlgmr.msra.gmra.mrb[8].mxu0 %vm310_vm4, %v3992_v49 }
 0x1ae   :  { %782 = vrot.lane.b32.xlu1 %v3985_v48, %s3861_s5  ;;  %1102 = vrot.lane.b32.xlu0 %v301_v63, %s3863_s19 }
 0x1b2   :  { %944 = vrot.lane.b32.xlu1 %v301_v63, %s3862_s9  ;;  %1100 = vrot.lane.b32.xlu0 %v3992_v49, %s3863_s19 }
 0x1b6   :  { %942 = vrot.lane.b32.xlu1 %v3992_v49, %s3862_s9  ;;  %1256 = vrot.lane.b32.xlu0 %v3985_v48, %s3864_s20 }
 0x1ba   :  { %1098 = vrot.lane.b32.xlu1 %v3985_v48, %s3863_s19  ;;  %1418 = vrot.lane.b32.xlu0 %v301_v63, %s3865_s21 }
 0x1be   :  { %1260 = vrot.lane.b32.xlu1 %v301_v63, %s3864_s20  ;;  %1416 = vrot.lane.b32.xlu0 %v3992_v49, %s3865_s21 }
 0x1c2   :  { %1258 = vrot.lane.b32.xlu1 %v3992_v49, %s3864_s20  ;;  %1978 = vrot.lane.b32.xlu0 %v4010_v62, %s3860_s4 }
 0x1c6   :  { %1414 = vrot.lane.b32.xlu1 %v3985_v48, %s3865_s21  ;;  %2274 = vrot.lane.b32.xlu0 %v4010_v62, %s3862_s9 }
 0x1ca   :  { %1830 = vrot.lane.b32.xlu1 %v4010_v62, %s3859_s14  ;;  %2570 = vrot.lane.b32.xlu0 %v4010_v62, %s3864_s20 }
 0x1ce   :  { %2126 = vrot.lane.b32.xlu1 %v4010_v62, %s3861_s5  ;;  %1773 = vrot.lane.b32.xlu0 %v4010_v62, %s3866_s22 }
 0x1d2   :  { %2422 = vrot.lane.b32.xlu1 %v4010_v62, %s3863_s19  ;;  %2069 = vrot.lane.b32.xlu0 %v4010_v62, %s3867_s23 }
 0x1d6   :  { %2718 = vrot.lane.b32.xlu1 %v4010_v62, %s3865_s21  ;;  %409 = vrot.lane.b32.xlu0 %v301_v63, %s3866_s22 }
 0x1da   :  { %1921 = vrot.lane.b32.xlu1 %v4010_v62, %s3868_s3  ;;  %725 = vrot.lane.b32.xlu0 %v301_v63, %s3867_s23 }
 0x1de   :  { %567 = vrot.lane.b32.xlu1 %v301_v63, %s3868_s3  ;;  %1041 = vrot.lane.b32.xlu0 %v301_v63, %s3869_s24 }
 0x1e2   :  { %883 = vrot.lane.b32.xlu1 %v301_v63, %s3870_s25  ;;  %1357 = vrot.lane.b32.xlu0 %v301_v63, %s3871_s26 }
 0x1e6   :  { %1199 = vrot.lane.b32.xlu1 %v301_v63, %s3872_s27 }
 0x1ea   :  { %1515 = vrot.lane.b32.xlu1 %v301_v63, %s3873_s28 }
 0x214   :  { %v629_v3 = vpop.permute.xlu1 %628  ;;  %v471_v4 = vpop.permute.xlu0 %470 }
 0x215   :  { %3539 = vmatprep.subr.msk.bf16.mxu1 %vm310_vm4, %v471_v4  ;;  %v479_v5 = vsel %vm310_vm4, %v471_v4, 0  ;;  %v637_v10 = vsel %vm310_vm4, %v629_v3, 0 }
 0x216   :  { %3339 = vmatpush3.bf16.xpose.msra.mxu1 %v479_v5 }
 0x217   :  { %3540 = vmatprep.subr.msk.bf16.mxu1 %vm310_vm4, %v629_v3 }
 0x218   :  { %v4058_v6 = vpop.permute.xlu1 %626  ;;  %v4060_v7 = vpop.permute.xlu0 %784 }
 0x21c   :  { %v787_v8 = vpop.permute.xlu1 %786  ;;  %v4062_v9 = vpop.permute.xlu0 %940 }
 0x21d   :  { %3341 = vmatmul.mubr.msk.bf16.vlgmr.msra.gmra.mrb[0].mxu1 %vm310_vm4, %v4051_v1  ;;  %v795_v15 = vsel %vm310_vm4, %v787_v8, 0 }
 0x21e   :  { %3351 = vmatpush3.bf16.xpose.msra.mxu1 %v637_v10  ;;  %3352 = vmatprep.mubr.msk.bf16.mxu1 %vm310_vm4, %v4053_v2 }
 0x21f   :  { %3541 = vmatprep.subr.msk.bf16.mxu1 %vm310_vm4, %v787_v8 }
 0x220   :  { %v4070_v11 = vpop.permute.xlu1 %782  ;;  %v1103_v12 = vpop.permute.xlu0 %1102 }
 0x221   :  { %v1111_v26 = vsel %vm310_vm4, %v1103_v12, 0 }
 0x224   :  { %v945_v13 = vpop.permute.xlu1 %944  ;;  %v4072_v14 = vpop.permute.xlu0 %1100 }
 0x225   :  { %3353 = vmatmul.mubr.msk.bf16.vlgmr.msra.gmra.mrb[4].mxu1 %vm310_vm4, %v4058_v6  ;;  %v953_v20 = vsel %vm310_vm4, %v945_v13, 0 }
 0x226   :  { %3363 = vmatpush3.bf16.xpose.msra.mxu1 %v795_v15  ;;  %3364 = vmatprep.mubr.msk.bf16.mxu1 %vm310_vm4, %v4070_v11 }
 0x227   :  { %3542 = vmatprep.subr.msk.bf16.mxu1 %vm310_vm4, %v945_v13 }
 0x228   :  { %v4080_v16 = vpop.permute.xlu1 %942  ;;  %v4082_v17 = vpop.permute.xlu0 %1256 }
 0x22c   :  { %v4084_v18 = vpop.permute.xlu1 %1098  ;;  %v1419_v19 = vpop.permute.xlu0 %1418 }
 0x22d   :  { %3365 = vmatmul.mubr.msk.bf16.vlgmr.msra.gmra.mrb[8].mxu1 %vm310_vm4, %v4060_v7  ;;  %v1427_v38 = vsel %vm310_vm4, %v1419_v19, 0 }
 0x22e   :  { %3375 = vmatpush3.bf16.xpose.msra.mxu1 %v953_v20  ;;  %3376 = vmatprep.mubr.msk.bf16.mxu1 %vm310_vm4, %v4062_v9 }
 0x22f   :  { %3543 = vmatprep.subr.msk.bf16.mxu1 %vm310_vm4, %v1103_v12 }
 0x230   :  { %v1261_v21 = vpop.permute.xlu1 %1260  ;;  %v4092_v23 = vpop.permute.xlu0 %1416 }
 0x231   :  { %v1269_v32 = vsel %vm310_vm4, %v1261_v21, 0 }
 0x234   :  { %v4094_v24 = vpop.permute.xlu1 %1258  ;;  %v1979_v25 = vpop.permute.xlu0 %1978 }
 0x235   :  { %3377 = vmatmul.mubr.msk.bf16.vlgmr.msra.gmra.mrb[12].mxu1 %vm310_vm4, %v4080_v16  ;;  %v1981_v45 = vsel %vm310_vm4, %v1979_v25, 0 }
 0x236   :  { %3387 = vmatpush3.bf16.xpose.msra.mxu1 %v1111_v26  ;;  %3388 = vmatprep.mubr.msk.bf16.mxu1 %vm310_vm4, %v4084_v18 }
 0x237   :  { %3544 = vmatprep.subr.msk.bf16.mxu1 %vm310_vm4, %v1261_v21 }
 0x238   :  { %v4102_v27 = vpop.permute.xlu1 %1414  ;;  %v2275_v28 = vpop.permute.xlu0 %2274 }
 0x239   :  { %v2277_v47 = vsel %vm310_vm4, %v2275_v28, 0 }
 0x23c   :  { %v1831_v29 = vpop.permute.xlu1 %1830  ;;  %v2571_v30 = vpop.permute.xlu0 %2570 }
 0x23d   :  { %3389 = vmatmul.mubr.msk.bf16.vlgmr.msra.gmra.mrb[16].mxu1 %vm310_vm4, %v4072_v14  ;;  %v1833_v44 = vsel %vm310_vm4, %v1831_v29, 0 }
 0x23e   :  { %3399 = vmatpush3.bf16.xpose.msra.mxu1 %v1269_v32  ;;  %3400 = vmatprep.mubr.msk.bf16.mxu1 %vm310_vm4, %v4082_v17 }
 0x23f   :  { %3545 = vmatprep.subr.msk.bf16.mxu1 %vm310_vm4, %v1419_v19 }
 0x240   :  { %v2127_v33 = vpop.permute.xlu1 %2126  ;;  %v4110_v35 = vpop.permute.xlu0 %1773 }
 0x241   :  { %5001 = vst [vmem:[#allocation5_spill] sm:$0xff] %v4110_v35  ;;  %v2129_v46 = vsel %vm310_vm4, %v2127_v33, 0 }
 0x244   :  { %v2423_v36 = vpop.permute.xlu1 %2422  ;;  %v4112_v37 = vpop.permute.xlu0 %2069 }
 0x245   :  { %5002 = vst [vmem:[#allocation6_spill] sm:$0xff] %v4112_v37  ;;  %3401 = vmatmul.mubr.msk.bf16.vlgmr.msra.gmra.mrb[20].mxu1 %vm310_vm4, %v4094_v24 }
 0x246   :  { %3411 = vmatpush3.bf16.xpose.msra.mxu1 %v1427_v38  ;;  %3412 = vmatprep.mubr.msk.bf16.mxu1 %vm310_vm4, %v4102_v27 }
 0x247   :  { %3546 = vmatprep.subr.msk.bf16.mxu1 %vm310_vm4, %v4010_v62 }
 0x248   :  { %v2719_v39 = vpop.permute.xlu1 %2718  ;;  %v410_v40 = vpop.permute.xlu0 %409 }
 0x249   :  { %3332 = vmatprep.subr.bf16.mxu0 %v410_v40  ;;  %v2721_v60 = vsel %vm310_vm4, %v2719_v39, 0 }
 0x24a   :  { %3333 = vmatpush3.bf16.msra.mxu0 %v410_v40 }
 0x24c   :  { %v4121_v41 = vpop.permute.xlu1 %1921 }
 0x24d   :  { %5003 = vst [vmem:[#allocation7_spill] sm:$0xff] %v4121_v41  ;;  %3413 = vmatmul.mubr.msk.bf16.vlgmr.msra.gmra.mrb[24].mxu1 %vm310_vm4, %v4092_v23 }
 0x24e   :  { %3423 = vmatpush3.bf16.xpose.msra.mxu1 %v1684_v42  ;;  %3424 = vmatprep.mubr.msk.bf16.mxu1 %vm310_vm4, %v3985_v48  ;;  %v2425_v48 = vsel %vm310_vm4, %v2423_v36, 0 }
 0x24f   :  { %3547 = vmatprep.subr.msk.bf16.mxu1 %vm310_vm4, %v1831_v29 }
 0x250   :  { %v4130_v43 = vpop.permute.xlu1 %567 }
 0x251   :  { %3344 = vmatprep.subr.bf16.mxu0 %v4130_v43 }
 0x255   :  { %3425 = vmatmul.mubr.msk.bf16.vlgmr.msra.gmra.mrb[28].mxu1 %vm310_vm4, %v3992_v49  ;;  %v2573_v49 = vsel %vm310_vm4, %v2571_v30, 0 }
 0x256   :  { %3435 = vmatpush3.bf16.xpose.msra.mxu1 %v1833_v44  ;;  %3436 = vmatprep.mubr.msk.bf16.mxu1 %vm310_vm4, %v4000_v50 }
 0x257   :  { %3548 = vmatprep.subr.msk.bf16.mxu1 %vm310_vm4, %v1979_v25 }
 0x25d   :  { %3437 = vmatmul.mubr.msk.bf16.vlgmr.msra.gmra.mrb[32].mxu1 %vm310_vm4, %v4051_v1 }
 0x25e   :  { %3447 = vmatpush3.bf16.xpose.msra.mxu1 %v1981_v45  ;;  %3448 = vmatprep.mubr.msk.bf16.mxu1 %vm310_vm4, %v4053_v2 }
 0x25f   :  { %3549 = vmatprep.subr.msk.bf16.mxu1 %vm310_vm4, %v2127_v33 }
 0x265   :  { %3449 = vmatmul.mubr.msk.bf16.vlgmr.msra.gmra.mrb[36].mxu1 %vm310_vm4, %v4058_v6 }
 0x266   :  { %3459 = vmatpush3.bf16.xpose.msra.mxu1 %v2129_v46  ;;  %3460 = vmatprep.mubr.msk.bf16.mxu1 %vm310_vm4, %v4070_v11 }
 0x267   :  { %3550 = vmatprep.subr.msk.bf16.mxu1 %vm310_vm4, %v2275_v28 }
 0x26d   :  { %3461 = vmatmul.mubr.msk.bf16.vlgmr.msra.gmra.mrb[40].mxu1 %vm310_vm4, %v4060_v7 }
 0x26e   :  { %3471 = vmatpush3.bf16.xpose.msra.mxu1 %v2277_v47  ;;  %3472 = vmatprep.mubr.msk.bf16.mxu1 %vm310_vm4, %v4062_v9 }
 0x26f   :  { %3551 = vmatprep.subr.msk.bf16.mxu1 %vm310_vm4, %v2423_v36 }
 0x275   :  { %3473 = vmatmul.mubr.msk.bf16.vlgmr.msra.gmra.mrb[44].mxu1 %vm310_vm4, %v4080_v16 }
 0x276   :  { %3483 = vmatpush3.bf16.xpose.msra.mxu1 %v2425_v48  ;;  %3484 = vmatprep.mubr.msk.bf16.mxu1 %vm310_vm4, %v4084_v18  ;;  %v4215_v18 = vpop.permute.xlu0 %725 }
 0x277   :  { %3552 = vmatprep.subr.msk.bf16.mxu1 %vm310_vm4, %v2571_v30 }
 0x27a   :  { %v4227_v29 = vpop.permute.xlu0 %1041 }
 0x27b   :  { %5005 = vst [vmem:[#allocation9_spill] sm:$0xff] %v4227_v29 }
 0x27d   :  { %3485 = vmatmul.mubr.msk.bf16.vlgmr.msra.gmra.mrb[48].mxu1 %vm310_vm4, %v4072_v14 }
 0x27e   :  { %v3330_v50 = vpop.f32.mrb[8].mxu0  ;;  %3495 = vmatpush3.bf16.xpose.msra.mxu1 %v2573_v49  ;;  %3496 = vmatprep.mubr.msk.bf16.mxu1 %vm310_vm4, %v4082_v17  ;;  %v4239_v44 = vpop.permute.xlu0 %1357 }
 0x27f   :  { %v4168_v51 = vmul.f32 0.35355338, %v3330_v50  ;;  %v354_v52 = vpop.f32.mrb[9].mxu0  ;;  %3553 = vmatprep.subr.msk.bf16.mxu1 %vm310_vm4, %v2719_v39  ;;  %5007 = vst [vmem:[#allocation11_spill] sm:$0xff] %v4239_v44 }
 0x280   :  { %v4171_v53 = vmul.f32 0.35355338, %v354_v52  ;;  %v3331_v54 = vpop.f32.mrb[10].mxu0 }
 0x281   :  { %v357_v55 = vpop.f32.mrb[11].mxu0  ;;  %v379_v56 = vsel %vm378_vm6, %v4168_v51, -inf }
 0x282   :  { %v4175_v57 = vmul.f32 0.35355338, %v357_v55  ;;  %380 = vmax.xlane.f32.xlu0 %v379_v56  ;;  %v372_v58 = vsel %vm371_vm7, %v4171_v53, -inf }
 0x284   :  { %v375_v59 = vsel %vm371_vm7, %v4175_v57, -inf }
 0x285   :  { %376 = vmax.xlane.f32.xlu1 %v375_v59  ;;  %3497 = vmatmul.mubr.msk.bf16.vlgmr.msra.gmra.mrb[52].mxu1 %vm310_vm4, %v4094_v24 }
 0x286   :  { %373 = vmax.xlane.f32.xlu0 %v372_v58  ;;  %3507 = vmatpush3.bf16.xpose.msra.mxu1 %v2721_v60 }
 0x287   :  { %3508 = vmatprep.mubr.msk.bf16.mxu1 %vm310_vm4, %v4102_v27  ;;  %3518 = vmatprep.subr.bf16.mxu1 %v4971_v22 }
 0x28d   :  { %3509 = vmatmul.mubr.msk.bf16.vlgmr.msra.gmra.mrb[56].mxu1 %vm310_vm4, %v4092_v23  ;;  %v4219_v23 = vpop.permute.xlu1 %883 }
 0x28e   :  { %3526 = vmatprep.mubr.msk.bf16.mxu1 %vm3858_vm3, %v4971_v22  ;;  %5004 = vst [vmem:[#allocation8_spill] sm:$0xff] %v4219_v23 }
 0x291   :  { %v4233_v33 = vpop.permute.xlu1 %1199 }
 0x292   :  { %5006 = vst [vmem:[#allocation10_spill] sm:$0xff] %v4233_v33 }
 0x295   :  { %v4247_v49 = vpop.permute.xlu1 %1515 }
 0x296   :  { %5008 = vst [vmem:[#allocation12_spill] sm:$0xff] %v4247_v49 }
 0x2f0   :  { %v3342_v61 = vpop.f32.mrb[0].mxu1 }
 0x2f1   :  { %v4191_v63 = vmul.f32 0.35355338, %v3342_v61  ;;  %v515_v0 = vpop.f32.mrb[1].mxu1 }
 0x2f2   :  { %v3343_v1 = vpop.f32.mrb[2].mxu1  ;;  %v4193_v2 = vmul.f32 0.35355338, %v515_v0 }
 0x2f3   :  { %v518_v3 = vpop.f32.mrb[3].mxu1  ;;  %v538_v4 = vsel %vm378_vm6, %v4191_v63, -inf }
 0x2f4   :  { %v4197_v5 = vmul.f32 0.35355338, %v518_v3  ;;  %539 = vmax.xlane.f32.xlu0 %v538_v4  ;;  %v532_v7 = vsel %vm371_vm7, %v4193_v2, -inf }
 0x2f6   :  { %v535_v6 = vsel %vm371_vm7, %v4197_v5, -inf }
 0x2f7   :  { %536 = vmax.xlane.f32.xlu1 %v535_v6 }
 0x2f8   :  { %v3354_v8 = vpop.f32.mrb[4].mxu1  ;;  %533 = vmax.xlane.f32.xlu0 %v532_v7 }
 0x2f9   :  { %v4203_v9 = vmul.f32 0.35355338, %v3354_v8  ;;  %v673_v10 = vpop.f32.mrb[5].mxu1 }
 0x2fa   :  { %v4205_v11 = vmul.f32 0.35355338, %v673_v10  ;;  %v3355_v12 = vpop.f32.mrb[6].mxu1 }
 0x2fb   :  { %v676_v13 = vpop.f32.mrb[7].mxu1  ;;  %v696_v14 = vsel %vm378_vm6, %v4203_v9, -inf }
 0x2fc   :  { %v4209_v15 = vmul.f32 0.35355338, %v676_v13  ;;  %697 = vmax.xlane.f32.xlu1 %v696_v14  ;;  %v690_v16 = vsel %vm371_vm7, %v4205_v11, -inf }
 0x2fe   :  { %v693_v17 = vsel %vm371_vm7, %v4209_v15, -inf }
 0x2ff   :  { %694 = vmax.xlane.f32.xlu0 %v693_v17 }
 0x300   :  { %v3366_v19 = vpop.f32.mrb[8].mxu1  ;;  %691 = vmax.xlane.f32.xlu1 %v690_v16 }
 0x301   :  { %v4217_v20 = vmul.f32 0.35355338, %v3366_v19  ;;  %v831_v21 = vpop.f32.mrb[9].mxu1 }
 0x302   :  { %v4221_v24 = vmul.f32 0.35355338, %v831_v21  ;;  %v3367_v25 = vpop.f32.mrb[10].mxu1 }
 0x303   :  { %v834_v26 = vpop.f32.mrb[11].mxu1  ;;  %v854_v27 = vsel %vm378_vm6, %v4217_v20, -inf }
 0x304   :  { %v4225_v28 = vmul.f32 0.35355338, %v834_v26  ;;  %855 = vmax.xlane.f32.xlu0 %v854_v27  ;;  %v848_v30 = vsel %vm371_vm7, %v4221_v24, -inf }
 0x306   :  { %v851_v32 = vsel %vm371_vm7, %v4225_v28, -inf }
 0x307   :  { %852 = vmax.xlane.f32.xlu1 %v851_v32 }
 0x308   :  { %v3378_v36 = vpop.f32.mrb[12].mxu1  ;;  %849 = vmax.xlane.f32.xlu0 %v848_v30 }
 0x309   :  { %v4235_v38 = vmul.f32 0.35355338, %v3378_v36  ;;  %v989_v39 = vpop.f32.mrb[13].mxu1 }
 0x30a   :  { %v4237_v40 = vmul.f32 0.35355338, %v989_v39  ;;  %v3379_v42 = vpop.f32.mrb[14].mxu1 }
 0x30b   :  { %v992_v45 = vpop.f32.mrb[15].mxu1  ;;  %v1012_v46 = vsel %vm378_vm6, %v4235_v38, -inf }
 0x30c   :  { %v4243_v47 = vmul.f32 0.35355338, %v992_v45  ;;  %1013 = vmax.xlane.f32.xlu1 %v1012_v46  ;;  %v1006_v48 = vsel %vm371_vm7, %v4237_v40, -inf }
 0x30e   :  { %v1009_v50 = vsel %vm371_vm7, %v4243_v47, -inf }
 0x30f   :  { %v381_v52 = vpop.xlane.xlu0 %380  ;;  %1010 = vmax.xlane.f32.xlu0 %v1009_v50 }
 0x310   :  { %v384_v54 = vsub.f32 %v4168_v51, %v381_v52  ;;  %v3390_v55 = vpop.f32.mrb[16].mxu1  ;;  %1007 = vmax.xlane.f32.xlu1 %v1006_v48 }
 0x311   :  { %v4252_v56 = vmul.f32 0.35355338, %v3390_v55  ;;  %v1147_v58 = vpop.f32.mrb[17].mxu1 }
 0x312   :  { %v389_v59 = vmul.f32 1.442695, %v384_v54  ;;  %v4254_v60 = vmul.f32 0.35355338, %v1147_v58  ;;  %v377_v61 = vpop.xlane.xlu1 %376  ;;  %v3391_v0 = vpop.f32.mrb[18].mxu1 }
 0x313   :  { %v383_v1 = vsub.f32 %v4175_v57, %v377_v61  ;;  %v374_v3 = vpop.xlane.xlu0 %373  ;;  %v1150_v4 = vpop.f32.mrb[19].mxu1  ;;  %v1170_v6 = vsel %vm378_vm6, %v4252_v56, -inf }
 0x314   :  { %v382_v7 = vsub.f32 %v4171_v53, %v374_v3  ;;  %v4260_v51 = vmul.f32 0.35355338, %v1150_v4  ;;  %1171 = vmax.xlane.f32.xlu0 %v1170_v6  ;;  %3663 = vpow2.f32 %v389_v59  ;;  %v1164_v10 = vsel %vm371_vm7, %v4254_v60, -inf }
 0x315   :  { %v387_v8 = vmul.f32 1.442695, %v383_v1 }
 0x316   :  { %v385_v12 = vmul.f32 1.442695, %v382_v7  ;;  %v1167_v13 = vsel %vm371_vm7, %v4260_v51, -inf }
 0x317   :  { %3665 = vpow2.f32 %v387_v8  ;;  %1168 = vmax.xlane.f32.xlu1 %v1167_v13 }
 0x318   :  { %v3402_v57 = vpop.f32.mrb[20].mxu1  ;;  %1165 = vmax.xlane.f32.xlu0 %v1164_v10  ;;  %3667 = vpow2.f32 %v385_v12 }
 0x319   :  { %v4266_v14 = vmul.f32 0.35355338, %v3402_v57  ;;  %v1305_v53 = vpop.f32.mrb[21].mxu1 }
 0x31a   :  { %v4268_v16 = vmul.f32 0.35355338, %v1305_v53  ;;  %v3403_v17 = vpop.f32.mrb[22].mxu1 }
 0x31b   :  { %v1308_v19 = vpop.f32.mrb[23].mxu1  ;;  %v1328_v21 = vsel %vm378_vm6, %v4266_v14, -inf }
 0x31c   :  { %v4272_v25 = vmul.f32 0.35355338, %v1308_v19  ;;  %1329 = vmax.xlane.f32.xlu1 %v1328_v21  ;;  %v1322_v26 = vsel %vm371_vm7, %v4268_v16, -inf }
 0x31e   :  { %v1325_v27 = vsel %vm371_vm7, %v4272_v25, -inf  ;;  %v4278_v30 = vpop.eup %3663 }
 0x31f   :  { %1326 = vmax.xlane.f32.xlu0 %v1325_v27  ;;  %v397_v45 = vsel %vm378_vm6, %v4278_v30, 0.0 }
 0x320   :  { %1323 = vmax.xlane.f32.xlu1 %v1322_v26  ;;  %v3414_v32 = vpop.f32.mrb[24].mxu1 }
 0x321   :  { %v4280_v36 = vpop.eup %3665  ;;  %v1463_v39 = vpop.f32.mrb[25].mxu1  ;;  %v4288_v52 = vmul.f32 0.35355338, %v3414_v32 }
 0x322   :  { %v3415_v42 = vpop.f32.mrb[26].mxu1  ;;  %v4284_v46 = vpop.eup %3667  ;;  %v394_v50 = vsel %vm371_vm7, %v4280_v36, 0.0  ;;  %v4296_v59 = vmul.f32 0.35355338, %v1463_v39 }
 0x323   :  { %398 = vadd.xlane.f32.xlu0 %v397_v45  ;;  %v1466_v48 = vpop.f32.mrb[27].mxu1  ;;  %v391_v55 = vsel %vm371_vm7, %v4284_v46, 0.0  ;;  %v1486_v0 = vsel %vm378_vm6, %v4288_v52, -inf }
 0x324   :  { %v4290_v54 = vmul.f32 0.35355338, %v1466_v48  ;;  %395 = vadd.xlane.f32.xlu1 %v394_v50  ;;  %v1480_v12 = vsel %vm371_vm7, %v4296_v59, -inf }
 0x326   :  { %v1483_v58 = vsel %vm371_vm7, %v4290_v54, -inf }
 0x327   :  { %392 = vadd.xlane.f32.xlu0 %v391_v55 }
 0x328   :  { %v3426_v61 = vpop.f32.mrb[28].mxu1  ;;  %1484 = vmax.xlane.f32.xlu1 %v1483_v58 }
 0x329   :  { %v4300_v1 = vmul.f32 0.35355338, %v3426_v61  ;;  %v1720_v3 = vpop.f32.mrb[29].mxu1 }
 0x32a   :  { %v4302_v4 = vmul.f32 0.35355338, %v1720_v3  ;;  %v3427_v6 = vpop.f32.mrb[30].mxu1 }
 0x32b   :  { %1487 = vmax.xlane.f32.xlu0 %v1486_v0  ;;  %v1743_v7 = vsel %vm378_vm6, %v4300_v1, -inf  ;;  %v1723_v8 = vpop.f32.mrb[31].mxu1 }
 0x32c   :  { %1744 = vmax.xlane.f32.xlu1 %v1743_v7  ;;  %v4306_v10 = vmul.f32 0.35355338, %v1723_v8  ;;  %v1737_v13 = vsel %vm371_vm7, %v4302_v4, -inf }
 0x32e   :  { %v1740_v53 = vsel %vm371_vm7, %v4306_v10, -inf }
 0x32f   :  { %1481 = vmax.xlane.f32.xlu0 %v1480_v12 }
 0x330   :  { %v3438_v57 = vpop.f32.mrb[32].mxu1  ;;  %1738 = vmax.xlane.f32.xlu1 %v1737_v13 }
 0x331   :  { %v1869_v17 = vpop.f32.mrb[33].mxu1  ;;  %v4314_v19 = vmul.f32 0.35355338, %v3438_v57 }
 0x332   :  { %v3439_v21 = vpop.f32.mrb[34].mxu1  ;;  %v4318_v32 = vmul.f32 0.35355338, %v1869_v17 }
 0x333   :  { %v1872_v26 = vpop.f32.mrb[35].mxu1  ;;  %1741 = vmax.xlane.f32.xlu0 %v1740_v53  ;;  %v1892_v39 = vsel %vm378_vm6, %v4314_v19, -inf }
 0x334   :  { %v4316_v27 = vmul.f32 0.35355338, %v1872_v26  ;;  %v1886_v58 = vsel %vm371_vm7, %v4318_v32, -inf }
 0x336   :  { %v1889_v42 = vsel %vm371_vm7, %v4316_v27, -inf }
 0x337   :  { %1893 = vmax.xlane.f32.xlu0 %v1892_v39  ;;  %1890 = vmax.xlane.f32.xlu1 %v1889_v42 }
 0x338   :  { %v3450_v45 = vpop.f32.mrb[36].mxu1 }
 0x339   :  { %v4324_v48 = vmul.f32 0.35355338, %v3450_v45  ;;  %v2017_v50 = vpop.f32.mrb[37].mxu1 }
 0x33a   :  { %v3451_v55 = vpop.f32.mrb[38].mxu1  ;;  %v4328_v61 = vmul.f32 0.35355338, %v2017_v50 }
 0x33b   :  { %v2020_v0 = vpop.f32.mrb[39].mxu1  ;;  %1887 = vmax.xlane.f32.xlu0 %v1886_v58  ;;  %v2040_v3 = vsel %vm378_vm6, %v4324_v48, -inf }
 0x33c   :  { %v4332_v6 = vmul.f32 0.35355338, %v2020_v0  ;;  %2041 = vmax.xlane.f32.xlu1 %v2040_v3  ;;  %v2034_v8 = vsel %vm371_vm7, %v4328_v61, -inf }
 0x33e   :  { %v2037_v7 = vsel %vm371_vm7, %v4332_v6, -inf }
 0x33f   :  { %2038 = vmax.xlane.f32.xlu0 %v2037_v7 }
 0x340   :  { %v3462_v12 = vpop.f32.mrb[40].mxu1  ;;  %2035 = vmax.xlane.f32.xlu1 %v2034_v8 }
 0x341   :  { %v4338_v13 = vmul.f32 0.35355338, %v3462_v12  ;;  %v2165_v57 = vpop.f32.mrb[41].mxu1 }
 0x342   :  { %v4340_v53 = vmul.f32 0.35355338, %v2165_v57  ;;  %v3463_v17 = vpop.f32.mrb[42].mxu1 }
 0x343   :  { %v2168_v21 = vpop.f32.mrb[43].mxu1  ;;  %v2188_v26 = vsel %vm378_vm6, %v4338_v13, -inf }
 0x344   :  { %v4344_v39 = vmul.f32 0.35355338, %v2168_v21  ;;  %2189 = vmax.xlane.f32.xlu1 %v2188_v26  ;;  %v2182_v42 = vsel %vm371_vm7, %v4340_v53, -inf }
 0x345   :  { %2183 = vmax.xlane.f32.xlu0 %v2182_v42 }
 0x346   :  { %v2185_v45 = vsel %vm371_vm7, %v4344_v39, -inf }
 0x348   :  { %v3474_v50 = vpop.f32.mrb[44].mxu1  ;;  %2186 = vmax.xlane.f32.xlu1 %v2185_v45 }
 0x349   :  { %v4350_v55 = vmul.f32 0.35355338, %v3474_v50  ;;  %v2313_v58 = vpop.f32.mrb[45].mxu1 }
 0x34a   :  { %v4352_v0 = vmul.f32 0.35355338, %v2313_v58  ;;  %v3475_v3 = vpop.f32.mrb[46].mxu1 }
 0x34b   :  { %v2316_v7 = vpop.f32.mrb[47].mxu1  ;;  %v2336_v8 = vsel %vm378_vm6, %v4350_v55, -inf }
 0x34c   :  { %v4356_v12 = vmul.f32 0.35355338, %v2316_v7  ;;  %2337 = vmax.xlane.f32.xlu1 %v2336_v8  ;;  %v2330_v57 = vsel %vm371_vm7, %v4352_v0, -inf }
 0x34d   :  { %2331 = vmax.xlane.f32.xlu0 %v2330_v57 }
 0x34e   :  { %5009 = vst [vmem:[#allocation13_spill] sm:$0xff] %v4356_v12  ;;  %v2333_v17 = vsel %vm371_vm7, %v4356_v12, -inf }
 0x350   :  { %v3486_v21 = vpop.f32.mrb[48].mxu1  ;;  %2334 = vmax.xlane.f32.xlu1 %v2333_v17 }
 0x351   :  { %v4362_v26 = vmul.f32 0.35355338, %v3486_v21  ;;  %v2461_v42 = vpop.f32.mrb[49].mxu1 }
 0x352   :  { %v4364_v45 = vmul.f32 0.35355338, %v2461_v42  ;;  %v3487_v50 = vpop.f32.mrb[50].mxu1 }
 0x353   :  { %5010 = vst [vmem:[#allocation14_spill] sm:$0xff] %v4362_v26  ;;  %v2464_v58 = vpop.f32.mrb[51].mxu1  ;;  %v2484_v3 = vsel %vm378_vm6, %v4362_v26, -inf }
 0x354   :  { %5011 = vst [vmem:[#allocation15_spill] sm:$0xff] %v4364_v45  ;;  %v4368_v7 = vmul.f32 0.35355338, %v2464_v58  ;;  %2485 = vmax.xlane.f32.xlu1 %v2484_v3  ;;  %v2478_v8 = vsel %vm371_vm7, %v4364_v45, -inf }
 0x355   :  { %2479 = vmax.xlane.f32.xlu0 %v2478_v8 }
 0x356   :  { %5012 = vst [vmem:[#allocation16_spill] sm:$0xff] %v4368_v7  ;;  %v2481_v57 = vsel %vm371_vm7, %v4368_v7, -inf }
 0x358   :  { %v3498_v17 = vpop.f32.mrb[52].mxu1  ;;  %2482 = vmax.xlane.f32.xlu1 %v2481_v57 }
 0x359   :  { %v4374_v21 = vmul.f32 0.35355338, %v3498_v17  ;;  %v2609_v42 = vpop.f32.mrb[53].mxu1 }
 0x35a   :  { %v4376_v50 = vmul.f32 0.35355338, %v2609_v42  ;;  %v3499_v22 = vpop.f32.mrb[54].mxu1 }
 0x35b   :  { %5013 = vst [vmem:[#allocation17_spill] sm:$0xff] %v4374_v21  ;;  %v2612_v34 = vpop.f32.mrb[55].mxu1  ;;  %v2632_v58 = vsel %vm378_vm6, %v4374_v21, -inf }
 0x35c   :  { %5014 = vst [vmem:[#allocation18_spill] sm:$0xff] %v4376_v50  ;;  %v4380_v3 = vmul.f32 0.35355338, %v2612_v34  ;;  %2633 = vmax.xlane.f32.xlu1 %v2632_v58  ;;  %v2626_v8 = vsel %vm371_vm7, %v4376_v50, -inf }
 0x35d   :  { %2627 = vmax.xlane.f32.xlu0 %v2626_v8 }
 0x35e   :  { %5015 = vst [vmem:[#allocation19_spill] sm:$0xff] %v4380_v3  ;;  %v2629_v57 = vsel %vm371_vm7, %v4380_v3, -inf }
 0x360   :  { %v3510_v17 = vpop.f32.mrb[56].mxu1  ;;  %2630 = vmax.xlane.f32.xlu1 %v2629_v57 }
 0x361   :  { %v4386_v31 = vmul.f32 0.35355338, %v3510_v17  ;;  %v2757_v42 = vpop.f32.mrb[57].mxu1 }
 0x362   :  { %v4388_v22 = vmul.f32 0.35355338, %v2757_v42  ;;  %v3511_v37 = vpop.f32.mrb[58].mxu1 }
 0x363   :  { %5016 = vst [vmem:[#allocation20_spill] sm:$0xff] %v4386_v31  ;;  %v2760_v41 = vpop.f32.mrb[59].mxu1  ;;  %v2780_v34 = vsel %vm378_vm6, %v4386_v31, -inf }
 0x364   :  { %5017 = vst [vmem:[#allocation21_spill] sm:$0xff] %v4388_v22  ;;  %v4392_v58 = vmul.f32 0.35355338, %v2760_v41  ;;  %2781 = vmax.xlane.f32.xlu0 %v2780_v34  ;;  %v2774_v8 = vsel %vm371_vm7, %v4388_v22, -inf }
 0x365   :  { %2775 = vmax.xlane.f32.xlu1 %v2774_v8 }
 0x366   :  { %5018 = vst [vmem:[#allocation22_spill] sm:$0xff] %v4392_v58  ;;  %v2777_v57 = vsel %vm371_vm7, %v4392_v58, -inf }
 0x369   :  { %2778 = vmax.xlane.f32.xlu1 %v2777_v57 }
 0x381   :  { %v540_v17 = vpop.xlane.xlu0 %539 }
 0x382   :  { %v543_v42 = vsub.f32 %v4191_v63, %v540_v17 }
 0x384   :  { %v548_v35 = vmul.f32 1.442695, %v543_v42  ;;  %v537_v37 = vpop.xlane.xlu1 %536 }
 0x385   :  { %v542_v49 = vsub.f32 %v4197_v5, %v537_v37  ;;  %v534_v44 = vpop.xlane.xlu0 %533 }
 0x386   :  { %3669 = vpow2.f32 %v548_v35  ;;  %v541_v41 = vsub.f32 %v4193_v2, %v534_v44 }
 0x387   :  { %v546_v34 = vmul.f32 1.442695, %v542_v49 }
 0x388   :  { %v544_v33 = vmul.f32 1.442695, %v541_v41 }
 0x389   :  { %3671 = vpow2.f32 %v546_v34  ;;  %v698_v8 = vpop.xlane.xlu1 %697 }
 0x38a   :  { %3673 = vpow2.f32 %v544_v33  ;;  %v701_v3 = vsub.f32 %v4203_v9, %v698_v8 }
 0x38c   :  { %v695_v29 = vpop.xlane.xlu0 %694 }
 0x38d   :  { %v692_v57 = vpop.xlane.xlu1 %691  ;;  %v700_v22 = vsub.f32 %v4209_v15, %v695_v29 }
 0x38e   :  { %v699_v45 = vsub.f32 %v4205_v11, %v692_v57 }
 0x38f   :  { %v704_v7 = vmul.f32 1.442695, %v700_v22 }
 0x390   :  { %v4401_v23 = vpop.eup %3669  ;;  %v702_v29 = vmul.f32 1.442695, %v699_v45 }
 0x391   :  { %5019 = vst [vmem:[#allocation23_spill] sm:$0xff] %v4401_v23  ;;  %v556_v63 = vsel %vm378_vm6, %v4401_v23, 0.0  ;;  %v856_v17 = vpop.xlane.xlu0 %855 }
 0x392   :  { %557 = vadd.xlane.f32.xlu0 %v556_v63  ;;  %v859_v9 = vsub.f32 %v4217_v20, %v856_v17 }
 0x393   :  { %v4405_v42 = vpop.eup %3671 }
 0x394   :  { %5020 = vst [vmem:[#allocation24_spill] sm:$0xff] %v4405_v42  ;;  %v4407_v5 = vpop.eup %3673  ;;  %v853_v35 = vpop.xlane.xlu1 %852  ;;  %v553_v2 = vsel %vm371_vm7, %v4405_v42, 0.0 }
 0x395   :  { %5021 = vst [vmem:[#allocation25_spill] sm:$0xff] %v4407_v5  ;;  %554 = vadd.xlane.f32.xlu1 %v553_v2  ;;  %v550_v33 = vsel %vm371_vm7, %v4407_v5, 0.0  ;;  %v850_v44 = vpop.xlane.xlu0 %849  ;;  %v858_v50 = vsub.f32 %v4225_v28, %v853_v35 }
 0x396   :  { %551 = vadd.xlane.f32.xlu0 %v550_v33 }
 0x397   :  { %v862_v12 = vmul.f32 1.442695, %v858_v50 }
 0x399   :  { %v1014_v49 = vpop.xlane.xlu1 %1013 }
 0x39c   :  { %v1011_v37 = vpop.xlane.xlu0 %1010 }
 0x39d   :  { %v1008_v41 = vpop.xlane.xlu1 %1007 }
 0x3a1   :  { %v1172_v34 = vpop.xlane.xlu0 %1171 }
 0x3a4   :  { %v4413_v58 = vpop.xlane.xlu1 %1168 }
 0x3a5   :  { %v4417_v63 = vpop.xlane.xlu0 %1165 }
 0x3a6   :  { %2217 = vrot.lane.b32.xlu1 %v4010_v62, %s3870_s25 }
 0x3a9   :  { %v4419_v23 = vpop.xlane.xlu1 %1329 }
 0x3ac   :  { %2365 = vrot.lane.b32.xlu0 %v4010_v62, %s3869_s24  ;;  %v4423_v2 = vpop.xlane.xlu0 %1326  ;;  %v706_v62 = vmul.f32 1.442695, %v701_v3  ;;  %v1015_v3 = vsub.f32 %v4237_v40, %v1008_v41 }
 0x3ad   :  { %v4425_v33 = vpop.xlane.xlu1 %1323 }
 0x3ae   :  { %v1018_v57 = vmul.f32 1.442695, %v1015_v3 }
 0x3b0   :  { %v399_v5 = vpop.xlane.xlu0 %398 }
 0x3b1   :  { %v396_v42 = vpop.xlane.xlu1 %395  ;;  %3675 = vrcp.f32 %v399_v5  ;;  %v1017_v5 = vsub.f32 %v4235_v38, %v1014_v49  ;;  %v864_v38 = vmul.f32 1.442695, %v859_v9 }
 0x3b2   :  { %3677 = vrcp.f32 %v396_v42  ;;  %v1173_v42 = vsub.f32 %v4254_v60, %v4417_v63  ;;  %v1331_v63 = vsub.f32 %v4268_v16, %v4425_v33  ;;  %v1332_v16 = vsub.f32 %v4272_v25, %v4423_v2 }
 0x3b3   :  { %v1022_v22 = vmul.f32 1.442695, %v1017_v5 }
 0x3b4   :  { %v393_v31 = vpop.xlane.xlu0 %392  ;;  %v1176_v60 = vmul.f32 1.442695, %v1173_v42  ;;  %v1334_v33 = vmul.f32 1.442695, %v1331_v63  ;;  %v1336_v25 = vmul.f32 1.442695, %v1332_v16 }
 0x3b5   :  { %3679 = vrcp.f32 %v393_v31  ;;  %v4429_v21 = vpop.xlane.xlu1 %1484 }
 0x3b6   :  { %3681 = vpow2.f32 %v704_v7 }
 0x3b7   :  { %3683 = vpow2.f32 %v706_v62  ;;  %v857_v62 = vsub.f32 %v4221_v24, %v850_v44  ;;  %v1174_v44 = vsub.f32 %v4260_v51, %v4413_v58  ;;  %v1333_v58 = vsub.f32 %v4266_v14, %v4419_v23 }
 0x3b8   :  { %3685 = vpow2.f32 %v862_v12  ;;  %v1016_v12 = vsub.f32 %v4243_v47, %v1011_v37  ;;  %v1488_v17 = vpop.xlane.xlu0 %1487 }
 0x3b9   :  { %v4433_v26 = vpop.xlane.xlu1 %1744  ;;  %3687 = vpow2.f32 %v702_v29  ;;  %v860_v40 = vmul.f32 1.442695, %v857_v62  ;;  %v1178_v51 = vmul.f32 1.442695, %v1174_v44  ;;  %v1338_v23 = vmul.f32 1.442695, %v1333_v58 }
 0x3ba   :  { %3689 = vpow2.f32 %v1022_v22  ;;  %v1020_v47 = vmul.f32 1.442695, %v1016_v12  ;;  %v1491_v14 = vsub.f32 %v4288_v52, %v1488_v17  ;;  %v1490_v52 = vsub.f32 %v4290_v54, %v4429_v21 }
 0x3bb   :  { %v3676_v15 = vpop.eup %3675  ;;  %3691 = vpow2.f32 %v864_v38 }
 0x3bc   :  { %v3678_v31 = vpop.eup %3677  ;;  %v405_v28 = vmul.f32 %v3676_v15, %v4278_v30  ;;  %3693 = vpow2.f32 %v1018_v57  ;;  %v1496_v38 = vmul.f32 1.442695, %v1491_v14  ;;  %v1494_v21 = vmul.f32 1.442695, %v1490_v52 }
 0x3bd   :  { %v4439_v11 = vpop.xlane.xlu1 %1738  ;;  %v404_v7 = vmul.f32 %v3678_v31, %v4280_v36  ;;  %3695 = vpow2.f32 %v860_v40 }
 0x3be   :  { %v407_v20 = vpack.c.bf16 %v405_v28, %v405_v28  ;;  %3697 = vpow2.f32 %v1020_v47  ;;  %v1746_v54 = vsub.f32 %v4302_v4, %v4439_v11 }
 0x3bf   :  { %v3680_v8 = vpop.eup %3679 }
 0x3c0   :  { %v403_v50 = vmul.f32 %v3680_v8, %v4284_v46  ;;  %v1175_v46 = vsub.f32 %v4252_v56, %v1172_v34  ;;  %v4450_v36 = vpop.eup %3681  ;;  %v1482_v34 = vpop.xlane.xlu0 %1481  ;;  %v1749_v44 = vmul.f32 1.442695, %v1746_v54 }
 0x3c1   :  { %v4453_v24 = vpop.eup %3683  ;;  %v1489_v2 = vsub.f32 %v4296_v59, %v1482_v34 }
 0x3c2   :  { %v406_v45 = vpack.c.bf16 %v404_v7, %v403_v50  ;;  %v4458_v35 = vpop.eup %3685  ;;  %v1180_v56 = vmul.f32 1.442695, %v1175_v46  ;;  %v714_v37 = vsel %vm378_vm6, %v4453_v24, 0.0  ;;  %v1748_v46 = vsub.f32 %v4300_v1, %v4433_v26 }
 0x3c3   :  { %v4468_v41 = vpop.eup %3687  ;;  %v869_v15 = vsel %vm371_vm7, %v4458_v35, 0.0  ;;  %v1492_v59 = vmul.f32 1.442695, %v1489_v2 }
 0x3c4   :  { %3334 = vmatprep.mubr.msk.bf16.mxu0 %vm371_vm7, %v406_v45  ;;  %v4446_v30 = vpop.xlane.xlu1 %1890  ;;  %3699 = vpow2.f32 %v1180_v56  ;;  %v4478_v29 = vpop.eup %3689  ;;  %v708_v9 = vsel %vm371_vm7, %v4468_v41, 0.0  ;;  %v1753_v11 = vmul.f32 1.442695, %v1748_v46 }
 0x3c5   :  { %3335 = vmatmul.mubr.msk.bf16.vlgmr.msra.gmra.mrb[12].mxu0 %vm371_vm7, %v407_v20  ;;  %v4482_v31 = vpop.eup %3691  ;;  %3701 = vpow2.f32 %v1176_v60  ;;  %v1742_v8 = vpop.xlane.xlu0 %1741  ;;  %v1030_v22 = vsel %vm378_vm6, %v4478_v29, 0.0  ;;  %v1896_v58 = vsub.f32 %v4316_v27, %v4446_v30 }
 0x3c6   :  { %3345 = vmatpush3.bf16.msra.mxu0 %v4130_v43  ;;  %v711_v43 = vsel %vm371_vm7, %v4450_v36, 0.0  ;;  %3703 = vpow2.f32 %v1178_v51  ;;  %v4491_v3 = vpop.eup %3693  ;;  %v872_v50 = vsel %vm378_vm6, %v4482_v31, 0.0  ;;  %v1747_v4 = vsub.f32 %v4306_v10, %v1742_v8 }
 0x3c7   :  { %3356 = vmatprep.subr.bf16.mxu0 %v4215_v18  ;;  %v4495_v7 = vpop.eup %3695  ;;  %3705 = vpow2.f32 %v1334_v33  ;;  %v1024_v62 = vsel %vm371_vm7, %v4491_v3, 0.0  ;;  %v1900_v27 = vmul.f32 1.442695, %v1896_v58 }
 0x3c8   :  { %3707 = vpow2.f32 %v1338_v23  ;;  %v4502_v45 = vpop.eup %3697  ;;  %v866_v20 = vsel %vm371_vm7, %v4495_v7, 0.0  ;;  %v1751_v10 = vmul.f32 1.442695, %v1747_v4 }
 0x3c9   :  { %v4462_v49 = vpop.xlane.xlu1 %2041  ;;  %v1894_v57 = vpop.xlane.xlu0 %1893  ;;  %3709 = vpow2.f32 %v1336_v25  ;;  %v1027_v17 = vsel %vm371_vm7, %v4502_v45, 0.0 }
 0x3ca   :  { %712 = vadd.xlane.f32.xlu1 %v711_v43  ;;  %3711 = vpow2.f32 %v1496_v38  ;;  %v1897_v1 = vsub.f32 %v4314_v19, %v1894_v57  ;;  %v2045_v30 = vsub.f32 %v4324_v48, %v4462_v49 }
 0x3cb   :  { %715 = vadd.xlane.f32.xlu0 %v714_v37  ;;  %3713 = vpow2.f32 %v1492_v59 }
 0x3cc   :  { %3715 = vpow2.f32 %v1494_v21  ;;  %v1902_v19 = vmul.f32 1.442695, %v1897_v1  ;;  %v2050_v52 = vmul.f32 1.442695, %v2045_v30  ;;  %v5024_v30 = vld [vmem:[#allocation15_spill] sm:$0xff] }
 0x3cd   :  { %v4474_v5 = vpop.xlane.xlu1 %2035  ;;  %v1888_v26 = vpop.xlane.xlu0 %1887  ;;  %3717 = vpow2.f32 %v1749_v44 }
 0x3ce   :  { %870 = vadd.xlane.f32.xlu1 %v869_v15  ;;  %v4506_v12 = vpop.eup %3699  ;;  %v1895_v51 = vsub.f32 %v4318_v32, %v1888_v26  ;;  %3719 = vpow2.f32 %v1753_v11  ;;  %v2043_v14 = vsub.f32 %v4328_v61, %v4474_v5 }
 0x3cf   :  { %709 = vadd.xlane.f32.xlu0 %v708_v9  ;;  %v4516_v47 = vpop.eup %3701  ;;  %v1188_v42 = vsel %vm378_vm6, %v4506_v12, 0.0  ;;  %3721 = vpow2.f32 %v1751_v10 }
 0x3d0   :  { %v4520_v56 = vpop.eup %3703  ;;  %v1182_v37 = vsel %vm371_vm7, %v4516_v47, 0.0  ;;  %v1898_v32 = vmul.f32 1.442695, %v1895_v51  ;;  %3723 = vpow2.f32 %v1902_v19  ;;  %v2046_v5 = vmul.f32 1.442695, %v2043_v14 }
 0x3d1   :  { %v4487_v28 = vpop.xlane.xlu1 %2189  ;;  %v4528_v34 = vpop.eup %3705  ;;  %v1185_v60 = vsel %vm371_vm7, %v4520_v56, 0.0 }
 0x3d2   :  { %1031 = vadd.xlane.f32.xlu1 %v1030_v22  ;;  %v4532_v63 = vpop.eup %3707  ;;  %v1340_v15 = vsel %vm371_vm7, %v4528_v34, 0.0  ;;  %v2039_v8 = vpop.xlane.xlu0 %2038  ;;  %3725 = vpow2.f32 %v1898_v32  ;;  %v2193_v48 = vsub.f32 %v4338_v13, %v4487_v28 }
 0x3d3   :  { %873 = vadd.xlane.f32.xlu0 %v872_v50  ;;  %v4539_v9 = vpop.eup %3709  ;;  %v1346_v16 = vsel %vm378_vm6, %v4532_v63, 0.0  ;;  %v2044_v61 = vsub.f32 %v4332_v6, %v2039_v8  ;;  %3727 = vpow2.f32 %v1900_v27 }
 0x3d4   :  { %v4543_v33 = vpop.eup %3711  ;;  %v1343_v22 = vsel %vm371_vm7, %v4539_v9, 0.0  ;;  %3729 = vpow2.f32 %v2046_v5  ;;  %v2198_v13 = vmul.f32 1.442695, %v2193_v48 }
 0x3d5   :  { %v4508_v40 = vpop.xlane.xlu1 %2186  ;;  %v4553_v50 = vpop.eup %3713  ;;  %v1504_v25 = vsel %vm378_vm6, %v4543_v33, 0.0  ;;  %v2048_v6 = vmul.f32 1.442695, %v2044_v61  ;;  %3731 = vpow2.f32 %v2050_v52 }
 0x3d6   :  { %1025 = vadd.xlane.f32.xlu1 %v1024_v62  ;;  %v4557_v2 = vpop.eup %3715  ;;  %v2184_v49 = vpop.xlane.xlu0 %2183  ;;  %v1498_v62 = vsel %vm371_vm7, %v4553_v50, 0.0  ;;  %v2192_v28 = vsub.f32 %v4344_v39, %v4508_v40 }
 0x3d7   :  { %867 = vadd.xlane.f32.xlu0 %v866_v20  ;;  %v4564_v20 = vpop.eup %3717  ;;  %v1501_v57 = vsel %vm371_vm7, %v4557_v2, 0.0  ;;  %v2191_v54 = vsub.f32 %v4340_v53, %v2184_v49  ;;  %3733 = vpow2.f32 %v2048_v6  ;;  %v5026_v6 = vld [vmem:[#allocation18_spill] sm:$0xff] }
 0x3d8   :  { %v4568_v59 = vpop.eup %3719  ;;  %v1755_v46 = vsel %vm371_vm7, %v4564_v20, 0.0  ;;  %3735 = vpow2.f32 %v2198_v13  ;;  %v2196_v39 = vmul.f32 1.442695, %v2192_v28  ;;  %v5027_v28 = vld [vmem:[#allocation17_spill] sm:$0xff] }
 0x3d9   :  { %v4524_v43 = vpop.xlane.xlu1 %2337  ;;  %v2194_v53 = vmul.f32 1.442695, %v2191_v54 }
 0x3da   :  { %1028 = vadd.xlane.f32.xlu1 %v1027_v17  ;;  %v2332_v21 = vpop.xlane.xlu0 %2331  ;;  %v4575_v17 = vpop.eup %3721  ;;  %v2341_v40 = vsub.f32 %v4350_v55, %v4524_v43  ;;  %v5023_v55 = vld [vmem:[#allocation14_spill] sm:$0xff] }
 0x3db   :  { %1189 = vadd.xlane.f32.xlu0 %v1188_v42  ;;  %v1761_v42 = vsel %vm378_vm6, %v4568_v59, 0.0  ;;  %v4579_v44 = vpop.eup %3723  ;;  %v2339_v11 = vsub.f32 %v4352_v0, %v2332_v21  ;;  %v1758_v1 = vsel %vm371_vm7, %v4575_v17, 0.0  ;;  %3737 = vpow2.f32 %v2194_v53  ;;  %v5022_v0 = vld [vmem:[#allocation13_spill] sm:$0xff] }
 0x3dc   :  { %v4586_v26 = vpop.eup %3725  ;;  %3739 = vpow2.f32 %v2196_v39  ;;  %v2346_v19 = vmul.f32 1.442695, %v2341_v40  ;;  %v5028_v40 = vld [vmem:[#allocation19_spill] sm:$0xff] }
 0x3dd   :  { %v4545_v23 = vpop.xlane.xlu1 %2334  ;;  %v2342_v10 = vmul.f32 1.442695, %v2339_v11 }
 0x3de   :  { %1183 = vadd.xlane.f32.xlu1 %v1182_v37  ;;  %v1910_v37 = vsel %vm378_vm6, %v4579_v44, 0.0  ;;  %v2340_v51 = vsub.f32 %v5022_v0, %v4545_v23 }
 0x3df   :  { %1186 = vadd.xlane.f32.xlu0 %v1185_v60  ;;  %v4590_v60 = vpop.eup %3727  ;;  %3741 = vpow2.f32 %v2342_v10  ;;  %v5029_v10 = vld [vmem:[#allocation20_spill] sm:$0xff] }
 0x3e0   :  { %v4597_v32 = vpop.eup %3729  ;;  %v1907_v14 = vsel %vm371_vm7, %v4590_v60, 0.0  ;;  %v2344_v23 = vmul.f32 1.442695, %v2340_v51  ;;  %3743 = vpow2.f32 %v2346_v19 }
 0x3e1   :  { %v2486_v38 = vpop.xlane.xlu1 %2485  ;;  %v4601_v27 = vpop.eup %3731  ;;  %v2052_v52 = vsel %vm371_vm7, %v4597_v32, 0.0 }
 0x3e2   :  { %1341 = vadd.xlane.f32.xlu1 %v1340_v15  ;;  %v2489_v43 = vsub.f32 %v5023_v55, %v2486_v38  ;;  %v2480_v58 = vpop.xlane.xlu0 %2479  ;;  %v4607_v48 = vpop.eup %3733  ;;  %v2058_v49 = vsel %vm378_vm6, %v4601_v27, 0.0  ;;  %3745 = vpow2.f32 %v2344_v23 }
 0x3e3   :  { %1347 = vadd.xlane.f32.xlu0 %v1346_v16  ;;  %v1904_v16 = vsel %vm371_vm7, %v4586_v26, 0.0  ;;  %v2487_v8 = vsub.f32 %v5024_v30, %v2480_v58  ;;  %v4611_v38 = vpop.eup %3735 }
 0x3e4   :  { %v2206_v53 = vsel %vm378_vm6, %v4611_v38, 0.0 }
 0x3e5   :  { %v2483_v4 = vpop.xlane.xlu1 %2482 }
 0x3e6   :  { %1344 = vadd.xlane.f32.xlu1 %v1343_v22  ;;  %v2494_v22 = vmul.f32 1.442695, %v2489_v43 }
 0x3e7   :  { %1505 = vadd.xlane.f32.xlu0 %v1504_v25  ;;  %v5025_v25 = vld [vmem:[#allocation16_spill] sm:$0xff] }
 0x3e8   :  { %v2488_v61 = vsub.f32 %v5025_v25, %v2483_v4  ;;  %3747 = vpow2.f32 %v2494_v22 }
 0x3e9   :  { %v2634_v15 = vpop.xlane.xlu1 %2633 }
 0x3ea   :  { %1499 = vadd.xlane.f32.xlu1 %v1498_v62  ;;  %v2628_v5 = vpop.xlane.xlu0 %2627  ;;  %v2492_v13 = vmul.f32 1.442695, %v2488_v61  ;;  %v2637_v21 = vsub.f32 %v5027_v28, %v2634_v15 }
 0x3eb   :  { %1502 = vadd.xlane.f32.xlu0 %v1501_v57  ;;  %v2490_v57 = vmul.f32 1.442695, %v2487_v8  ;;  %v2635_v54 = vsub.f32 %v5026_v6, %v2628_v5 }
 0x3ed   :  { %v2631_v62 = vpop.xlane.xlu1 %2630  ;;  %3749 = vpow2.f32 %v2490_v57  ;;  %v2638_v39 = vmul.f32 1.442695, %v2635_v54 }
 0x3ee   :  { %1756 = vadd.xlane.f32.xlu1 %v1755_v46  ;;  %v2055_v46 = vsel %vm371_vm7, %v4607_v48, 0.0  ;;  %3751 = vpow2.f32 %v2492_v13 }
 0x3ef   :  { %1762 = vadd.xlane.f32.xlu0 %v1761_v42  ;;  %v4617_v42 = vpop.eup %3737  ;;  %3753 = vpow2.f32 %v2638_v39 }
 0x3f0   :  { %v4621_v11 = vpop.eup %3739  ;;  %v2200_v19 = vsel %vm371_vm7, %v4617_v42, 0.0 }
 0x3f1   :  { %v2782_v4 = vpop.xlane.xlu0 %2781  ;;  %v4627_v55 = vpop.eup %3741  ;;  %v2203_v43 = vsel %vm371_vm7, %v4621_v11, 0.0 }
 0x3f2   :  { %1759 = vadd.xlane.f32.xlu1 %v1758_v1  ;;  %v2636_v1 = vsub.f32 %v5028_v40, %v2631_v62  ;;  %v2785_v0 = vsub.f32 %v5029_v10, %v2782_v4  ;;  %v2776_v51 = vpop.xlane.xlu1 %2775  ;;  %v4631_v58 = vpop.eup %3743  ;;  %v2348_v30 = vsel %vm371_vm7, %v4627_v55, 0.0 }
 0x3f3   :  { %1911 = vadd.xlane.f32.xlu0 %v1910_v37  ;;  %v2642_v37 = vmul.f32 1.442695, %v2637_v21  ;;  %v4636_v8 = vpop.eup %3745  ;;  %v2354_v22 = vsel %vm378_vm6, %v4631_v58, 0.0 }
 0x3f4   :  { %v2640_v15 = vmul.f32 1.442695, %v2636_v1  ;;  %v2790_v23 = vmul.f32 1.442695, %v2785_v0  ;;  %v4640_v25 = vpop.eup %3747  ;;  %v2351_v5 = vsel %vm371_vm7, %v4636_v8, 0.0 }
 0x3f5   :  { %3755 = vpow2.f32 %v2642_v37 }
 0x3f6   :  { %1905 = vadd.xlane.f32.xlu1 %v1904_v16  ;;  %v5030_v16 = vld [vmem:[#allocation21_spill] sm:$0xff]  ;;  %3757 = vpow2.f32 %v2640_v15  ;;  %v2779_v37 = vpop.xlane.xlu1 %2778 }
 0x3f7   :  { %1908 = vadd.xlane.f32.xlu0 %v1907_v14  ;;  %v2783_v14 = vsub.f32 %v5030_v16, %v2776_v51  ;;  %3759 = vpow2.f32 %v2790_v23 }
 0x3f9   :  { %v2786_v61 = vmul.f32 1.442695, %v2783_v14  ;;  %v5032_v14 = vld [vmem:[#allocation23_spill] sm:$0xff] }
 0x3fa   :  { %2053 = vadd.xlane.f32.xlu1 %v2052_v52  ;;  %v4644_v52 = vpop.eup %3749 }
 0x3fb   :  { %2059 = vadd.xlane.f32.xlu0 %v2058_v49  ;;  %v2502_v49 = vsel %vm378_vm6, %v4640_v25, 0.0  ;;  %v4648_v62 = vpop.eup %3751  ;;  %3761 = vpow2.f32 %v2786_v61  ;;  %v2496_v57 = vsel %vm371_vm7, %v4644_v52, 0.0  ;;  %v5034_v61 = vld [vmem:[#allocation25_spill] sm:$0xff] }
 0x3fc   :  { %v4652_v6 = vpop.eup %3753  ;;  %v2499_v54 = vsel %vm371_vm7, %v4648_v62, 0.0 }
 0x3fd   :  { %v2644_v28 = vsel %vm371_vm7, %v4652_v6, 0.0 }
 0x3fe   :  { %2056 = vadd.xlane.f32.xlu1 %v2055_v46 }
 0x3ff   :  { %2207 = vadd.xlane.f32.xlu0 %v2206_v53  ;;  %v4656_v13 = vpop.eup %3755 }
 0x400   :  { %v4660_v21 = vpop.eup %3757  ;;  %v2650_v46 = vsel %vm378_vm6, %v4656_v13, 0.0 }
 0x401   :  { %v4664_v4 = vpop.eup %3759  ;;  %v2647_v53 = vsel %vm371_vm7, %v4660_v21, 0.0 }
 0x402   :  { %2201 = vadd.xlane.f32.xlu1 %v2200_v19  ;;  %v2798_v40 = vsel %vm378_vm6, %v4664_v4, 0.0 }
 0x403   :  { %2204 = vadd.xlane.f32.xlu0 %v2203_v43  ;;  %v5031_v43 = vld [vmem:[#allocation4_spill] sm:$0xff] }
 0x405   :  { %v4668_v39 = vpop.eup %3761 }
 0x406   :  { %2349 = vadd.xlane.f32.xlu1 %v2348_v30  ;;  %v2792_v1 = vsel %vm371_vm7, %v4668_v39, 0.0  ;;  %v5033_v30 = vld [vmem:[#allocation24_spill] sm:$0xff] }
 0x407   :  { %2355 = vadd.xlane.f32.xlu0 %v2354_v22 }
 0x40a   :  { %2352 = vadd.xlane.f32.xlu1 %v2351_v5 }
 0x40b   :  { %2503 = vadd.xlane.f32.xlu0 %v2502_v49 }
 0x40e   :  { %2497 = vadd.xlane.f32.xlu1 %v2496_v57 }
 0x40f   :  { %2500 = vadd.xlane.f32.xlu0 %v2499_v54  ;;  %v5035_v54 = vld [vmem:[#allocation22_spill] sm:$0xff] }
 0x412   :  { %2645 = vadd.xlane.f32.xlu1 %v2644_v28  ;;  %v2784_v28 = vsub.f32 %v5035_v54, %v2779_v37 }
 0x413   :  { %2651 = vadd.xlane.f32.xlu0 %v2650_v46  ;;  %v5036_v46 = vld [vmem:[#allocation8_spill] sm:$0xff] }
 0x416   :  { %2648 = vadd.xlane.f32.xlu1 %v2647_v53  ;;  %v2788_v53 = vmul.f32 1.442695, %v2784_v28 }
 0x417   :  { %2799 = vadd.xlane.f32.xlu0 %v2798_v40 }
 0x41a   :  { %2793 = vadd.xlane.f32.xlu1 %v2792_v1 }
 0x41f   :  { %v558_v10 = vpop.xlane.xlu0 %557 }
 0x420   :  { %3763 = vrcp.f32 %v558_v10 }
 0x422   :  { %v555_v0 = vpop.xlane.xlu1 %554 }
 0x423   :  { %3765 = vrcp.f32 %v555_v0  ;;  %v552_v51 = vpop.xlane.xlu0 %551 }
 0x424   :  { %3767 = vrcp.f32 %v552_v51 }
 0x425   :  { %3769 = vpow2.f32 %v2788_v53 }
 0x426   :  { %v4690_v10 = vpop.permute.xlu1 %2217 }
 0x427   :  { %v4692_v0 = vpop.permute.xlu0 %2365 }
 0x42a   :  { %v3764_v19 = vpop.eup %3763 }
 0x42b   :  { %2513 = vrot.lane.b32.xlu1 %v5031_v43, %s3872_s27  ;;  %v564_v23 = vmul.f32 %v3764_v19, %v5032_v14 }
 0x42d   :  { %v3766_v15 = vpop.eup %3765  ;;  %2661 = vrot.lane.b32.xlu0 %v5031_v43, %s3871_s26  ;;  %v566_v57 = vpack.c.bf16 %v564_v23, %v564_v23 }
 0x42e   :  { %v3768_v16 = vpop.eup %3767  ;;  %v563_v22 = vmul.f32 %v3766_v15, %v5033_v30 }
 0x42f   :  { %v562_v5 = vmul.f32 %v3768_v16, %v5034_v61  ;;  %v4686_v40 = vpop.eup %3769 }
 0x430   :  { %v2795_v1 = vsel %vm371_vm7, %v4686_v40, 0.0 }
 0x431   :  { %v565_v49 = vpack.c.bf16 %v563_v22, %v562_v5 }
 0x433   :  { %3346 = vmatprep.mubr.msk.bf16.mxu0 %vm371_vm7, %v565_v49 }
 0x434   :  { %3347 = vmatmul.mubr.msk.bf16.vlgmr.msra.gmra.mrb[16].mxu0 %vm371_vm7, %v566_v57 }
 0x435   :  { %3357 = vmatpush3.bf16.msra.mxu0 %v4215_v18 }
 0x436   :  { %3368 = vmatprep.subr.bf16.mxu0 %v5036_v46 }
 0x44c   :  { %2796 = vadd.xlane.f32.xlu0 %v2795_v1 }
 0x457   :  { %v713_v51 = vpop.xlane.xlu1 %712 }
 0x458   :  { %v716_v19 = vpop.xlane.xlu0 %715 }
 0x459   :  { %3771 = vrcp.f32 %v716_v19 }
 0x45a   :  { %3773 = vrcp.f32 %v713_v51 }
 0x45b   :  { %v871_v18 = vpop.xlane.xlu1 %870 }
 0x45c   :  { %v710_v37 = vpop.xlane.xlu0 %709 }
 0x45d   :  { %3775 = vrcp.f32 %v710_v37  ;;  %v5037_v37 = vld [vmem:[#allocation9_spill] sm:$0xff] }
 0x45f   :  { %v1032_v15 = vpop.xlane.xlu1 %1031 }
 0x460   :  { %v874_v16 = vpop.xlane.xlu0 %873 }
 0x461   :  { %3777 = vrcp.f32 %v874_v16 }
 0x462   :  { %2809 = vrot.lane.b32.xlu0 %v5031_v43, %s3873_s28  ;;  %3779 = vrcp.f32 %v871_v18 }
 0x463   :  { %v1026_v14 = vpop.xlane.xlu1 %1025  ;;  %v3772_v23 = vpop.eup %3771 }
 0x464   :  { %v868_v30 = vpop.xlane.xlu0 %867  ;;  %v3774_v22 = vpop.eup %3773  ;;  %v722_v5 = vmul.f32 %v3772_v23, %v4453_v24 }
 0x465   :  { %3781 = vrcp.f32 %v868_v30  ;;  %v721_v28 = vmul.f32 %v3774_v22, %v4450_v36 }
 0x466   :  { %3783 = vrcp.f32 %v1026_v14  ;;  %v724_v1 = vpack.c.bf16 %v722_v5, %v722_v5 }
 0x467   :  { %v3776_v61 = vpop.eup %3775  ;;  %v1029_v49 = vpop.xlane.xlu1 %1028 }
 0x468   :  { %3785 = vrcp.f32 %v1029_v49  ;;  %v1190_v57 = vpop.xlane.xlu0 %1189  ;;  %v720_v54 = vmul.f32 %v3776_v61, %v4468_v41 }
 0x469   :  { %3787 = vrcp.f32 %v1032_v15 }
 0x46a   :  { %v723_v53 = vpack.c.bf16 %v721_v28, %v720_v54 }
 0x46b   :  { %v1184_v43 = vpop.xlane.xlu1 %1183  ;;  %v3778_v51 = vpop.eup %3777 }
 0x46c   :  { %3789 = vrcp.f32 %v1184_v43  ;;  %v1187_v19 = vpop.xlane.xlu0 %1186  ;;  %3358 = vmatprep.mubr.msk.bf16.mxu0 %vm371_vm7, %v723_v53  ;;  %v3780_v18 = vpop.eup %3779  ;;  %v880_v41 = vmul.f32 %v3778_v51, %v4482_v31  ;;  %v5038_v53 = vld [vmem:[#allocation10_spill] sm:$0xff] }
 0x46d   :  { %3791 = vrcp.f32 %v1187_v19  ;;  %3359 = vmatmul.mubr.msk.bf16.vlgmr.msra.gmra.mrb[20].mxu0 %vm371_vm7, %v724_v1  ;;  %v879_v23 = vmul.f32 %v3780_v18, %v4458_v35 }
 0x46e   :  { %3369 = vmatpush3.bf16.msra.mxu0 %v5036_v46  ;;  %3793 = vrcp.f32 %v1190_v57  ;;  %v882_v5 = vpack.c.bf16 %v880_v41, %v880_v41 }
 0x46f   :  { %v3782_v24 = vpop.eup %3781  ;;  %3380 = vmatprep.subr.bf16.mxu0 %v5037_v37  ;;  %v1342_v36 = vpop.xlane.xlu1 %1341 }
 0x470   :  { %v3784_v15 = vpop.eup %3783  ;;  %v1348_v16 = vpop.xlane.xlu0 %1347  ;;  %v878_v14 = vmul.f32 %v3782_v24, %v4495_v7 }
 0x471   :  { %v1036_v49 = vmul.f32 %v3784_v15, %v4491_v3 }
 0x472   :  { %v3786_v30 = vpop.eup %3785  ;;  %v881_v22 = vpack.c.bf16 %v879_v23, %v878_v14 }
 0x473   :  { %v1345_v61 = vpop.xlane.xlu1 %1344  ;;  %v1037_v46 = vmul.f32 %v3786_v30, %v4502_v45  ;;  %v3788_v54 = vpop.eup %3787 }
 0x474   :  { %3795 = vrcp.f32 %v1345_v61  ;;  %v1506_v31 = vpop.xlane.xlu0 %1505  ;;  %3370 = vmatprep.mubr.msk.bf16.mxu0 %vm371_vm7, %v881_v22  ;;  %v1038_v57 = vmul.f32 %v3788_v54, %v4478_v29 }
 0x475   :  { %3797 = vrcp.f32 %v1342_v36  ;;  %3371 = vmatmul.mubr.msk.bf16.vlgmr.msra.gmra.mrb[24].mxu0 %vm371_vm7, %v882_v5  ;;  %v1039_v7 = vpack.c.bf16 %v1037_v46, %v1036_v49  ;;  %v5039_v36 = vld [vmem:[#allocation11_spill] sm:$0xff] }
 0x476   :  { %v3790_v28 = vpop.eup %3789  ;;  %3381 = vmatpush3.bf16.msra.mxu0 %v5037_v37  ;;  %3799 = vrcp.f32 %v1348_v16  ;;  %v1040_v19 = vpack.c.bf16 %v1038_v57, %v1038_v57 }
 0x477   :  { %v3792_v35 = vpop.eup %3791  ;;  %3392 = vmatprep.subr.bf16.mxu0 %v5038_v53  ;;  %3382 = vmatprep.mubr.msk.bf16.mxu0 %vm371_vm7, %v1039_v7  ;;  %v1500_v3 = vpop.xlane.xlu1 %1499  ;;  %v1194_v43 = vmul.f32 %v3790_v28, %v4516_v47 }
 0x478   :  { %v1503_v45 = vpop.xlane.xlu0 %1502  ;;  %v1195_v1 = vmul.f32 %v3792_v35, %v4520_v56  ;;  %3801 = vrcp.f32 %v1500_v3  ;;  %v3794_v18 = vpop.eup %3793 }
 0x479   :  { %3803 = vrcp.f32 %v1503_v45  ;;  %v1196_v47 = vmul.f32 %v3794_v18, %v4506_v12  ;;  %v5041_v45 = vld [vmem:[#allocation5_spill] sm:$0xff] }
 0x47a   :  { %v1197_v41 = vpack.c.bf16 %v1195_v1, %v1194_v43  ;;  %3805 = vrcp.f32 %v1506_v31 }
 0x47b   :  { %v1757_v51 = vpop.xlane.xlu1 %1756  ;;  %v1198_v22 = vpack.c.bf16 %v1196_v47, %v1196_v47  ;;  %v5042_v47 = vld [vmem:[#allocation7_spill] sm:$0xff] }
 0x47c   :  { %v1763_v24 = vpop.xlane.xlu0 %1762 }
 0x47d   :  { %3383 = vmatmul.mubr.msk.bf16.vlgmr.msra.gmra.mrb[28].mxu0 %vm371_vm7, %v1040_v19 }
 0x47e   :  { %v3796_v29 = vpop.eup %3795  ;;  %3393 = vmatpush3.bf16.msra.mxu0 %v5038_v53  ;;  %3394 = vmatprep.mubr.msk.bf16.mxu0 %vm371_vm7, %v1197_v41 }
 0x47f   :  { %v3798_v37 = vpop.eup %3797  ;;  %3404 = vmatprep.subr.bf16.mxu0 %v5039_v36  ;;  %v1760_v56 = vpop.xlane.xlu1 %1759  ;;  %v1353_v16 = vmul.f32 %v3796_v29, %v4539_v9  ;;  %v5040_v9 = vld [vmem:[#allocation12_spill] sm:$0xff] }
 0x480   :  { %v1912_v15 = vpop.xlane.xlu0 %1911  ;;  %v1352_v14 = vmul.f32 %v3798_v37, %v4528_v34  ;;  %v3800_v23 = vpop.eup %3799  ;;  %3807 = vrcp.f32 %v1760_v56 }
 0x481   :  { %3809 = vrcp.f32 %v1757_v51  ;;  %v1354_v12 = vmul.f32 %v3800_v23, %v4532_v63 }
 0x482   :  { %v3802_v61 = vpop.eup %3801  ;;  %v1355_v49 = vpack.c.bf16 %v1353_v16, %v1352_v14  ;;  %3811 = vrcp.f32 %v1763_v24 }
 0x483   :  { %v1906_v30 = vpop.xlane.xlu1 %1905  ;;  %v3804_v46 = vpop.eup %3803  ;;  %v1510_v54 = vmul.f32 %v3802_v61, %v4553_v50  ;;  %v1356_v35 = vpack.c.bf16 %v1354_v12, %v1354_v12 }
 0x484   :  { %v1909_v5 = vpop.xlane.xlu0 %1908  ;;  %v1511_v31 = vmul.f32 %v3804_v46, %v4557_v2  ;;  %3813 = vrcp.f32 %v1906_v30  ;;  %v3806_v57 = vpop.eup %3805  ;;  %v5043_v46 = vld [vmem:[#allocation6_spill] sm:$0xff] }
 0x485   :  { %3395 = vmatmul.mubr.msk.bf16.vlgmr.msra.gmra.mrb[32].mxu0 %vm371_vm7, %v1198_v22  ;;  %3815 = vrcp.f32 %v1909_v5  ;;  %v1512_v50 = vmul.f32 %v3806_v57, %v4543_v33 }
 0x486   :  { %3405 = vmatpush3.bf16.msra.mxu0 %v5039_v36  ;;  %3406 = vmatprep.mubr.msk.bf16.mxu0 %vm371_vm7, %v1355_v49  ;;  %v1513_v53 = vpack.c.bf16 %v1511_v31, %v1510_v54  ;;  %3817 = vrcp.f32 %v1912_v15 }
 0x487   :  { %3416 = vmatprep.subr.bf16.mxu0 %v5040_v9  ;;  %v2054_v34 = vpop.xlane.xlu1 %2053  ;;  %v1514_v24 = vpack.c.bf16 %v1512_v50, %v1512_v50 }
 0x488   :  { %v2060_v7 = vpop.xlane.xlu0 %2059 }
 0x48a   :  { %v3808_v3 = vpop.eup %3807 }
 0x48b   :  { %v2057_v28 = vpop.xlane.xlu1 %2056  ;;  %v3810_v63 = vpop.eup %3809  ;;  %v1768_v1 = vmul.f32 %v3808_v3, %v4575_v17 }
 0x48c   :  { %v2208_v43 = vpop.xlane.xlu0 %2207  ;;  %v1767_v51 = vmul.f32 %v3810_v63, %v4564_v20  ;;  %v3812_v19 = vpop.eup %3811  ;;  %3819 = vrcp.f32 %v2057_v28 }
 0x48d   :  { %3407 = vmatmul.mubr.msk.bf16.vlgmr.msra.gmra.mrb[36].mxu0 %vm371_vm7, %v1356_v35  ;;  %3821 = vrcp.f32 %v2054_v34  ;;  %v1769_v17 = vmul.f32 %v3812_v19, %v4568_v59 }
 0x48e   :  { %3417 = vmatpush3.bf16.msra.mxu0 %v5040_v9  ;;  %3418 = vmatprep.mubr.msk.bf16.mxu0 %vm371_vm7, %v1513_v53  ;;  %v3814_v41 = vpop.eup %3813  ;;  %v1770_v29 = vpack.c.bf16 %v1768_v1, %v1767_v51  ;;  %3823 = vrcp.f32 %v2060_v7 }
 0x48f   :  { %3428 = vmatprep.subr.bf16.mxu0 %v5041_v45  ;;  %v2202_v2 = vpop.xlane.xlu1 %2201  ;;  %v3816_v37 = vpop.eup %3815  ;;  %v1916_v56 = vmul.f32 %v3814_v41, %v4586_v26  ;;  %v1771_v30 = vpack.c.bf16 %v1769_v17, %v1769_v17 }
 0x490   :  { %v2205_v33 = vpop.xlane.xlu0 %2204  ;;  %v1917_v15 = vmul.f32 %v3816_v37, %v4590_v60  ;;  %3825 = vrcp.f32 %v2202_v2  ;;  %v3818_v22 = vpop.eup %3817 }
 0x491   :  { %3827 = vrcp.f32 %v2205_v33  ;;  %v1918_v60 = vmul.f32 %v3818_v22, %v4579_v44 }
 0x492   :  { %v1919_v61 = vpack.c.bf16 %v1917_v15, %v1916_v56  ;;  %3829 = vrcp.f32 %v2208_v43 }
 0x493   :  { %v2350_v18 = vpop.xlane.xlu1 %2349  ;;  %v1920_v31 = vpack.c.bf16 %v1918_v60, %v1918_v60 }
 0x494   :  { %v2356_v59 = vpop.xlane.xlu0 %2355 }
 0x495   :  { %3419 = vmatmul.mubr.msk.bf16.vlgmr.msra.gmra.mrb[40].mxu0 %vm371_vm7, %v1514_v24 }
 0x496   :  { %3429 = vmatpush3.bf16.msra.mxu0 %v5041_v45  ;;  %3430 = vmatprep.mubr.msk.bf16.mxu0 %vm371_vm7, %v1770_v29  ;;  %v3820_v5 = vpop.eup %3819 }
 0x497   :  { %3440 = vmatprep.subr.bf16.mxu0 %v5042_v47  ;;  %v2353_v20 = vpop.xlane.xlu1 %2352  ;;  %v3822_v26 = vpop.eup %3821  ;;  %v2065_v12 = vmul.f32 %v3820_v5, %v4607_v48 }
 0x498   :  { %v4742_v36 = vpop.f32.mrb[12].mxu0  ;;  %v2504_v9 = vpop.xlane.xlu0 %2503  ;;  %v2064_v34 = vmul.f32 %v3822_v26, %v4597_v32  ;;  %3831 = vrcp.f32 %v2353_v20 }
 0x499   :  { %v4746_v16 = vpop.f32.mrb[13].mxu0  ;;  %v3824_v54 = vpop.eup %3823  ;;  %3833 = vrcp.f32 %v2350_v18 }
 0x49a   :  { %v3337_v14 = vpop.f32.mrb[14].mxu0  ;;  %v3826_v7 = vpop.eup %3825  ;;  %v2067_v35 = vpack.c.bf16 %v2065_v12, %v2064_v34  ;;  %v2066_v44 = vmul.f32 %v3824_v54, %v4601_v27  ;;  %3835 = vrcp.f32 %v2356_v59 }
 0x49b   :  { %v4748_v23 = vpop.f32.mrb[15].mxu0  ;;  %v2498_v49 = vpop.xlane.xlu1 %2497  ;;  %v2212_v32 = vmul.f32 %v3826_v7, %v4617_v42 }
 0x49c   :  { %v3828_v57 = vpop.eup %3827  ;;  %v2501_v48 = vpop.xlane.xlu0 %2500  ;;  %3837 = vrcp.f32 %v2498_v49  ;;  %v2068_v63 = vpack.c.bf16 %v2066_v44, %v2066_v44 }
 0x49d   :  { %3431 = vmatmul.mubr.msk.bf16.vlgmr.msra.gmra.mrb[44].mxu0 %vm371_vm7, %v1771_v30  ;;  %v2213_v53 = vmul.f32 %v3828_v57, %v4621_v11  ;;  %3839 = vrcp.f32 %v2501_v48  ;;  %v3830_v50 = vpop.eup %3829 }
 0x49e   :  { %3441 = vmatpush3.bf16.msra.mxu0 %v5042_v47  ;;  %3442 = vmatprep.mubr.msk.bf16.mxu0 %vm371_vm7, %v1919_v61  ;;  %v2214_v43 = vmul.f32 %v3830_v50, %v4611_v38  ;;  %3841 = vrcp.f32 %v2504_v9 }
 0x49f   :  { %3452 = vmatprep.subr.bf16.mxu0 %v5043_v46  ;;  %v2646_v28 = vpop.xlane.xlu1 %2645  ;;  %v2215_v45 = vpack.c.bf16 %v2213_v53, %v2212_v32 }
 0x4a0   :  { %v2652_v1 = vpop.xlane.xlu0 %2651  ;;  %v2216_v18 = vpack.c.bf16 %v2214_v43, %v2214_v43 }
 0x4a2   :  { %v3832_v2 = vpop.eup %3831 }
 0x4a3   :  { %v2649_v3 = vpop.xlane.xlu1 %2648  ;;  %v3834_v27 = vpop.eup %3833  ;;  %v2361_v11 = vmul.f32 %v3832_v2, %v4636_v8  ;;  %v3657_v2 = vld [vmem:[%s4967_s6] sm:$0xff]  }
 0x4a4   :  { %v2360_v51 = vmul.f32 %v3834_v27, %v4627_v55  ;;  %v3836_v19 = vpop.eup %3835  ;;  %3843 = vrcp.f32 %v2649_v3  ;;  %v2800_v8 = vpop.xlane.xlu0 %2799  ;;  %3519 = vmatpush3.bf16.msra.mxu1 %v3657_v2  ;;  %v5044_v27 = vmov 0.0  }
 0x4a5   :  { %3443 = vmatmul.mubr.msk.bf16.vlgmr.msra.gmra.mrb[48].mxu0 %vm371_vm7, %v1920_v31  ;;  %3845 = vrcp.f32 %v2646_v28  ;;  %v2362_v38 = vmul.f32 %v3836_v19, %v4631_v58  ;;  %3520 = vmatprep.subr.bf16.mxu1 %v5044_v27 }
 0x4a6   :  { %3453 = vmatpush3.bf16.msra.mxu0 %v5043_v46  ;;  %3454 = vmatprep.mubr.msk.bf16.mxu0 %vm371_vm7, %v2067_v35  ;;  %v3838_v24 = vpop.eup %3837  ;;  %v2363_v41 = vpack.c.bf16 %v2361_v11, %v2360_v51  ;;  %3847 = vrcp.f32 %v2652_v1  ;;  %v3658_v51 = vld [vmem:[%s4967_s6 + $0x8] sm:$0xff]  }
 0x4a7   :  { %3464 = vmatprep.subr.bf16.mxu0 %v4690_v10  ;;  %v2794_v42 = vpop.xlane.xlu1 %2793  ;;  %v2508_v55 = vmul.f32 %v3838_v24, %v4644_v52  ;;  %v2364_v33 = vpack.c.bf16 %v2362_v38, %v2362_v38  ;;  %3849 = vrcp.f32 %v2800_v8  ;;  %v3660_v38 = vld [vmem:[%s4967_s6 + $0x18] sm:$0xff]  }
 0x4a8   :  { %v2662_v56 = vpop.permute.xlu0 %2661  ;;  %3851 = vrcp.f32 %v2794_v42  ;;  %3521 = vmatpush3.bf16.msra.mxu1 %v3658_v51  ;;  %v5046_v51 = vld [vmem:[#allocation3_spill] sm:$0xff] }
 0x4a9   :  { %3522 = vmatprep.subr.bf16.mxu1 %v5044_v27 }
 0x4ab   :  { %v2514_v29 = vpop.permute.xlu1 %2513 }
 0x4ad   :  { %3455 = vmatmul.mubr.msk.bf16.vlgmr.msra.gmra.mrb[52].mxu0 %vm371_vm7, %v2068_v63 }
 0x4ae   :  { %3465 = vmatpush3.bf16.msra.mxu0 %v4690_v10  ;;  %3466 = vmatprep.mubr.msk.bf16.mxu0 %vm371_vm7, %v2215_v45  ;;  %v3840_v10 = vpop.eup %3839 }
 0x4af   :  { %3476 = vmatprep.subr.bf16.mxu0 %v4692_v0  ;;  %v2509_v37 = vmul.f32 %v3840_v10, %v4648_v62  ;;  %v3842_v17 = vpop.eup %3841 }
 0x4b0   :  { %v3844_v20 = vpop.eup %3843  ;;  %v2510_v58 = vmul.f32 %v3842_v17, %v4640_v25 }
 0x4b1   :  { %v2511_v47 = vpack.c.bf16 %v2509_v37, %v2508_v55  ;;  %v2657_v15 = vmul.f32 %v3844_v20, %v4660_v21 }
 0x4b2   :  { %v2512_v62 = vpack.c.bf16 %v2510_v58, %v2510_v58 }
 0x4b5   :  { %3467 = vmatmul.mubr.msk.bf16.vlgmr.msra.gmra.mrb[56].mxu0 %vm371_vm7, %v2216_v18  ;;  %v3659_v18 = vld [vmem:[%s4967_s6 + $0x10] sm:$0xff]  }
 0x4b6   :  { %3477 = vmatpush3.bf16.msra.mxu0 %v4692_v0  ;;  %3478 = vmatprep.mubr.msk.bf16.mxu0 %vm371_vm7, %v2363_v41  ;;  %v3846_v0 = vpop.eup %3845 }
 0x4b7   :  { %3488 = vmatprep.subr.bf16.mxu0 %v2514_v29  ;;  %v2656_v52 = vmul.f32 %v3846_v0, %v4652_v6  ;;  %v3848_v14 = vpop.eup %3847  ;;  %3523 = vmatpush3.bf16.msra.mxu1 %v3659_v18 }
 0x4b8   :  { %v2658_v22 = vmul.f32 %v3848_v14, %v4656_v13  ;;  %v3850_v6 = vpop.eup %3849  ;;  %3524 = vmatprep.subr.bf16.mxu1 %v5044_v27 }
 0x4b9   :  { %v2659_v30 = vpack.c.bf16 %v2657_v15, %v2656_v52  ;;  %v3852_v61 = vpop.eup %3851  ;;  %v2806_v49 = vmul.f32 %v3850_v6, %v4664_v4 }
 0x4ba   :  { %v2660_v59 = vpack.c.bf16 %v2658_v22, %v2658_v22  ;;  %v2804_v26 = vmul.f32 %v3852_v61, %v4668_v39 }
 0x4bb   :  { %v2808_v46 = vpack.c.bf16 %v2806_v49, %v2806_v49  ;;  %3525 = vmatpush3.bf16.msra.mxu1 %v3660_v38 }
 0x4bd   :  { %3479 = vmatmul.mubr.msk.bf16.vlgmr.msra.gmra.mrb[60].mxu0 %vm371_vm7, %v2364_v33 }
 0x4be   :  { %3489 = vmatpush3.bf16.msra.mxu0 %v2514_v29  ;;  %3490 = vmatprep.mubr.msk.bf16.mxu0 %vm371_vm7, %v2511_v47 }
 0x4bf   :  { %3500 = vmatprep.subr.bf16.mxu0 %v2662_v56 }
 0x4c5   :  { %3491 = vmatmul.mubr.msk.bf16.vlgmr.msra.gmra.mrb[64].mxu0 %vm371_vm7, %v2512_v62 }
 0x4c6   :  { %3501 = vmatpush3.bf16.msra.mxu0 %v2662_v56  ;;  %3502 = vmatprep.mubr.msk.bf16.mxu0 %vm371_vm7, %v2659_v30 }
 0x4cd   :  { %3503 = vmatmul.mubr.msk.bf16.vlgmr.msra.gmra.mrb[68].mxu0 %vm371_vm7, %v2660_v59 }
 0x4d9   :  { %v2797_v25 = vpop.xlane.xlu0 %2796 }
 0x4da   :  { %3853 = vrcp.f32 %v2797_v25 }
 0x4dd   :  { %v2810_v21 = vpop.permute.xlu0 %2809 }
 0x4de   :  { %3512 = vmatprep.subr.bf16.mxu0 %v2810_v21 }
 0x4df   :  { %3513 = vmatpush3.bf16.msra.mxu0 %v2810_v21 }
 0x4e4   :  { %v3854_v5 = vpop.eup %3853 }
 0x4e5   :  { %v2805_v60 = vmul.f32 %v3854_v5, %v4686_v40 }
 0x4e7   :  { %v2807_v13 = vpack.c.bf16 %v2805_v60, %v2804_v26 }
 0x4e9   :  { %3514 = vmatprep.mubr.msk.bf16.mxu0 %vm371_vm7, %v2807_v13 }
 0x4ea   :  { %3515 = vmatmul.mubr.msk.bf16.vlgmr.msra.gmra.mrb[72].mxu0 %vm371_vm7, %v2808_v46 }
 0x507   :  { %v4791_v12 = vpop.f32.mrb[16].mxu0 }
 0x508   :  { %v610_v9 = vpop.f32.mrb[17].mxu0 }
 0x509   :  { %v3349_v34 = vpop.f32.mrb[18].mxu0 }
 0x50a   :  { %v613_v54 = vpop.f32.mrb[19].mxu0 }
 0x50b   :  { %v3571_v31 = vpack.i.bf16 %v613_v54, %v610_v9 }
 0x50d   :  { %3572 = vrot.lane.b32.xlu0 %v3571_v31, %s3873_s28 }
 0x540   :  { %v4794_v7 = vpop.f32.mrb[20].mxu0 }
 0x541   :  { %v768_v4 = vpop.f32.mrb[21].mxu0 }
 0x542   :  { %v3361_v39 = vpop.f32.mrb[22].mxu0 }
 0x543   :  { %v771_v28 = vpop.f32.mrb[23].mxu0 }
 0x544   :  { %v3576_v40 = vpack.i.bf16 %v771_v28, %v768_v4 }
 0x546   :  { %3577 = vrot.lane.b32.xlu1 %v3576_v40, %s3871_s26 }
 0x548   :  { %v3372_v35 = vpop.f32.mrb[24].mxu0 }
 0x549   :  { %v926_v57 = vpop.f32.mrb[25].mxu0 }
 0x54a   :  { %1603 = vrot.lane.b32.xlu1 %v3372_v35, %s3872_s27  ;;  %v3373_v44 = vpop.f32.mrb[26].mxu0 }
 0x54b   :  { %v929_v48 = vpop.f32.mrb[27].mxu0 }
 0x54c   :  { %v3581_v32 = vpack.i.bf16 %v929_v48, %v926_v57 }
 0x54e   :  { %3582 = vrot.lane.b32.xlu0 %v3581_v32, %s3872_s27 }
 0x550   :  { %v3384_v53 = vpop.f32.mrb[28].mxu0 }
 0x551   :  { %1615 = vrot.lane.b32.xlu1 %v3384_v53, %s3869_s24  ;;  %v1084_v3 = vpop.f32.mrb[29].mxu0 }
 0x552   :  { %v3385_v63 = vpop.f32.mrb[30].mxu0 }
 0x553   :  { %v1087_v50 = vpop.f32.mrb[31].mxu0 }
 0x554   :  { %v3586_v45 = vpack.i.bf16 %v1087_v50, %v1084_v3 }
 0x556   :  { %3587 = vrot.lane.b32.xlu1 %v3586_v45, %s3869_s24 }
 0x558   :  { %v3396_v43 = vpop.f32.mrb[32].mxu0 }
 0x559   :  { %v1242_v42 = vpop.f32.mrb[33].mxu0 }
 0x55a   :  { %1627 = vrot.lane.b32.xlu1 %v3396_v43, %s3870_s25  ;;  %v3397_v11 = vpop.f32.mrb[34].mxu0 }
 0x55b   :  { %v1245_v1 = vpop.f32.mrb[35].mxu0 }
 0x55c   :  { %v3591_v19 = vpack.i.bf16 %v1245_v1, %v1242_v42  ;;  %v5045_v42 = vld [vmem:[#allocation2_spill] sm:$0xff] }
 0x55d   :  { %v161_v11 = vrot.slane %v5045_v42, 4 }
 0x55e   :  { %3592 = vrot.lane.b32.xlu0 %v3591_v19, %s3870_s25  ;;  %v170_v19 = vrot.slane %v5046_v51, 4 }
 0x55f   :  { %v162_v18 = vadd.f32 %v161_v11, %v5045_v42 }
 0x560   :  { %v3408_v24 = vpop.f32.mrb[36].mxu0 }
 0x561   :  { %1639 = vrot.lane.b32.xlu1 %v3408_v24, %s3867_s23  ;;  %v1400_v41 = vpop.f32.mrb[37].mxu0  ;;  %v171_v24 = vadd.f32 %v170_v19, %v5046_v51 }
 0x562   :  { %v3409_v10 = vpop.f32.mrb[38].mxu0 }
 0x563   :  { %v1403_v29 = vpop.f32.mrb[39].mxu0  ;;  %v163_v10 = vrot.slane %v162_v18, 2 }
 0x564   :  { %v3596_v8 = vpack.i.bf16 %v1403_v29, %v1400_v41  ;;  %v172_v29 = vrot.slane %v171_v24, 2 }
 0x565   :  { %v164_v38 = vadd.f32 %v163_v10, %v162_v18 }
 0x566   :  { %3597 = vrot.lane.b32.xlu1 %v3596_v8, %s3867_s23  ;;  %v173_v8 = vadd.f32 %v172_v29, %v171_v24 }
 0x568   :  { %v3420_v55 = vpop.f32.mrb[40].mxu0 }
 0x569   :  { %1651 = vrot.lane.b32.xlu0 %v3420_v55, %s3868_s3  ;;  %v1558_v37 = vpop.f32.mrb[41].mxu0 }
 0x56a   :  { %v3421_v33 = vpop.f32.mrb[42].mxu0 }
 0x56b   :  { %v1561_v17 = vpop.f32.mrb[43].mxu0  ;;  %v165_v33 = vrot.slane %v164_v38, 1 }
 0x56c   :  { %v3601_v47 = vpack.i.bf16 %v1561_v17, %v1558_v37  ;;  %v174_v17 = vrot.slane %v173_v8, 1 }
 0x56e   :  { %3602 = vrot.lane.b32.xlu1 %v3601_v47, %s3868_s3 }
 0x570   :  { %v4822_v20 = vpop.f32.mrb[44].mxu0 }
 0x571   :  { %v4824_v56 = vpop.f32.mrb[45].mxu0 }
 0x572   :  { %v3433_v0 = vpop.f32.mrb[46].mxu0 }
 0x573   :  { %v4826_v58 = vpop.f32.mrb[47].mxu0 }
 0x578   :  { %v3444_v15 = vpop.f32.mrb[48].mxu0 }
 0x579   :  { %v3606_v52 = vpack.i.bf16 %v3444_v15, %v4791_v12  ;;  %v1964_v62 = vpop.f32.mrb[49].mxu0  ;;  %v166_v15 = vadd.f32 %v165_v33, %v164_v38 }
 0x57a   :  { %v3445_v14 = vpop.f32.mrb[50].mxu0 }
 0x57b   :  { %3607 = vrot.lane.b32.xlu1 %v3606_v52, %s3873_s28  ;;  %v1967_v30 = vpop.f32.mrb[51].mxu0  ;;  %v175_v52 = vadd.f32 %v174_v17, %v173_v8 }
 0x57c   :  { %v3611_v22 = vpack.i.bf16 %v1967_v30, %v1964_v62 }
 0x57e   :  { %3612 = vrot.lane.b32.xlu0 %v3611_v22, %s3873_s28 }
 0x57f   :  { %v3573_v37 = vpop.permute.xlu0 %3572 }
 0x580   :  { %v3456_v59 = vpop.f32.mrb[52].mxu0  ;;  %v3575_v62 = vunpack.i.h.bf16 %v3573_v37  ;;  %v3574_v14 = vunpack.i.l.bf16 %v3573_v37 }
 0x581   :  { %v3616_v25 = vpack.i.bf16 %v3456_v59, %v4794_v7  ;;  %v2112_v21 = vpop.f32.mrb[53].mxu0 }
 0x582   :  { %v3457_v6 = vpop.f32.mrb[54].mxu0 }
 0x583   :  { %3617 = vrot.lane.b32.xlu1 %v3616_v25, %s3871_s26  ;;  %v2115_v61 = vpop.f32.mrb[55].mxu0 }
 0x584   :  { %v3621_v5 = vpack.i.bf16 %v2115_v61, %v2112_v21 }
 0x586   :  { %3622 = vrot.lane.b32.xlu0 %v3621_v5, %s3871_s26 }
 0x588   :  { %v3468_v49 = vpop.f32.mrb[56].mxu0 }
 0x589   :  { %2897 = vrot.lane.b32.xlu1 %v3468_v49, %s3872_s27  ;;  %v2260_v26 = vpop.f32.mrb[57].mxu0  ;;  %v4856_v49 = vmul.f32 0.0625, %v166_v15 }
 0x58a   :  { %v3469_v60 = vpop.f32.mrb[58].mxu0 }
 0x58b   :  { %v2263_v13 = vpop.f32.mrb[59].mxu0  ;;  %v1657_v60 = vsel %vm310_vm4, %v4748_v23, %v3575_v62 }
 0x58c   :  { %v3626_v46 = vpack.i.bf16 %v2263_v13, %v2260_v26  ;;  %v4858_v26 = vmul.f32 0.0625, %v175_v52  ;;  %v1656_v13 = vsel %vm310_vm4, %v4746_v16, %v3574_v14  ;;  %v179_v16 = vmul.f32 %v4856_v49, %v4856_v49 }
 0x58e   :  { %3627 = vrot.lane.b32.xlu0 %v3626_v46, %s3872_s27 }
 0x590   :  { %v3480_v12 = vpop.f32.mrb[60].mxu0 }
 0x591   :  { %v2408_v9 = vpop.f32.mrb[61].mxu0 }
 0x592   :  { %v3481_v34 = vpop.f32.mrb[62].mxu0 }
 0x593   :  { %v2411_v54 = vpop.f32.mrb[63].mxu0 }
 0x594   :  { %v3631_v31 = vpack.i.bf16 %v2411_v54, %v2408_v9 }
 0x596   :  { %3632 = vrot.lane.b32.xlu0 %v3631_v31, %s3869_s24 }
 0x598   :  { %v3492_v7 = vpop.f32.mrb[64].mxu0 }
 0x599   :  { %2921 = vrot.lane.b32.xlu1 %v3492_v7, %s3870_s25  ;;  %v2556_v4 = vpop.f32.mrb[65].mxu0 }
 0x59a   :  { %v3493_v39 = vpop.f32.mrb[66].mxu0 }
 0x59b   :  { %v2559_v28 = vpop.f32.mrb[67].mxu0 }
 0x59c   :  { %v3636_v40 = vpack.i.bf16 %v2559_v28, %v2556_v4 }
 0x59e   :  { %3637 = vrot.lane.b32.xlu0 %v3636_v40, %s3870_s25  ;;  %v180_v40 = vmul.f32 %v4858_v26, %v4858_v26 }
 0x5a0   :  { %v3504_v35 = vpop.f32.mrb[68].mxu0 }
 0x5a1   :  { %v2704_v57 = vpop.f32.mrb[69].mxu0 }
 0x5a2   :  { %v3505_v44 = vpop.f32.mrb[70].mxu0 }
 0x5a3   :  { %v2707_v48 = vpop.f32.mrb[71].mxu0 }
 0x5a4   :  { %v3641_v32 = vpack.i.bf16 %v2707_v48, %v2704_v57 }
 0x5a6   :  { %3642 = vrot.lane.b32.xlu0 %v3641_v32, %s3867_s23 }
 0x5b8   :  { %v3578_v53 = vpop.permute.xlu1 %3577 }
 0x5b9   :  { %v3580_v30 = vunpack.i.h.bf16 %v3578_v53  ;;  %v3579_v22 = vunpack.i.l.bf16 %v3578_v53 }
 0x5bb   :  { %v1660_v9 = vsel %vm371_vm7, %v1657_v60, %v3580_v30  ;;  %v1659_v34 = vsel %vm371_vm7, %v1656_v13, %v3579_v22 }
 0x5bc   :  { %v4841_v2 = vpop.permute.xlu1 %1603 }
 0x5bd   :  { %v3516_v3 = vpop.f32.mrb[72].mxu0 }
 0x5be   :  { %2945 = vrot.lane.b32.xlu1 %v3516_v3, %s3868_s3  ;;  %v2852_v63 = vpop.f32.mrb[73].mxu0 }
 0x5bf   :  { %v3517_v50 = vpop.f32.mrb[74].mxu0 }
 0x5c0   :  { %v2855_v45 = vpop.f32.mrb[75].mxu0  ;;  %v3583_v0 = vpop.permute.xlu0 %3582 }
 0x5c1   :  { %v3646_v43 = vpack.i.bf16 %v2855_v45, %v2852_v63  ;;  %v3585_v25 = vunpack.i.h.bf16 %v3583_v0  ;;  %v3584_v21 = vunpack.i.l.bf16 %v3583_v0  ;;  %v183_v45 = vsel %vm57_vm1, %v180_v40, %v179_v16 }
 0x5c3   :  { %3647 = vrot.lane.b32.xlu0 %v3646_v43, %s3868_s3  ;;  %v4845_v1 = vpop.permute.xlu1 %1615  ;;  %v1663_v7 = vsel %vm1662_vm8, %v1659_v34, %v3584_v21  ;;  %v1664_v4 = vsel %vm1662_vm8, %v1660_v9, %v3585_v25  ;;  %v185_v43 = vsel %vm60_vm2, %v183_v45, 0.0 }
 0x5c7   :  { %2909 = vrot.lane.b32.xlu0 %v3480_v12, %s3869_s24 }
 0x5c8   :  { %v3588_v41 = vpop.permute.xlu1 %3587 }
 0x5c9   :  { %v3590_v61 = vunpack.i.h.bf16 %v3588_v41  ;;  %v3589_v5 = vunpack.i.l.bf16 %v3588_v41 }
 0x5cb   :  { %2933 = vrot.lane.b32.xlu0 %v3504_v35, %s3867_s23  ;;  %v1667_v39 = vsel %vm1666_vm9, %v1663_v7, %v3589_v5  ;;  %v1668_v23 = vsel %vm1666_vm9, %v1664_v4, %v3590_v61 }
 0x5cc   :  { %v4852_v55 = vpop.permute.xlu1 %1627 }
 0x5d0   :  { %v3593_v59 = vpop.permute.xlu0 %3592 }
 0x5d1   :  { %v3595_v46 = vunpack.i.h.bf16 %v3593_v59  ;;  %v3594_v12 = vunpack.i.l.bf16 %v3593_v59 }
 0x5d3   :  { %v4854_v47 = vpop.permute.xlu1 %1639  ;;  %v1671_v35 = vsel %vm1670_vm10, %v1667_v39, %v3594_v12  ;;  %v1672_v57 = vsel %vm1670_vm10, %v1668_v23, %v3595_v46 }
 0x5d8   :  { %v3598_v6 = vpop.permute.xlu1 %3597 }
 0x5d9   :  { %v3600_v54 = vunpack.i.h.bf16 %v3598_v6  ;;  %v3599_v31 = vunpack.i.l.bf16 %v3598_v6 }
 0x5db   :  { %v1675_v32 = vsel %vm1674_vm11, %v1671_v35, %v3599_v31  ;;  %v1676_v53 = vsel %vm1674_vm11, %v1672_v57, %v3600_v54  ;;  %v1652_v11 = vpop.permute.xlu0 %1651 }
 0x5e0   :  { %v3603_v28 = vpop.permute.xlu1 %3602 }
 0x5e1   :  { %v3605_v44 = vunpack.i.h.bf16 %v3603_v28  ;;  %v3604_v48 = vunpack.i.l.bf16 %v3603_v28 }
 0x5e3   :  { %v1679_v3 = vsel %vm1678_vm12, %v1675_v32, %v3604_v48  ;;  %v1680_v63 = vsel %vm1678_vm12, %v1676_v53, %v3605_v44 }
 0x5e4   :  { %v2984_v50 = vpack.c.bf16 %v1680_v63, %v1679_v3 }
 0x5e6   :  { %3527 = vmatmul.mubr.msk.bf16.vlgmr.msra.gmra.mrb[60].mxu1 %vm35_vm0, %v2984_v50 }
 0x5e7   :  { %3530 = vmatprep.mubr.msk.bf16.mxu1 %vm3858_vm3, %v5044_v27 }
 0x5ea   :  { %186 = vadd.xlane.f32.xlu0 %v185_v43 }
 0x5ed   :  { %v3608_v42 = vpop.permute.xlu1 %3607 }
 0x5ee   :  { %v3609_v51 = vunpack.i.l.bf16 %v3608_v42  ;;  %v3610_v18 = vunpack.i.h.bf16 %v3608_v42 }
 0x5f0   :  { %v1658_v41 = vsel %vm310_vm4, %v4742_v36, %v3609_v51  ;;  %v3613_v10 = vpop.permute.xlu0 %3612  ;;  %v2952_v33 = vsel %vm310_vm4, %v4822_v20, %v3610_v18 }
 0x5f1   :  { %v3615_v14 = vunpack.i.h.bf16 %v3613_v10 }
 0x5f3   :  { %v2951_v20 = vsel %vm310_vm4, %v4826_v58, %v3615_v14 }
 0x5f5   :  { %v3618_v19 = vpop.permute.xlu1 %3617 }
 0x5f6   :  { %v3619_v24 = vunpack.i.l.bf16 %v3618_v19  ;;  %v3620_v29 = vunpack.i.h.bf16 %v3618_v19 }
 0x5f8   :  { %v1661_v38 = vsel %vm371_vm7, %v1658_v41, %v3619_v24  ;;  %v3623_v0 = vpop.permute.xlu0 %3622  ;;  %v2955_v36 = vsel %vm371_vm7, %v2952_v33, %v3620_v29 }
 0x5f9   :  { %v1665_v8 = vsel %vm1662_vm8, %v1661_v38, %v4841_v2  ;;  %v3614_v2 = vunpack.i.l.bf16 %v3613_v10  ;;  %v3625_v30 = vunpack.i.h.bf16 %v3623_v0  ;;  %v3624_v22 = vunpack.i.l.bf16 %v3623_v0 }
 0x5fa   :  { %v1669_v37 = vsel %vm1666_vm9, %v1665_v8, %v4845_v1 }
 0x5fb   :  { %v1673_v17 = vsel %vm1670_vm10, %v1669_v37, %v4852_v55  ;;  %v2898_v15 = vpop.permute.xlu1 %2897  ;;  %v2950_v55 = vsel %vm310_vm4, %v4824_v56, %v3614_v2  ;;  %v2954_v21 = vsel %vm371_vm7, %v2951_v20, %v3625_v30 }
 0x5fc   :  { %v2958_v52 = vsel %vm1662_vm8, %v2955_v36, %v2898_v15  ;;  %v1677_v62 = vsel %vm1674_vm11, %v1673_v17, %v4854_v47  ;;  %v2953_v6 = vsel %vm371_vm7, %v2950_v55, %v3624_v22 }
 0x5fd   :  { %v1681_v63 = vsel %vm1678_vm12, %v1677_v62, %v1652_v11 }
 0x600   :  { %v3628_v1 = vpop.permute.xlu0 %3627 }
 0x601   :  { %v3630_v59 = vunpack.i.h.bf16 %v3628_v1  ;;  %v3629_v25 = vunpack.i.l.bf16 %v3628_v1 }
 0x603   :  { %v2957_v61 = vsel %vm1662_vm8, %v2954_v21, %v3630_v59  ;;  %v2956_v47 = vsel %vm1662_vm8, %v2953_v6, %v3629_v25 }
 0x608   :  { %v3633_v5 = vpop.permute.xlu0 %3632 }
 0x609   :  { %v3635_v46 = vunpack.i.h.bf16 %v3633_v5  ;;  %v3634_v12 = vunpack.i.l.bf16 %v3633_v5 }
 0x60b   :  { %v2960_v56 = vsel %vm1666_vm9, %v2957_v61, %v3635_v46  ;;  %v2959_v31 = vsel %vm1666_vm9, %v2956_v47, %v3634_v12  ;;  %v2922_v53 = vpop.permute.xlu1 %2921 }
 0x610   :  { %v3638_v60 = vpop.permute.xlu0 %3637 }
 0x611   :  { %v3640_v9 = vunpack.i.h.bf16 %v3638_v60  ;;  %v3639_v58 = vunpack.i.l.bf16 %v3638_v60 }
 0x613   :  { %v2963_v4 = vsel %vm1670_vm10, %v2960_v56, %v3640_v9  ;;  %v2962_v39 = vsel %vm1670_vm10, %v2959_v31, %v3639_v58 }
 0x618   :  { %v3643_v13 = vpop.permute.xlu0 %3642 }
 0x619   :  { %v3645_v34 = vunpack.i.h.bf16 %v3643_v13  ;;  %v3644_v54 = vunpack.i.l.bf16 %v3643_v13 }
 0x61b   :  { %v2966_v16 = vsel %vm1674_vm11, %v2963_v4, %v3645_v34  ;;  %v2965_v40 = vsel %vm1674_vm11, %v2962_v39, %v3644_v54 }
 0x630   :  { %v2946_v19 = vpop.permute.xlu1 %2945 }
 0x635   :  { %v3648_v7 = vpop.permute.xlu0 %3647 }
 0x636   :  { %v3650_v23 = vunpack.i.h.bf16 %v3648_v7  ;;  %v3649_v28 = vunpack.i.l.bf16 %v3648_v7 }
 0x638   :  { %v2969_v35 = vsel %vm1678_vm12, %v2966_v16, %v3650_v23  ;;  %v2968_v57 = vsel %vm1678_vm12, %v2965_v40, %v3649_v28 }
 0x639   :  { %v2976_v44 = vrot.slane %v2969_v35, 4  ;;  %v2975_v48 = vrot.slane %v2968_v57, 4  ;;  %v2910_v32 = vpop.permute.xlu0 %2909 }
 0x63a   :  { %v2961_v3 = vsel %vm1666_vm9, %v2958_v52, %v2910_v32 }
 0x63b   :  { %v2977_v50 = vsel %vm2974_vm13, %v2975_v48, %v2976_v44  ;;  %v2983_v45 = vsel %vm2974_vm13, %v1681_v63, %v2975_v48  ;;  %v2964_v51 = vsel %vm1670_vm10, %v2961_v3, %v2922_v53 }
 0x63c   :  { %v2985_v43 = vpack.c.bf16 %v2977_v50, %v2983_v45 }
 0x63d   :  { %v2934_v42 = vpop.permute.xlu0 %2933 }
 0x63e   :  { %v2967_v18 = vsel %vm1674_vm11, %v2964_v51, %v2934_v42  ;;  %3531 = vmatmul.mubr.msk.bf16.gmra.mrb[64].mxu1 %vm35_vm0, %v2985_v43 }
 0x63f   :  { %v2970_v24 = vsel %vm1678_vm12, %v2967_v18, %v2946_v19  ;;  %3534 = vmatprep.mubr.msk.bf16.mxu1 %vm3858_vm3, %v5044_v27  ;;  %v3187_v27 = vld [vmem:[%s4969_s7] ss:$0 sm:$0xff] }
 0x640   :  { %v2978_v41 = vrot.slane %v2970_v24, 4 }
 0x642   :  { %v2979_v11 = vsel %vm2974_vm13, %v2976_v44, %v2978_v41 }
 0x643   :  { %v2986_v10 = vpack.c.bf16 %v2979_v11, %v2979_v11 }
 0x646   :  { %3535 = vmatmul.mubr.msk.bf16.gmra.mrb[68].mxu1 %vm35_vm0, %v2986_v10 }
 0x677   :  { %v187_v29 = vpop.xlane.xlu0 %186 }
 0x678   :  { %v188_v38 = vmax.f32 %v187_v29, 1e-12 }
 0x67a   :  { %3855 = vrsqrt.f32 %v188_v38 }
 0x684   :  { %v3856_v8 = vpop.eup %3855 }
 0x685   :  { %v191_v37 = vrot.slane %v3856_v8, 1  ;;  %v194_v33 = vmul.f32 %v3856_v8, %v4856_v49 }
 0x687   :  { %v195_v17 = vmul.f32 %v191_v37, %v4858_v26 }
 0x689   :  { %v198_v0 = vrot.slane %v195_v17, 7 }
 0x68b   :  { %v199_v15 = vsel %vm57_vm1, %v198_v0, %v194_v33 }
 0x68c   :  { %201 = vst.msk [vmem:[%s4968_s10] sm:$0x3] %vm60_vm2, %v199_v15 }
 0x6b9   :  { %v3069_v36 = vpop.f32.mrb[60].mxu1 }
 0x6ba   :  { %v3070_v52 = vadd.f32 %v3187_v27, %v3069_v36  ;;  %v3528_v62 = vpop.f32.mrb[61].mxu1 }
 0x6bb   :  { %v3072_v14 = vpop.f32.mrb[62].mxu1 }
 0x6bc   :  { %3091 = vst.msk [vmem:[%s4970_s8] sm:$0xff] %vm35_vm0, %v3070_v52  ;;  %v3073_v49 = vadd.f32 %v3187_v27, %v3072_v14  ;;  %v3529_v26 = vpop.f32.mrb[63].mxu1 }
 0x6be   :  { %3092 = vst.msk [vmem:[%s4970_s8 + $0x8] sm:$0xff] %vm35_vm0, %v3073_v49 }
 0x711   :  { %v3077_v2 = vpop.f32.mrb[64].mxu1 }
 0x712   :  { %v3078_v30 = vadd.f32 %v3187_v27, %v3077_v2  ;;  %v3532_v22 = vpop.f32.mrb[65].mxu1 }
 0x713   :  { %v3080_v1 = vpop.f32.mrb[66].mxu1 }
 0x714   :  { %3094 = vst.msk [vmem:[%s4970_s8 + $0x10] sm:$0xf] %vm3093_vm14, %v3078_v30  ;;  %v3081_v20 = vadd.f32 %v3187_v27, %v3080_v1  ;;  %v3533_v55 = vpop.f32.mrb[67].mxu1 }
 0x715   :  { %3195 = vst.msk [vmem:[%s4970_s8 + $0x14] sm:$0xf0] %vm3096_vm15, %v3078_v30 }
 0x716   :  { %3196 = vst.msk [vmem:[%s4970_s8 + $0x1c] sm:$0xff] %vm35_vm0, %v3081_v20 }
 0x719   :  { %v3085_v59 = vpop.f32.mrb[68].mxu1 }
 0x71a   :  { %v3086_v25 = vadd.f32 %v3187_v27, %v3085_v59  ;;  %v3536_v21 = vpop.f32.mrb[69].mxu1 }
 0x71b   :  { %v3088_v6 = vpop.f32.mrb[70].mxu1 }
 0x71c   :  { %3197 = vst.msk [vmem:[%s4970_s8 + $0x24] sm:$0xff] %vm35_vm0, %v3086_v25  ;;  %v3537_v61 = vpop.f32.mrb[71].mxu1 }

</bundles_post_ra>
